<compile_context>
chip_gen: v5e
topology: v5e:2x2
jax: 0.10.0
libtpu: 0.0.40
codegen_flags: <defaults>
</compile_context>

<pallas_src>
import math
from collections import namedtuple

import numpy as np
import jax
import jax.numpy as jnp
from jax.experimental import pallas as pl
from jax.experimental.pallas import tpu as pltpu

C0_ELEC = 322.0637  # electrostatic constant, (kcal/mol)*A/e^2

ElecGlobalParams = namedtuple(
    "ElecGlobalParams",
    [
        "elec_sigmoidal_die_D",
        "elec_sigmoidal_die_D0",
        "elec_sigmoidal_die_S",
        "elec_min_dis",
        "elec_max_dis",
    ],
)


# ----------------------------------------------------------------------------- kernel
def _elec_pose_kernel(params_ref, x_ref, xt_ref, qc_ref, qr_ref, cp_ref,
                      out_ref, acc_ref):
    """Grid = (pose_tile, j_tile); one (TP poses) x (all i atoms) x (TJ j atoms) block.

    params_ref : SMEM (1, 6) f32 -> [D, D0, S, min_dis, max_dis, shift]
    x_ref      : VMEM (TP, N, 8)  f32  coords (xyz zero-padded to 8 lanes), i side
    xt_ref     : VMEM (TP, 8, TJ) f32  transposed coords, j-tile slice
    qc_ref     : VMEM (TP, N, 1)  f32  per-atom charge, column layout (atom_i)
    qr_ref     : VMEM (TP, 1, TJ) f32  per-atom charge, row layout (atom_j tile)
    cp_ref     : VMEM (TP, N, TJ) int8 count-pair code: 0->w=0, 1->w=0.2, 2->w=1.0
                                      (i<j triangle & atom validity already folded in)
    out_ref    : VMEM (1, TP, 128) f32 per-pose score broadcast across lanes
    acc_ref    : VMEM (TP, TJ)    f32  per-pose partial sums accumulated over j tiles
    """
    D = params_ref[0, 0]
    D0 = params_ref[0, 1]
    S = params_ref[0, 2]
    min_dis = params_ref[0, 3]
    max_dis = params_ref[0, 4]
    shift = params_ref[0, 5]  # 1 / (max_dis * sig_eps(max_dis)), hoisted scalar

    jt = pl.program_id(1)

    @pl.when(jt == 0)
    def _():
        acc_ref[...] = jnp.zeros_like(acc_ref)

    x = x_ref[...]    # [TP, N, 8]
    xt = xt_ref[...]  # [TP, 8, TJ]

    # pairwise squared distances: |xi|^2 + |xj|^2 - 2 xi.xj   (batched MXU matmul)
    gram = jnp.einsum("bik,bkj->bij", x, xt, preferred_element_type=jnp.float32)
    sq_i = jnp.sum(x * x, axis=2, keepdims=True)    # [TP, N, 1]
    sq_j = jnp.sum(xt * xt, axis=1, keepdims=True)  # [TP, 1, TJ]
    d2 = jnp.maximum(sq_i + sq_j - 2.0 * gram, 0.0)
    d = jnp.sqrt(d2)

    # sigmoidal distance-dependent dielectric Coulomb energy, shifted so E(max_dis)==0.
    # The clamp + hoisted scalar shift makes the energy ~0 for d >= max_dis, so the old
    # explicit `where(d >= max_dis, 0, e)` mask is dropped.
    # TODO(synk): tmol applies cubic-spline smoothing near min_dis/max_dis; here we use
    # the plain clamp + max_dis shift (same asymptotics, no boundary polynomials).
    dc = jnp.clip(d, min_dis, max_dis)
    rs = dc * S
    eps = D - 0.5 * (D - D0) * (2.0 + 2.0 * rs + rs * rs) * jnp.exp(-rs)
    # exact divide kept; pl.reciprocal(approx=True) is available but risks the 1e-3 check
    inv = 1.0 / (dc * eps) - shift

    # rebuild pair weight in-kernel from the int8 code + per-atom charges (rank-1 outer)
    code = cp_ref[...].astype(jnp.float32)
    w_cp = jnp.where(code > 1.5, 1.0, jnp.where(code > 0.5, 0.2, 0.0))
    w = qc_ref[...] * qr_ref[...] * w_cp

    e = (C0_ELEC * w) * inv
    acc_ref[...] += jnp.sum(e, axis=1)  # reduce over atom_i -> [TP, TJ]

    # lane-dense per-pose output (full 128-lane store); host reads lane 0.
    pose_sum = jnp.sum(acc_ref[...], axis=-1, keepdims=True)  # [TP, 1]
    out_ref[...] = jnp.broadcast_to(pose_sum[None, :, :], out_ref.shape)


def _elec_pallas_call(global_params, coords_p, coords_pt, q_col, q_row, cp_code, tp, tj):
    P_pad, N_pad, _ = coords_p.shape
    n_pose_tiles = P_pad // tp
    n_j_tiles = N_pad // tj
    return pl.pallas_call(
        _elec_pose_kernel,
        out_shape=jax.ShapeDtypeStruct((n_pose_tiles, tp, 128), jnp.float32),
        grid=(n_pose_tiles, n_j_tiles),
        in_specs=[
            pl.BlockSpec(memory_space=pltpu.MemorySpace.SMEM),       # global params
            pl.BlockSpec((tp, N_pad, 8), lambda p, j: (p, 0, 0)),    # coords (i side)
            pl.BlockSpec((tp, 8, tj), lambda p, j: (p, 0, j)),       # coords^T (j tile)
            pl.BlockSpec((tp, N_pad, 1), lambda p, j: (p, 0, 0)),    # q_i column
            pl.BlockSpec((tp, 1, tj), lambda p, j: (p, 0, j)),       # q_j row (j tile)
            pl.BlockSpec((tp, N_pad, tj), lambda p, j: (p, 0, j)),   # int8 cp code tile
        ],
        out_specs=pl.BlockSpec((1, tp, 128), lambda p, j: (p, 0, 0)),
        scratch_shapes=[pltpu.VMEM((tp, tj), jnp.float32)],
        compiler_params=pltpu.CompilerParams(
            dimension_semantics=("parallel", "arbitrary"),
            vmem_limit_bytes=48 * 1024 * 1024,
        ),
    )(global_params, coords_p, coords_pt, q_col, q_row, cp_code)


def _tiling(n_pad, n_poses):
    """Pose batching for small poses; lane-dense j tiling for large ones."""
    tp = max(1, min(8, 1024 // n_pad, n_poses))
    if n_pad % 512 == 0:
        tj = 512
    elif n_pad % 256 == 0:
        tj = 256
    else:
        tj = 128
    return tp, tj


# ----------------------------------------------------------------- glue (plain JAX)
def _build_pair_tables(
    pose_stack_block_coord_offset,
    pose_stack_block_types,
    pose_stack_inter_block_bondsep,
    bt_n_atoms,
    bt_partial_charge,
    bt_n_interblock_bonds,
    bt_inter_repr_path_distance,
    bt_intra_repr_path_distance,
    n_total_atoms,
):
    """Returns (atom_charge [P,N] f32, cp_code [P,N,N] int8).

    cp_code[p,i,j] = 2 if count-pair weight 1.0, 1 if weight 0.2, 0 otherwise,
    with the (i < j) triangle and atom-validity masks already folded in.
    """
    P, B = pose_stack_block_types.shape
    T, A = bt_partial_charge.shape
    C = bt_inter_repr_path_distance.shape[1]
    N = n_total_atoms
    BIG = jnp.int32(10000)

    bt = pose_stack_block_types
    bt_safe = jnp.maximum(bt, 0)
    a_idx = jnp.arange(A, dtype=jnp.int32)

    real = (bt[:, :, None] >= 0) & (
        a_idx[None, None, :] < bt_n_atoms[bt_safe][:, :, None]
    )  # [P,B,A]
    flat = pose_stack_block_coord_offset[:, :, None] + a_idx[None, None, :]
    flat_safe = jnp.where(real, flat, N)  # dump invalid atoms into slot N
    p_idx = jnp.broadcast_to(jnp.arange(P)[:, None, None], (P, B, A))

    def scatter(vals, fill, dtype):
        buf = jnp.full((P, N + 1), fill, dtype)
        buf = buf.at[p_idx, flat_safe].set(vals.astype(dtype))
        return buf[:, :N]

    atom_block = scatter(
        jnp.broadcast_to(jnp.arange(B, dtype=jnp.int32)[None, :, None], (P, B, A)),
        -1, jnp.int32)
    atom_local = scatter(
        jnp.broadcast_to(a_idx[None, None, :], (P, B, A)), 0, jnp.int32)
    atom_bt = scatter(
        jnp.broadcast_to(bt_safe[:, :, None], (P, B, A)), 0, jnp.int32)
    atom_real = scatter(real.astype(jnp.int32), 0, jnp.int32).astype(bool)
    atom_charge = scatter(
        jnp.where(real, bt_partial_charge[bt_safe], 0.0), 0.0, jnp.float32)

    # --- intra-block representative path distances
    same_block = (atom_block[:, :, None] == atom_block[:, None, :]) & (
        atom_block[:, :, None] >= 0
    )
    intra_path = bt_intra_repr_path_distance[
        atom_bt[:, :, None], atom_local[:, :, None], atom_local[:, None, :]
    ]  # [P,N,N]

    # --- inter-block: min over connection pairs of
    #       path(conn_c1 -> repr(i)) + bondsep(c1, c2) + path(conn_c2 -> repr(j))
    c_idx = jnp.arange(C, dtype=jnp.int32)
    conn_valid = c_idx[None, None, :] < bt_n_interblock_bonds[atom_bt][:, :, None]
    conn_path = bt_inter_repr_path_distance[
        atom_bt[:, :, None], c_idx[None, None, :], atom_local[:, :, None]
    ]  # [P,N,C]
    conn_path = jnp.where(conn_valid, conn_path, BIG)

    ibb = pose_stack_inter_block_bondsep[
        jnp.arange(P)[:, None, None, None, None],
        jnp.maximum(atom_block, 0)[:, :, None, None, None],
        jnp.maximum(atom_block, 0)[:, None, :, None, None],
        c_idx[None, None, None, :, None],
        c_idx[None, None, None, None, :],
    ]  # [P,N,N,C,C]
    inter_path = jnp.min(
        conn_path[:, :, None, :, None] + ibb + conn_path[:, None, :, None, :],
        axis=(3, 4),
    )

    path = jnp.where(same_block, intra_path, inter_path)
    path = jnp.minimum(path, 6)

    # count-pair code on representative-atom separation (2 -> w=1.0, 1 -> w=0.2, 0 -> w=0)
    code = jnp.where(path > 4, 2, jnp.where(path == 4, 1, 0))

    i_idx = jnp.arange(N)
    triangle = i_idx[:, None] < i_idx[None, :]
    pair_real = atom_real[:, :, None] & atom_real[:, None, :]
    mask = triangle[None, :, :] & pair_real
    code = jnp.where(mask, code, 0).astype(jnp.int8)

    return atom_charge, code


# ----------------------------------------------------------------------- the module
class ElecWholePoseScoringModule:
    def __init__(
        self,
        pose_stack_block_coord_offset,
        pose_stack_block_types,
        pose_stack_min_block_bondsep,
        pose_stack_inter_block_bondsep,
        bt_n_atoms,
        bt_partial_charge,
        bt_n_interblock_bonds,
        bt_atoms_forming_chemical_bonds,
        bt_inter_repr_path_distance,
        bt_intra_repr_path_distance,
        global_params,
    ):
        self.pose_stack_block_coord_offset = jnp.asarray(
            pose_stack_block_coord_offset, jnp.int32)
        self.pose_stack_block_types = jnp.asarray(pose_stack_block_types, jnp.int32)
        self.pose_stack_min_block_bondsep = jnp.asarray(
            pose_stack_min_block_bondsep, jnp.int32)
        self.pose_stack_inter_block_bondsep = jnp.asarray(
            pose_stack_inter_block_bondsep, jnp.int32)
        self.bt_n_atoms = jnp.asarray(bt_n_atoms, jnp.int32)
        self.bt_partial_charge = jnp.asarray(bt_partial_charge, jnp.float32)
        self.bt_n_interblock_bonds = jnp.asarray(bt_n_interblock_bonds, jnp.int32)
        self.bt_atoms_forming_chemical_bonds = jnp.asarray(
            bt_atoms_forming_chemical_bonds, jnp.int32)
        self.bt_inter_repr_path_distance = jnp.asarray(
            bt_inter_repr_path_distance, jnp.int32)
        self.bt_intra_repr_path_distance = jnp.asarray(
            bt_intra_repr_path_distance, jnp.int32)

        D = float(global_params.elec_sigmoidal_die_D)
        D0 = float(global_params.elec_sigmoidal_die_D0)
        S = float(global_params.elec_sigmoidal_die_S)
        min_dis = float(global_params.elec_min_dis)
        max_dis = float(global_params.elec_max_dis)
        # hoisted constant: 1 / (max_dis * sig_eps(max_dis))
        rs = max_dis * S
        eps_max = D - 0.5 * (D - D0) * (2.0 + 2.0 * rs + rs * rs) * math.exp(-rs)
        shift = 1.0 / (max_dis * eps_max)
        self.global_params = jnp.array(
            [[D, D0, S, min_dis, max_dis, shift]], dtype=jnp.float32)

    def __call__(self, coords, output_block_pair_energies=False):
        if output_block_pair_energies:
            # TODO(synk): per-block-pair energy output (shape [1, P, B, B]) not implemented.
            raise NotImplementedError("output_block_pair_energies=True not supported")

        coords = jnp.asarray(coords, jnp.float32)
        P, N, _ = coords.shape

        q, cp_code = _build_pair_tables(
            self.pose_stack_block_coord_offset,
            self.pose_stack_block_types,
            self.pose_stack_inter_block_bondsep,
            self.bt_n_atoms,
            self.bt_partial_charge,
            self.bt_n_interblock_bonds,
            self.bt_inter_repr_path_distance,
            self.bt_intra_repr_path_distance,
            N,
        )

        N_pad = max(128, ((N + 127) // 128) * 128)
        TP, TJ = _tiling(N_pad, P)
        P_pad = ((P + TP - 1) // TP) * TP

        xp = jnp.zeros((P_pad, N_pad, 8), jnp.float32).at[:P, :N, :3].set(coords)
        xpt = jnp.transpose(xp, (0, 2, 1))                     # [P_pad, 8, N_pad]
        qp = jnp.zeros((P_pad, N_pad), jnp.float32).at[:P, :N].set(q)
        cpp = jnp.zeros((P_pad, N_pad, N_pad), jnp.int8).at[:P, :N, :N].set(cp_code)

        out = _elec_pallas_call(
            self.global_params, xp, xpt, qp[:, :, None], qp[:, None, :], cpp, TP, TJ)
        scores = out[:, :, 0].reshape(-1)[:P]
        return scores[None, :]  # [1, n_poses]


# --------------------------------------------------------------------- reference
def _elec_reference(coords, q, cp_code, gp):
    D, D0, S, min_dis, max_dis = (gp[0, k] for k in range(5))
    cp_w = jnp.where(cp_code == 2, 1.0, jnp.where(cp_code == 1, 0.2, 0.0)).astype(
        jnp.float32)
    pair_coef = q[:, :, None] * q[:, None, :] * cp_w

    diff = coords[:, :, None, :] - coords[:, None, :, :]
    d = jnp.sqrt(jnp.maximum(jnp.sum(diff * diff, axis=-1), 0.0))

    def sig_eps(r):
        rs = r * S
        return D - 0.5 * (D - D0) * (2.0 + 2.0 * rs + rs * rs) * jnp.exp(-rs)

    dc = jnp.clip(d, min_dis, max_dis)
    inv = 1.0 / (dc * sig_eps(dc)) - 1.0 / (max_dis * sig_eps(max_dis))
    e = C0_ELEC * pair_coef * inv
    e = jnp.where(d >= max_dis, 0.0, e)
    return jnp.sum(e, axis=(1, 2))[None, :]


# --------------------------------------------------------------------------- main
if __name__ == "__main__":
    P, B, A, T, C = 2, 3, 8, 2, 2     # poses, blocks/pose, atoms/block-type, types, conns
    N = B * A                         # total (padded) atoms per pose

    key = jax.random.PRNGKey(0)
    k_coords, k_charge = jax.random.split(key, 2)

    coords = jax.random.uniform(k_coords, (P, N, 3), jnp.float32, 0.0, 8.0)

    bt_n_atoms = jnp.array([7, 8], jnp.int32)
    raw_q = jax.random.uniform(k_charge, (T, A), jnp.float32, -0.6, 0.6)
    atom_valid_t = jnp.arange(A)[None, :] < bt_n_atoms[:, None]
    bt_partial_charge = jnp.where(atom_valid_t, raw_q, 0.0)

    bt_n_interblock_bonds = jnp.array([2, 2], jnp.int32)
    bt_atoms_forming_chemical_bonds = jnp.array([[0, 6], [0, 7]], jnp.int32)

    # intra-block representative path distances: linear-chain topology, capped at 6
    ai = np.arange(A)
    intra = np.minimum(np.abs(ai[:, None] - ai[None, :]), 6).astype(np.int32)
    valid_np = np.asarray(atom_valid_t)
    bt_intra_repr_path_distance = jnp.array(
        np.where(valid_np[:, :, None] & valid_np[:, None, :], intra[None, :, :], 6),
        jnp.int32,
    )
    # path distance from each connection atom to each atom's representative
    conn_at = np.asarray(bt_atoms_forming_chemical_bonds)
    bt_inter_repr_path_distance = jnp.array(
        np.asarray(bt_intra_repr_path_distance)[
            np.arange(T)[:, None, None], conn_at[:, :, None], ai[None, None, :]
        ],
        jnp.int32,
    )

    pose_stack_block_types = jnp.array([[0, 1, 0], [1, 0, -1]], jnp.int32)
    pose_stack_block_coord_offset = jnp.broadcast_to(
        (jnp.arange(B, dtype=jnp.int32) * A)[None, :], (P, B)
    )

    ibb = np.full((P, B, B, C, C), 6, np.int32)
    for p in range(P):
        for b1 in range(B):
            for b2 in range(B):
                if b1 == b2:
                    ibb[p, b1, b2] = 0
                elif b2 == b1 + 1:
                    ibb[p, b1, b2, 1, 0] = 1   # upper conn of b1 to lower conn of b2
                elif b2 == b1 - 1:
                    ibb[p, b1, b2, 0, 1] = 1
    pose_stack_inter_block_bondsep = jnp.array(ibb)
    pose_stack_min_block_bondsep = jnp.min(pose_stack_inter_block_bondsep, axis=(3, 4))

    global_params = ElecGlobalParams(
        elec_sigmoidal_die_D=79.931,
        elec_sigmoidal_die_D0=6.648,
        elec_sigmoidal_die_S=0.441546,
        elec_min_dis=1.6,
        elec_max_dis=5.5,
    )

    module = ElecWholePoseScoringModule(
        pose_stack_block_coord_offset,
        pose_stack_block_types,
        pose_stack_min_block_bondsep,
        pose_stack_inter_block_bondsep,
        bt_n_atoms,
        bt_partial_charge,
        bt_n_interblock_bonds,
        bt_atoms_forming_chemical_bonds,
        bt_inter_repr_path_distance,
        bt_intra_repr_path_distance,
        global_params,
    )

    scores = module(coords)
    scores = jax.block_until_ready(scores)

    # sanity check vs. a plain-JAX reference of the same math
    q_ref, code_ref = _build_pair_tables(
        module.pose_stack_block_coord_offset,
        module.pose_stack_block_types,
        module.pose_stack_inter_block_bondsep,
        module.bt_n_atoms,
        module.bt_partial_charge,
        module.bt_n_interblock_bonds,
        module.bt_inter_repr_path_distance,
        module.bt_intra_repr_path_distance,
        N,
    )
    ref = _elec_reference(coords, q_ref, code_ref, module.global_params)
    assert scores.shape == (1, P) and scores.dtype == jnp.float32
    np.testing.assert_allclose(np.asarray(scores), np.asarray(ref), rtol=1e-3, atol=1e-3)

    print("KERNEL_OK")
</pallas_src>

<mosaic_0001>
module attributes {stable_mosaic.version = 11 : i64} {
  func.func @_elec_pose_kernel(%arg0: i32, %arg1: i32, %arg2: memref<1x6xf32, #tpu.memory_space<smem>>, %arg3: memref<2x128x8xf32, #tpu.memory_space<vmem>>, %arg4: memref<2x8x128xf32, #tpu.memory_space<vmem>>, %arg5: memref<2x128x1xf32, #tpu.memory_space<vmem>>, %arg6: memref<2x1x128xf32, #tpu.memory_space<vmem>>, %arg7: memref<2x128x128xi8, #tpu.memory_space<vmem>>, %arg8: memref<1x2x128xf32, #tpu.memory_space<vmem>>, %arg9: memref<2x128xf32, #tpu.memory_space<vmem>>) attributes {dimension_semantics = [#tpu.dimension_semantics<parallel>, #tpu.dimension_semantics<arbitrary>], iteration_bounds = array<i64: 1, 1>, scalar_prefetch = 0 : i64, scratch_operands = 1 : i64, tpu.core_type = #tpu.core_type<tc>, window_params = [{transform_indices = @transform_0, window_bounds = array<i64: 1, 6>}, {transform_indices = @transform_1, window_bounds = array<i64: 2, 128, 8>}, {transform_indices = @transform_2, window_bounds = array<i64: 2, 8, 128>}, {transform_indices = @transform_3, window_bounds = array<i64: 2, 128, 1>}, {transform_indices = @transform_4, window_bounds = array<i64: 2, 1, 128>}, {transform_indices = @transform_5, window_bounds = array<i64: 2, 128, 128>}, {transform_indices = @transform_6, window_bounds = array<i64: 1, 2, 128>}]} {
    %c0 = arith.constant 0 : index
    %c0_0 = arith.constant 0 : index
    %0 = memref.load %arg2[%c0, %c0_0] : memref<1x6xf32, #tpu.memory_space<smem>>
    %c0_1 = arith.constant 0 : index
    %c1 = arith.constant 1 : index
    %1 = memref.load %arg2[%c0_1, %c1] : memref<1x6xf32, #tpu.memory_space<smem>>
    %c0_2 = arith.constant 0 : index
    %c2 = arith.constant 2 : index
    %2 = memref.load %arg2[%c0_2, %c2] : memref<1x6xf32, #tpu.memory_space<smem>>
    %c0_3 = arith.constant 0 : index
    %c3 = arith.constant 3 : index
    %3 = memref.load %arg2[%c0_3, %c3] : memref<1x6xf32, #tpu.memory_space<smem>>
    %c0_4 = arith.constant 0 : index
    %c4 = arith.constant 4 : index
    %4 = memref.load %arg2[%c0_4, %c4] : memref<1x6xf32, #tpu.memory_space<smem>>
    %c0_5 = arith.constant 0 : index
    %c5 = arith.constant 5 : index
    %5 = memref.load %arg2[%c0_5, %c5] : memref<1x6xf32, #tpu.memory_space<smem>>
    %c0_i32 = arith.constant 0 : i32
    %6 = arith.cmpi eq, %arg1, %c0_i32 : i32
    %7 = arith.extui %6 : i1 to i32
    %c0_i32_6 = arith.constant 0 : i32
    %8 = arith.cmpi ne, %7, %c0_i32_6 : i32
    scf.if %8 {
      %cst_48 = arith.constant 0.000000e+00 : f32
      %85 = vector.broadcast %cst_48 : f32 to vector<2x128xf32>
      %c0_49 = arith.constant 0 : index
      %c0_50 = arith.constant 0 : index
      %86 = vector.load %arg9[%c0_49, %c0_50] : memref<2x128xf32, #tpu.memory_space<vmem>>, vector<2x128xf32>
      tpu.vector_store %arg9[%c0_49, %c0_50], %85 {strides = array<i32>} : memref<2x128xf32, #tpu.memory_space<vmem>>, vector<2x128xf32>,
    } else {
    }
    %c0_7 = arith.constant 0 : index
    %c0_8 = arith.constant 0 : index
    %c0_9 = arith.constant 0 : index
    %9 = vector.load %arg3[%c0_7, %c0_8, %c0_9] : memref<2x128x8xf32, #tpu.memory_space<vmem>>, vector<2x128x8xf32>
    %c0_10 = arith.constant 0 : index
    %c0_11 = arith.constant 0 : index
    %c0_12 = arith.constant 0 : index
    %10 = vector.load %arg4[%c0_10, %c0_11, %c0_12] : memref<2x8x128xf32, #tpu.memory_space<vmem>>, vector<2x8x128xf32>
    "tpu.trace_start"() <{level = 10 : i32, message = "bik,bkj->bij"}> : () -> ()
    %cst = arith.constant dense<0.000000e+00> : vector<2x128x128xf32>
    %11 = tpu.matmul %9, %10, %cst {dimension_numbers = #tpu.dot_dimension_numbers<[2], [1], [1], [2], [0, 0, 0, 1, 1, 2], [0], [0]>} : vector<2x128x8xf32>, vector<2x8x128xf32>, vector<2x128x128xf32> -> vector<2x128x128xf32>
    "tpu.trace_stop"() : () -> ()
    %12 = arith.mulf %9, %9 : vector<2x128x8xf32>
    %cst_13 = arith.constant dense<0.000000e+00> : vector<2x128xf32>
    %13 = vector.multi_reduction <add>, %12, %cst_13 [2] : vector<2x128x8xf32> to vector<2x128xf32>
    %14 = vector.shape_cast %13 : vector<2x128xf32> to vector<2x128x1xf32>
    %15 = arith.mulf %10, %10 : vector<2x8x128xf32>
    %cst_14 = arith.constant dense<0.000000e+00> : vector<2x128xf32>
    %16 = vector.multi_reduction <add>, %15, %cst_14 [1] : vector<2x8x128xf32> to vector<2x128xf32>
    %17 = vector.shape_cast %16 : vector<2x128xf32> to vector<2x1x128xf32>
    %18 = vector.broadcast %14 : vector<2x128x1xf32> to vector<2x128x128xf32>
    %19 = vector.broadcast %17 : vector<2x1x128xf32> to vector<2x128x128xf32>
    %20 = arith.addf %18, %19 : vector<2x128x128xf32>
    %cst_15 = arith.constant 2.000000e+00 : f32
    %21 = vector.broadcast %cst_15 : f32 to vector<2x128x128xf32>
    %22 = arith.mulf %21, %11 : vector<2x128x128xf32>
    %23 = arith.subf %20, %22 : vector<2x128x128xf32>
    %cst_16 = arith.constant 0.000000e+00 : f32
    %24 = vector.broadcast %cst_16 : f32 to vector<2x128x128xf32>
    %25 = arith.maximumf %23, %24 : vector<2x128x128xf32>
    %26 = math.sqrt %25 : vector<2x128x128xf32>
    %27 = vector.broadcast %3 : f32 to vector<2x128x128xf32>
    %28 = arith.maximumf %27, %26 : vector<2x128x128xf32>
    %29 = vector.broadcast %4 : f32 to vector<2x128x128xf32>
    %30 = arith.minimumf %29, %28 : vector<2x128x128xf32>
    %31 = vector.broadcast %2 : f32 to vector<2x128x128xf32>
    %32 = arith.mulf %30, %31 : vector<2x128x128xf32>
    %33 = arith.subf %0, %1 : f32
    %cst_17 = arith.constant 5.000000e-01 : f32
    %34 = arith.mulf %cst_17, %33 : f32
    %cst_18 = arith.constant 2.000000e+00 : f32
    %35 = vector.broadcast %cst_18 : f32 to vector<2x128x128xf32>
    %36 = arith.mulf %35, %32 : vector<2x128x128xf32>
    %cst_19 = arith.constant 2.000000e+00 : f32
    %37 = vector.broadcast %cst_19 : f32 to vector<2x128x128xf32>
    %38 = arith.addf %37, %36 : vector<2x128x128xf32>
    %39 = arith.mulf %32, %32 : vector<2x128x128xf32>
    %40 = arith.addf %38, %39 : vector<2x128x128xf32>
    %41 = vector.broadcast %34 : f32 to vector<2x128x128xf32>
    %42 = arith.mulf %41, %40 : vector<2x128x128xf32>
    %cst_20 = arith.constant 0.000000e+00 : f32
    %43 = vector.broadcast %cst_20 : f32 to vector<2x128x128xf32>
    %44 = arith.subf %43, %32 : vector<2x128x128xf32>
    %45 = math.exp %44 : vector<2x128x128xf32>
    %46 = arith.mulf %42, %45 : vector<2x128x128xf32>
    %47 = vector.broadcast %0 : f32 to vector<2x128x128xf32>
    %48 = arith.subf %47, %46 : vector<2x128x128xf32>
    %49 = arith.mulf %30, %48 : vector<2x128x128xf32>
    %cst_21 = arith.constant 1.000000e+00 : f32
    %50 = vector.broadcast %cst_21 : f32 to vector<2x128x128xf32>
    %51 = arith.divf %50, %49 : vector<2x128x128xf32>
    %52 = vector.broadcast %5 : f32 to vector<2x128x128xf32>
    %53 = arith.subf %51, %52 : vector<2x128x128xf32>
    %c0_22 = arith.constant 0 : index
    %c0_23 = arith.constant 0 : index
    %c0_24 = arith.constant 0 : index
    %54 = vector.load %arg7[%c0_22, %c0_23, %c0_24] : memref<2x128x128xi8, #tpu.memory_space<vmem>>, vector<2x128x128xi8>
    %55 = arith.sitofp %54 : vector<2x128x128xi8> to vector<2x128x128xf32>
    %cst_25 = arith.constant 1.500000e+00 : f32
    %56 = vector.broadcast %cst_25 : f32 to vector<2x128x128xf32>
    %57 = arith.cmpf ogt, %55, %56 : vector<2x128x128xf32>
    %cst_26 = arith.constant 5.000000e-01 : f32
    %58 = vector.broadcast %cst_26 : f32 to vector<2x128x128xf32>
    %59 = arith.cmpf ogt, %55, %58 : vector<2x128x128xf32>
    %cst_27 = arith.constant 2.000000e-01 : f32
    %cst_28 = arith.constant 0.000000e+00 : f32
    %60 = vector.broadcast %cst_27 : f32 to vector<2x128x128xf32>
    %61 = vector.broadcast %cst_28 : f32 to vector<2x128x128xf32>
    %62 = arith.select %59, %60, %61 : vector<2x128x128xi1>, vector<2x128x128xf32>
    %cst_29 = arith.constant 1.000000e+00 : f32
    %63 = vector.broadcast %cst_29 : f32 to vector<2x128x128xf32>
    %64 = arith.select %57, %63, %62 : vector<2x128x128xi1>, vector<2x128x128xf32>
    %c0_30 = arith.constant 0 : index
    %c0_31 = arith.constant 0 : index
    %c0_32 = arith.constant 0 : index
    %65 = vector.load %arg5[%c0_30, %c0_31, %c0_32] : memref<2x128x1xf32, #tpu.memory_space<vmem>>, vector<2x128x1xf32>
    %c0_33 = arith.constant 0 : index
    %c0_34 = arith.constant 0 : index
    %c0_35 = arith.constant 0 : index
    %66 = vector.load %arg6[%c0_33, %c0_34, %c0_35] : memref<2x1x128xf32, #tpu.memory_space<vmem>>, vector<2x1x128xf32>
    %67 = vector.broadcast %65 : vector<2x128x1xf32> to vector<2x128x128xf32>
    %68 = vector.broadcast %66 : vector<2x1x128xf32> to vector<2x128x128xf32>
    %69 = arith.mulf %67, %68 : vector<2x128x128xf32>
    %70 = arith.mulf %69, %64 : vector<2x128x128xf32>
    %cst_36 = arith.constant 322.06369 : f32
    %71 = vector.broadcast %cst_36 : f32 to vector<2x128x128xf32>
    %72 = arith.mulf %71, %70 : vector<2x128x128xf32>
    %73 = arith.mulf %72, %53 : vector<2x128x128xf32>
    %c0_37 = arith.constant 0 : index
    %c0_38 = arith.constant 0 : index
    %74 = vector.load %arg9[%c0_37, %c0_38] : memref<2x128xf32, #tpu.memory_space<vmem>>, vector<2x128xf32>
    %cst_39 = arith.constant dense<0.000000e+00> : vector<2x128xf32>
    %75 = vector.multi_reduction <add>, %73, %cst_39 [1] : vector<2x128x128xf32> to vector<2x128xf32>
    %76 = arith.addf %74, %75 : vector<2x128xf32>
    %c0_40 = arith.constant 0 : index
    %c0_41 = arith.constant 0 : index
    %77 = vector.load %arg9[%c0_40, %c0_41] : memref<2x128xf32, #tpu.memory_space<vmem>>, vector<2x128xf32>
    tpu.vector_store %arg9[%c0_40, %c0_41], %76 {strides = array<i32>} : memref<2x128xf32, #tpu.memory_space<vmem>>, vector<2x128xf32>,
    %c0_42 = arith.constant 0 : index
    %c0_43 = arith.constant 0 : index
    %78 = vector.load %arg9[%c0_42, %c0_43] : memref<2x128xf32, #tpu.memory_space<vmem>>, vector<2x128xf32>
    %cst_44 = arith.constant dense<0.000000e+00> : vector<2xf32>
    %79 = vector.multi_reduction <add>, %78, %cst_44 [1] : vector<2x128xf32> to vector<2xf32>
    %80 = vector.shape_cast %79 : vector<2xf32> to vector<2x1xf32>
    %81 = vector.shape_cast %80 : vector<2x1xf32> to vector<1x2x1xf32>
    %82 = vector.shape_cast %81 : vector<1x2x1xf32> to vector<1x2x1xf32>
    %83 = vector.broadcast %82 : vector<1x2x1xf32> to vector<1x2x128xf32>
    %c0_45 = arith.constant 0 : index
    %c0_46 = arith.constant 0 : index
    %c0_47 = arith.constant 0 : index
    %84 = vector.load %arg8[%c0_45, %c0_46, %c0_47] : memref<1x2x128xf32, #tpu.memory_space<vmem>>, vector<1x2x128xf32>
    tpu.vector_store %arg8[%c0_45, %c0_46, %c0_47], %83 {strides = array<i32>} : memref<1x2x128xf32, #tpu.memory_space<vmem>>, vector<1x2x128xf32>,
    return
  }
  func.func @transform_0(%arg0: i32, %arg1: i32) -> (i32, i32) {
    %c0_i32 = arith.constant 0 : i32
    %c0_i32_0 = arith.constant 0 : i32
    %c0_i32_1 = arith.constant 0 : i32
    return %c0_i32, %c0_i32_0 : i32, i32
  }
  func.func @transform_1(%arg0: i32, %arg1: i32) -> (i32, i32, i32) {
    %c0_i32 = arith.constant 0 : i32
    %c0_i32_0 = arith.constant 0 : i32
    %c0_i32_1 = arith.constant 0 : i32
    return %arg0, %c0_i32, %c0_i32_0 : i32, i32, i32
  }
  func.func @transform_2(%arg0: i32, %arg1: i32) -> (i32, i32, i32) {
    %c0_i32 = arith.constant 0 : i32
    %c0_i32_0 = arith.constant 0 : i32
    return %arg0, %c0_i32, %arg1 : i32, i32, i32
  }
  func.func @transform_3(%arg0: i32, %arg1: i32) -> (i32, i32, i32) {
    %c0_i32 = arith.constant 0 : i32
    %c0_i32_0 = arith.constant 0 : i32
    %c0_i32_1 = arith.constant 0 : i32
    return %arg0, %c0_i32, %c0_i32_0 : i32, i32, i32
  }
  func.func @transform_4(%arg0: i32, %arg1: i32) -> (i32, i32, i32) {
    %c0_i32 = arith.constant 0 : i32
    %c0_i32_0 = arith.constant 0 : i32
    return %arg0, %c0_i32, %arg1 : i32, i32, i32
  }
  func.func @transform_5(%arg0: i32, %arg1: i32) -> (i32, i32, i32) {
    %c0_i32 = arith.constant 0 : i32
    %c0_i32_0 = arith.constant 0 : i32
    return %arg0, %c0_i32, %arg1 : i32, i32, i32
  }
  func.func @transform_6(%arg0: i32, %arg1: i32) -> (i32, i32, i32) {
    %c0_i32 = arith.constant 0 : i32
    %c0_i32_0 = arith.constant 0 : i32
    %c0_i32_1 = arith.constant 0 : i32
    return %arg0, %c0_i32, %c0_i32_0 : i32, i32, i32
  }
}

</mosaic_0001>

<bundles_post_ra>
// kernel: tpu_custom_call.1
= control target key start
LH: loop header
LB: loop body
LE: loop exit
PB: predicated region body
PF: predicated region fallthrough
CT: control target
= control target key end

     0   :  { %11 = vsyncpa [#allocation5], 0  ;;  %s5504_s0 = inlined_call_operand.vmem [shape: f32[1,6], index: 0, kind: input, shape index: {}]   ;;  %s5505_s1 = inlined_call_operand.vmem [shape: f32[2,128,8], index: 1, kind: input, shape index: {}]   ;;  %s5506_s2 = inlined_call_operand.vmem [shape: f32[2,8,128], index: 2, kind: input, shape index: {}]   ;;  %s5507_s3 = inlined_call_operand.vmem [shape: f32[2,128,1], index: 3, kind: input, shape index: {}]   ;;  %s5508_s4 = inlined_call_operand.vmem [shape: f32[2,1,128], index: 4, kind: input, shape index: {}]   ;;  %s5509_s5 = inlined_call_operand.vmem [shape: s8[2,128,128], index: 5, kind: input, shape index: {}]   ;;  %s5510_s6 = inlined_call_operand.hbm [shape: f32[1,2,128], index: 6, kind: output, shape index: {}]  }
   0x1   :  { %12 = vsyncpa [#allocation4], 0  ;;  %s18_s23 = sshll.u32 %s5504_s0, 4  ;;  %s2816_s24 = smov [#allocation3]   ;;  %s19_s23 = int_to_ptr.vmem [resolvable:$true] %s18_s23 }
   0x2   :  { %21 = dma.vmem_to_smem %s19_s23, 16, %s2816_s24, [#allocation5]  }
   0x3   :  { %2812 = dma.done.wait [#allocation5], 16  }
   0x4   :  { %2813 = vsyncadd [#allocation5], 4294967280 }
   0x5   :  { %36 = sfence }
   0x6   :  { %v2861_v0 = vld [vmem:[%s5506_s2] sm:$0xff]  ;;  %v2866_v1 = vld [vmem:[%s5506_s2 + $0x8] sm:$0xff]  ;;  %vm82_vm0 = vcmask 64512   ;;  %v50_v8 = vld [vmem:[%s5505_s1 + $0x10] sm:$0xff]  ;;  %s3601_s24 = sld [smem:[#allocation3 + $0x4]]  ;;  %s2522_s8 = sshll.u32 %s5510_s6, 4  ;;  %s2523_s8 = int_to_ptr.hbm [resolvable:$true] %s2522_s8 }
   0x7   :  { %v48_v2 = vld [vmem:[%s5505_s1] sm:$0xff]  ;;  %146 = vmatpush.msra.mxu0 %v2861_v0  ;;  %2569 = vmatpush.msra.mxu2 %v2861_v0  ;;  %v49_v9 = vld [vmem:[%s5505_s1 + $0x8] sm:$0xff]  ;;  %v311_v10 = vmul.f32 %v50_v8, %v50_v8  ;;  %v51_v15 = vld [vmem:[%s5505_s1 + $0x18] sm:$0xff]  ;;  %s3618_s25 = sld [smem:[#allocation3 + $0x2]] }
   0x8   :  { %v56_v3 = vld [vmem:[%s5505_s1 + $0x40] sm:$0xff]  ;;  %v309_v6 = vmul.f32 %v48_v2, %v48_v2  ;;  %259 = vmatpush.msra.mxu1 %v2866_v1  ;;  %2537 = vmatmul.msk.f32.vlgmr.msra.gmra.mxu0 %vm82_vm0, %v48_v2  ;;  %v2908_v13 = vld [vmem:[%s5505_s1 + $0x28] sm:$0xff]  ;;  %v310_v17 = vmul.f32 %v49_v9, %v49_v9  ;;  %v312_v19 = vmul.f32 %v51_v15, %v51_v15  ;;  %v2939_v25 = vld [vmem:[%s5505_s1 + $0x30] sm:$0xff]  ;;  %s3664_s26 = sld [smem:[#allocation3]] }
   0x9   :  { %v2879_v4 = vld [vmem:[%s5505_s1 + $0x80] sm:$0xff]  ;;  %2545 = vmatmul.msk.f32.vlgmr.msra.gmra.mxu2 %vm82_vm0, %v56_v3  ;;  %2570 = vmatpush.msra.mxu3 %v2866_v1  ;;  %v347_v16 = vsel %vm82_vm0, %v311_v10, 0.0  ;;  %v314_v18 = vmul.f32 %v2908_v13, %v2908_v13  ;;  %v57_v20 = vld [vmem:[%s5505_s1 + $0x48] sm:$0xff]  ;;  %v2948_v27 = vld [vmem:[%s5505_s1 + $0x38] sm:$0xff]  ;;  %v315_v28 = vmul.f32 %v2939_v25, %v2939_v25  ;;  %v317_v29 = vmul.f32 %v56_v3, %v56_v3  ;;  %s3667_s27 = sld [smem:[#allocation3 + $0x1]] }
   0xa   :  { %v2884_v5 = vld [vmem:[%s5505_s1 + $0x20] sm:$0xff]  ;;  %2553 = vmatmul.msk.f32.vlgmr.msra.gmra.mxu1 %vm82_vm0, %v2879_v4  ;;  %v341_v11 = vsel %vm82_vm0, %v309_v6, 0.0  ;;  %348 = vadd.xlane.f32.xlu1 %v347_v16  ;;  %v2926_v21 = vld [vmem:[%s5505_s1 + $0x88] sm:$0xff]  ;;  %v344_v22 = vsel %vm82_vm0, %v310_v17, 0.0  ;;  %v350_v26 = vsel %vm82_vm0, %v312_v19, 0.0  ;;  %v316_v30 = vmul.f32 %v2948_v27, %v2948_v27  ;;  %v58_v31 = vld [vmem:[%s5505_s1 + $0x50] sm:$0xff] }
   0xb   :  { %v313_v7 = vmul.f32 %v2884_v5, %v2884_v5  ;;  %v2903_v12 = vld [vmem:[%s5505_s1 + $0xc0] sm:$0xff]  ;;  %342 = vadd.xlane.f32.xlu0 %v341_v11  ;;  %v356_v23 = vsel %vm82_vm0, %v314_v18, 0.0  ;;  %v2934_v24 = vld [vmem:[%s5505_s1 + $0xc8] sm:$0xff]  ;;  %v66_v32 = vld [vmem:[%s5505_s1 + $0x90] sm:$0xff]  ;;  %v359_v33 = vsel %vm82_vm0, %v315_v28, 0.0  ;;  %v365_v34 = vsel %vm82_vm0, %v317_v29, 0.0 }
   0xc   :  { %2561 = vmatmul.msk.f32.vlgmr.msra.gmra.mxu3 %vm82_vm0, %v2903_v12  ;;  %v2968_v35 = vld [vmem:[%s5505_s1 + $0xd0] sm:$0xff]  ;;  %v362_v36 = vsel %vm82_vm0, %v316_v30, 0.0  ;;  %v59_v37 = vld [vmem:[%s5505_s1 + $0x58] sm:$0xff]  ;;  %v318_v38 = vmul.f32 %v57_v20, %v57_v20  ;;  %v319_v40 = vmul.f32 %v58_v31, %v58_v31  ;;  %v60_v44 = vld [vmem:[%s5505_s1 + $0x60] sm:$0xff]  ;;  %v326_v59 = vmul.f32 %v2926_v21, %v2926_v21  ;;  %s3854_s7 = sld [smem:[#allocation3 + $0x5]] }
   0xd   :  { %v353_v14 = vsel %vm82_vm0, %v313_v7, 0.0  ;;  %v320_v39 = vmul.f32 %v59_v37, %v59_v37  ;;  %v67_v41 = vld [vmem:[%s5505_s1 + $0x98] sm:$0xff]  ;;  %v62_v47 = vld [vmem:[%s5505_s1 + $0x70] sm:$0xff]  ;;  %v61_v48 = vld [vmem:[%s5505_s1 + $0x68] sm:$0xff]  ;;  %v321_v49 = vmul.f32 %v60_v44, %v60_v44  ;;  %v325_v60 = vmul.f32 %v2879_v4, %v2879_v4 }
   0xe   :  { %354 = vadd.xlane.f32.xlu2 %v353_v14  ;;  %v368_v42 = vsel %vm82_vm0, %v318_v38, 0.0  ;;  %v2990_v45 = vld [vmem:[%s5505_s1 + $0xd8] sm:$0xff]  ;;  %v371_v46 = vsel %vm82_vm0, %v319_v40, 0.0  ;;  %v323_v50 = vmul.f32 %v62_v47, %v62_v47  ;;  %v322_v51 = vmul.f32 %v61_v48, %v61_v48  ;;  %v68_v52 = vld [vmem:[%s5505_s1 + $0xa0] sm:$0xff]  ;;  %v69_v61 = vld [vmem:[%s5505_s1 + $0xa8] sm:$0xff] }
   0xf   :  { %v374_v43 = vsel %vm82_vm0, %v320_v39, 0.0  ;;  %v377_v53 = vsel %vm82_vm0, %v321_v49, 0.0  ;;  %v3013_v55 = vld [vmem:[%s5505_s1 + $0xe0] sm:$0xff]  ;;  %v63_v56 = vld [vmem:[%s5505_s1 + $0x78] sm:$0xff]  ;;  %v392_v63 = vsel %vm82_vm0, %v326_v59, 0.0  ;;  %v77_v2 = vld [vmem:[%s5505_s1 + $0xe8] sm:$0xff]  ;;  %v327_v4 = vmul.f32 %v66_v32, %v66_v32  ;;  %s1062_s28 = ssub.f32 %s3664_s26, %s3667_s27 }
  0x10   :  { %2538 = vmatmul.msk.f32.gmra.mxu0 %vm82_vm0, %v49_v9  ;;  %v383_v54 = vsel %vm82_vm0, %v323_v50, 0.0  ;;  %v380_v57 = vsel %vm82_vm0, %v322_v51, 0.0  ;;  %v324_v58 = vmul.f32 %v63_v56, %v63_v56  ;;  %v389_v3 = vsel %vm82_vm0, %v325_v60, 0.0  ;;  %v70_v7 = vld [vmem:[%s5505_s1 + $0xb0] sm:$0xff]  ;;  %v2131_v39 = vld [vmem:[%s5507_s3] sm:$0xff]  ;;  %v2132_v40 = vld [vmem:[%s5507_s3 + $0x8] sm:$0xff] }
  0x11   :  { %2546 = vmatmul.msk.f32.gmra.mxu2 %vm82_vm0, %v57_v20  ;;  %v328_v6 = vmul.f32 %v67_v41, %v67_v41  ;;  %v78_v10 = vld [vmem:[%s5505_s1 + $0xf0] sm:$0xff]  ;;  %v330_v14 = vmul.f32 %v69_v61, %v69_v61  ;;  %v331_v16 = vmul.f32 %v70_v7, %v70_v7  ;;  %v2817_v17 = vmov 0   ;;  %v79_v20 = vld [vmem:[%s5505_s1 + $0xf8] sm:$0xff]  ;;  %v2147_v49 = vld [vmem:[%s5507_s3 + $0x80] sm:$0xff]  ;;  %s1063_s29 = smul.f32 0.5, %s1062_s28 }
  0x12   :  { %2554 = vmatmul.msk.f32.gmra.mxu1 %vm82_vm0, %v2926_v21  ;;  %351 = vadd.xlane.f32.xlu1 %v350_v26  ;;  %v386_v62 = vsel %vm82_vm0, %v324_v58, 0.0  ;;  %v336_v29 = vmul.f32 %v2990_v45, %v2990_v45  ;;  %v337_v30 = vmul.f32 %v3013_v55, %v3013_v55 }
  0x13   :  { %345 = vadd.xlane.f32.xlu0 %v344_v22  ;;  %v398_v11 = vsel %vm82_vm0, %v328_v6, 0.0  ;;  %2575 = vset.pattern.permute.xlu2 %v2817_v17  ;;  %v404_v18 = vsel %vm82_vm0, %v330_v14, 0.0  ;;  %v407_v21 = vsel %vm82_vm0, %v331_v16, 0.0  ;;  %v333_v22 = vmul.f32 %v2903_v12, %v2903_v12 }
  0x14   :  { %2562 = vmatmul.msk.f32.gmra.mxu3 %vm82_vm0, %v2934_v24  ;;  %2576 = vset.pattern.permute.xlu0 %v2817_v17  ;;  %v338_v12 = vmul.f32 %v77_v2, %v77_v2 }
  0x15   :  { %2577 = vset.pattern.permute.xlu1 %v2817_v17  ;;  %v413_v26 = vsel %vm82_vm0, %v333_v22, 0.0  ;;  %v2158_v22 = vld [vmem:[%s5507_s3 + $0xd8] sm:$0xff] }
  0x16   :  { %357 = vadd.xlane.f32.xlu2 %v356_v23  ;;  %v335_v23 = vmul.f32 %v2968_v35, %v2968_v35 }
  0x18   :  { %2539 = vmatmul.msk.f32.gmra.mxu0 %vm82_vm0, %v50_v8  ;;  %v395_v8 = vsel %vm82_vm0, %v327_v4, 0.0 }
  0x19   :  { %2547 = vmatmul.msk.f32.gmra.mxu2 %vm82_vm0, %v58_v31  ;;  %v422_v31 = vsel %vm82_vm0, %v336_v29, 0.0 }
  0x1a   :  { %2555 = vmatmul.msk.f32.gmra.mxu1 %vm82_vm0, %v66_v32  ;;  %363 = vadd.xlane.f32.xlu1 %v362_v36  ;;  %v425_v32 = vsel %vm82_vm0, %v337_v30, 0.0 }
  0x1b   :  { %360 = vadd.xlane.f32.xlu0 %v359_v33  ;;  %v339_v33 = vmul.f32 %v78_v10, %v78_v10 }
  0x1c   :  { %2563 = vmatmul.msk.f32.gmra.mxu3 %vm82_vm0, %v2968_v35 }
  0x1d   :  { %v431_v35 = vsel %vm82_vm0, %v339_v33, 0.0 }
  0x1e   :  { %366 = vadd.xlane.f32.xlu2 %v365_v34  ;;  %v340_v34 = vmul.f32 %v79_v20, %v79_v20 }
  0x20   :  { %2540 = vmatmul.msk.f32.gmra.mxu0 %vm82_vm0, %v51_v15  ;;  %v434_v36 = vsel %vm82_vm0, %v340_v34, 0.0 }
  0x21   :  { %2548 = vmatmul.msk.f32.gmra.mxu2 %vm82_vm0, %v59_v37  ;;  %v437_v37 = vmul.f32 %v2861_v0, %v2861_v0  ;;  %v2133_v0 = vld [vmem:[%s5507_s3 + $0x10] sm:$0xff] }
  0x22   :  { %2556 = vmatmul.msk.f32.gmra.mxu1 %vm82_vm0, %v67_v41  ;;  %372 = vadd.xlane.f32.xlu1 %v371_v46 }
  0x23   :  { %369 = vadd.xlane.f32.xlu0 %v368_v42  ;;  %v439_v38 = vrot.slane %v437_v37, 4 }
  0x24   :  { %2564 = vmatmul.msk.f32.gmra.mxu3 %vm82_vm0, %v2990_v45 }
  0x25   :  { %v440_v41 = vadd.f32 %v439_v38, %v437_v37 }
  0x26   :  { %375 = vadd.xlane.f32.xlu2 %v374_v43  ;;  %v2134_v43 = vld [vmem:[%s5507_s3 + $0x18] sm:$0xff] }
  0x27   :  { %v441_v42 = vrot.slane %v440_v41, 2 }
  0x28   :  { %2541 = vmatmul.msk.f32.gmra.mxu0 %vm82_vm0, %v2884_v5  ;;  %v329_v5 = vmul.f32 %v68_v52, %v68_v52 }
  0x29   :  { %2549 = vmatmul.msk.f32.gmra.mxu2 %vm82_vm0, %v60_v44  ;;  %v2139_v44 = vld [vmem:[%s5507_s3 + $0x40] sm:$0xff]  ;;  %v442_v45 = vadd.f32 %v441_v42, %v440_v41 }
  0x2a   :  { %2557 = vmatmul.msk.f32.gmra.mxu1 %vm82_vm0, %v68_v52  ;;  %381 = vadd.xlane.f32.xlu1 %v380_v57  ;;  %v401_v9 = vsel %vm82_vm0, %v329_v5, 0.0  ;;  %v2150_v57 = vld [vmem:[%s5507_s3 + $0x98] sm:$0xff] }
  0x2b   :  { %378 = vadd.xlane.f32.xlu0 %v377_v53  ;;  %v443_v46 = vrot.slane %v442_v45, 1 }
  0x2c   :  { %2565 = vmatmul.msk.f32.gmra.mxu3 %vm82_vm0, %v3013_v55  ;;  %v2137_v55 = vld [vmem:[%s5507_s3 + $0x30] sm:$0xff] }
  0x2d   :  { %v3113_v50 = vadd.f32 %v443_v46, %v442_v45 }
  0x2e   :  { %384 = vadd.xlane.f32.xlu2 %v383_v54 }
  0x30   :  { %2542 = vmatmul.msk.f32.gmra.mxu0 %vm82_vm0, %v2908_v13  ;;  %v71_v13 = vld [vmem:[%s5505_s1 + $0xb8] sm:$0xff] }
  0x31   :  { %2550 = vmatmul.msk.f32.gmra.mxu2 %vm82_vm0, %v61_v48  ;;  %v332_v15 = vmul.f32 %v71_v13, %v71_v13  ;;  %v2136_v48 = vld [vmem:[%s5507_s3 + $0x28] sm:$0xff] }
  0x32   :  { %2558 = vmatmul.msk.f32.gmra.mxu1 %vm82_vm0, %v69_v61  ;;  %390 = vadd.xlane.f32.xlu1 %v389_v3  ;;  %v2153_v3 = vld [vmem:[%s5507_s3 + $0xb0] sm:$0xff] }
  0x33   :  { %387 = vadd.xlane.f32.xlu0 %v386_v62  ;;  %v410_v19 = vsel %vm82_vm0, %v332_v15, 0.0 }
  0x34   :  { %2566 = vmatmul.msk.f32.gmra.mxu3 %vm82_vm0, %v77_v2  ;;  %v2141_v2 = vld [vmem:[%s5507_s3 + $0x50] sm:$0xff] }
  0x36   :  { %393 = vadd.xlane.f32.xlu2 %v392_v63  ;;  %v2140_v63 = vld [vmem:[%s5507_s3 + $0x48] sm:$0xff] }
  0x38   :  { %2543 = vmatmul.msk.f32.gmra.mxu0 %vm82_vm0, %v2939_v25  ;;  %v334_v25 = vmul.f32 %v2934_v24, %v2934_v24  ;;  %v428_v24 = vsel %vm82_vm0, %v338_v12, 0.0  ;;  %v438_v12 = vmul.f32 %v2866_v1, %v2866_v1  ;;  %v2144_v1 = vld [vmem:[%s5507_s3 + $0x68] sm:$0xff] }
  0x39   :  { %2551 = vmatmul.msk.f32.gmra.mxu2 %vm82_vm0, %v62_v47  ;;  %v2135_v47 = vld [vmem:[%s5507_s3 + $0x20] sm:$0xff] }
  0x3a   :  { %2559 = vmatmul.msk.f32.gmra.mxu1 %vm82_vm0, %v70_v7  ;;  %399 = vadd.xlane.f32.xlu1 %v398_v11  ;;  %v416_v28 = vsel %vm82_vm0, %v334_v25, 0.0 }
  0x3b   :  { %396 = vadd.xlane.f32.xlu0 %v395_v8  ;;  %v2148_v8 = vld [vmem:[%s5507_s3 + $0x88] sm:$0xff] }
  0x3c   :  { %2567 = vmatmul.msk.f32.gmra.mxu3 %vm82_vm0, %v78_v10  ;;  %v2149_v10 = vld [vmem:[%s5507_s3 + $0x90] sm:$0xff] }
  0x3e   :  { %402 = vadd.xlane.f32.xlu2 %v401_v9 }
  0x40   :  { %2544 = vmatmul.msk.f32.gmra.mxu0 %vm82_vm0, %v2948_v27  ;;  %v419_v27 = vsel %vm82_vm0, %v335_v23, 0.0 }
  0x41   :  { %2552 = vmatmul.msk.f32.gmra.mxu2 %vm82_vm0, %v63_v56  ;;  %v2138_v56 = vld [vmem:[%s5507_s3 + $0x38] sm:$0xff] }
  0x42   :  { %2560 = vmatmul.msk.f32.gmra.mxu1 %vm82_vm0, %v71_v13  ;;  %408 = vadd.xlane.f32.xlu1 %v407_v21  ;;  %v2156_v13 = vld [vmem:[%s5507_s3 + $0xc8] sm:$0xff] }
  0x43   :  { %405 = vadd.xlane.f32.xlu0 %v404_v18  ;;  %v2152_v21 = vld [vmem:[%s5507_s3 + $0xa8] sm:$0xff] }
  0x44   :  { %2568 = vmatmul.msk.f32.gmra.mxu3 %vm82_vm0, %v79_v20  ;;  %v2151_v20 = vld [vmem:[%s5507_s3 + $0xa0] sm:$0xff] }
  0x46   :  { %411 = vadd.xlane.f32.xlu2 %v410_v19 }
  0x4a   :  { %417 = vadd.xlane.f32.xlu1 %v416_v28 }
  0x4b   :  { %414 = vadd.xlane.f32.xlu0 %v413_v26 }
  0x4e   :  { %420 = vadd.xlane.f32.xlu2 %v419_v27 }
  0x52   :  { %426 = vadd.xlane.f32.xlu1 %v425_v32 }
  0x53   :  { %423 = vadd.xlane.f32.xlu0 %v422_v31 }
  0x56   :  { %429 = vadd.xlane.f32.xlu2 %v428_v24  ;;  %v2154_v24 = vld [vmem:[%s5507_s3 + $0xb8] sm:$0xff] }
  0x5a   :  { %435 = vadd.xlane.f32.xlu1 %v434_v36  ;;  %v445_v36 = vrot.slane %v438_v12, 4 }
  0x5b   :  { %432 = vadd.xlane.f32.xlu0 %v431_v35  ;;  %v2155_v35 = vld [vmem:[%s5507_s3 + $0xc0] sm:$0xff] }
  0x6e   :  { %2167 = vperm.xlu2 %2575, %v2131_v39  }
  0x6f   :  { %2172 = vperm.xlu0 %2576, %v2132_v40  }
  0x73   :  { %2177 = vperm.xlu1 %2577, %v2133_v0   ;;  %v2157_v0 = vld [vmem:[%s5507_s3 + $0xd0] sm:$0xff] }
  0x76   :  { %2182 = vperm.xlu2 %2575, %v2134_v43   ;;  %v446_v43 = vadd.f32 %v445_v36, %v438_v12 }
  0x77   :  { %2207 = vperm.xlu0 %2576, %v2139_v44  }
  0x7b   :  { %2192 = vperm.xlu1 %2577, %v2136_v48   ;;  %v2142_v48 = vld [vmem:[%s5507_s3 + $0x58] sm:$0xff] }
  0x7d   :  { %v349_v53 = vpop.xlane.xlu1 %348 }
  0x7e   :  { %2187 = vperm.xlu2 %2575, %v2135_v47   ;;  %v3119_v54 = vadd.f32 %v3113_v50, %v349_v53  ;;  %v343_v61 = vpop.xlane.xlu0 %342  ;;  %v2161_v53 = vld [vmem:[%s5507_s3 + $0xf0] sm:$0xff] }
  0x7f   :  { %2247 = vperm.xlu0 %2576, %v2147_v49   ;;  %v451_v26 = vadd.f32 %v3113_v50, %v343_v61 }
  0x81   :  { %v355_v51 = vpop.xlane.xlu2 %354 }
  0x82   :  { %v3116_v52 = vadd.f32 %v3113_v50, %v355_v51 }
  0x83   :  { %2202 = vperm.xlu1 %2577, %v2138_v56  }
  0x85   :  { %v352_v60 = vpop.xlane.xlu1 %351  ;;  %v148_v11 = vpop.f32.mrf.mxu0 }
  0x86   :  { %2197 = vperm.xlu2 %2575, %v2137_v55   ;;  %v3134_v62 = vadd.f32 %v3113_v50, %v352_v60  ;;  %v346_v9 = vpop.xlane.xlu0 %345  ;;  %v483_v27 = vmul.f32 2.0, %v148_v11  ;;  %v447_v55 = vrot.slane %v446_v43, 2 }
  0x87   :  { %2262 = vperm.xlu0 %2576, %v2150_v57   ;;  %v3163_v18 = vpop.f32.mrf.mxu1  ;;  %v452_v37 = vadd.f32 %v3113_v50, %v346_v9 }
  0x88   :  { %v515_v33 = vsub.f32 %v451_v26, %v483_v27 }
  0x89   :  { %v358_v58 = vpop.xlane.xlu2 %357 }
  0x8a   :  { %v3131_v59 = vadd.f32 %v3113_v50, %v358_v58  ;;  %v3200_v38 = vmax.f32 %v515_v33, 0.0 }
  0x8b   :  { %2217 = vperm.xlu1 %2577, %v2141_v2   ;;  %v448_v2 = vadd.f32 %v447_v55, %v446_v43 }
  0x8c   :  { %v172_v15 = vpop.f32.mrf.mxu2  ;;  %2580 = vrsqrt.f32 %v3200_v38  ;;  %vm586_vm1 = vcmp.eq.f32.partialorder %v3200_v38, inf  ;;  %vm588_vm0 = vcmp.eq.f32.partialorder %v3200_v38, 0.0 }
  0x8d   :  { %v364_v6 = vpop.xlane.xlu1 %363  ;;  %v151_v25 = vpop.f32.mrf.mxu0  ;;  %v491_v41 = vmul.f32 2.0, %v172_v15  ;;  %v449_v11 = vrot.slane %v448_v2, 1 }
  0x8e   :  { %2212 = vperm.xlu2 %2575, %v2140_v63   ;;  %v3149_v7 = vadd.f32 %v3113_v50, %v364_v6  ;;  %v3177_v23 = vpop.xlane.xlu0 %360  ;;  %v484_v39 = vmul.f32 2.0, %v151_v25 }
  0x8f   :  { %2277 = vperm.xlu0 %2576, %v2153_v3   ;;  %v3191_v34 = vpop.f32.mrf.mxu1  ;;  %v285_v36 = vpop.f32.mrf.mxu3 }
  0x90   :  { %v516_v46 = vsub.f32 %v452_v37, %v484_v39 }
  0x91   :  { %v367_v4 = vpop.xlane.xlu2 %366 }
  0x92   :  { %v3146_v5 = vadd.f32 %v3113_v50, %v367_v4  ;;  %v3216_v58 = vmax.f32 %v516_v46, 0.0  ;;  %v3221_v63 = vpop.eup %2580  ;;  %v2143_v4 = vld [vmem:[%s5507_s3 + $0x60] sm:$0xff] }
  0x93   :  { %2257 = vperm.xlu1 %2577, %v2149_v10   ;;  %v580_v9 = vmul.f32 %v3221_v63, %v3200_v38 }
  0x94   :  { %v175_v32 = vpop.f32.mrf.mxu2  ;;  %v523_v49 = vsub.f32 %v3146_v5, %v491_v41  ;;  %2582 = vrsqrt.f32 %v3216_v58  ;;  %vm598_vm3 = vcmp.eq.f32.partialorder %v3216_v58, inf }
  0x95   :  { %v373_v17 = vpop.xlane.xlu1 %372  ;;  %v154_v42 = vpop.f32.mrf.mxu0  ;;  %v492_v44 = vmul.f32 2.0, %v175_v32 }
  0x96   :  { %2252 = vperm.xlu2 %2575, %v2148_v8   ;;  %v3166_v19 = vadd.f32 %v3113_v50, %v373_v17  ;;  %v370_v40 = vpop.xlane.xlu0 %369  ;;  %v485_v47 = vmul.f32 2.0, %v154_v42  ;;  %v3219_v61 = vmax.f32 %v523_v49, 0.0  ;;  %v499_v49 = vmul.f32 2.0, %v3163_v18 }
  0x97   :  { %2292 = vperm.xlu0 %2576, %v2156_v13   ;;  %v460_v45 = vadd.f32 %v3113_v50, %v370_v40  ;;  %v3214_v56 = vpop.f32.mrf.mxu1 }
  0x98   :  { %v517_v60 = vsub.f32 %v3119_v54, %v485_v47  ;;  %v2159_v54 = vld [vmem:[%s5507_s3 + $0xe0] sm:$0xff]  ;;  %2584 = vrsqrt.f32 %v3219_v61  ;;  %vm682_vm2 = vcmp.eq.f32.partialorder %v3219_v61, inf }
  0x99   :  { %v376_v14 = vpop.xlane.xlu2 %375  ;;  %v524_v57 = vsub.f32 %v460_v45, %v492_v44 }
  0x9a   :  { %v3161_v16 = vadd.f32 %v3113_v50, %v376_v14  ;;  %v3231_v8 = vmax.f32 %v517_v60, 0.0  ;;  %v3293_v60 = vmul.f32 2.0, %v285_v36 }
  0x9b   :  { %2272 = vperm.xlu1 %2577, %v2152_v21   ;;  %v3226_v5 = vmax.f32 %v524_v57, 0.0  ;;  %v3245_v21 = vpop.eup %2582 }
  0x9c   :  { %v178_v51 = vpop.f32.mrf.mxu2  ;;  %vm610_vm5 = vcmp.eq.f32.partialorder %v3231_v8, inf }
  0x9d   :  { %v382_v29 = vpop.xlane.xlu1 %381  ;;  %v493_v3 = vmul.f32 2.0, %v178_v51  ;;  %5547 = vst [vmem:[#allocation9_spill] sm:$0xff] %v3226_v5  ;;  %v157_v10 = vpop.f32.mrf.mxu0  ;;  %2586 = vrsqrt.f32 %v3226_v5  ;;  %vm694_vm4 = vcmp.eq.f32.partialorder %v3226_v5, inf }
  0x9e   :  { %2267 = vperm.xlu2 %2575, %v2151_v20   ;;  %v3186_v31 = vadd.f32 %v3113_v50, %v382_v29  ;;  %v3228_v6 = vpop.xlane.xlu0 %378  ;;  %2588 = vrsqrt.f32 %v3231_v8  ;;  %v486_v17 = vmul.f32 2.0, %v157_v10  ;;  %v581_v20 = vmul.f32 %v3221_v63, %v580_v9  ;;  %v3254_v27 = vpop.eup %2584 }
  0x9f   :  { %2302 = vperm.xlu0 %2576, %v2158_v22   ;;  %v525_v13 = vsub.f32 %v3166_v19, %v493_v3  ;;  %v3242_v15 = vpop.f32.mrf.mxu1  ;;  %v3247_v22 = vadd.f32 %v449_v11, %v448_v2  ;;  %v2160_v19 = vld [vmem:[%s5507_s3 + $0xe8] sm:$0xff] }
  0xa0   :  { %v518_v29 = vsub.f32 %v3134_v62, %v486_v17  ;;  %v582_v33 = vmul.f32 0.5, %v581_v20  ;;  %v676_v62 = vmul.f32 %v3254_v27, %v3219_v61 }
  0xa1   :  { %v385_v28 = vpop.xlane.xlu2 %384  ;;  %v3249_v25 = vmax.f32 %v525_v13, 0.0 }
  0xa2   :  { %v3183_v30 = vadd.f32 %v3113_v50, %v385_v28  ;;  %v3276_v42 = vmax.f32 %v518_v29, 0.0  ;;  %v583_v43 = vsub.f32 1.5, %v582_v33  ;;  %v677_v45 = vmul.f32 %v3254_v27, %v676_v62 }
  0xa3   :  { %2287 = vperm.xlu1 %2577, %v2155_v35   ;;  %5548 = vst [vmem:[#allocation10_spill] sm:$0xff] %v3249_v25  ;;  %v3260_v32 = vpop.eup %2586  ;;  %v500_v35 = vmul.f32 2.0, %v3191_v34  ;;  %2590 = vrsqrt.f32 %v3249_v25  ;;  %v502_v62 = vmul.f32 2.0, %v3242_v15  ;;  %vm706_vm6 = vcmp.eq.f32.partialorder %v3249_v25, inf }
  0xa4   :  { %v181_v14 = vpop.f32.mrf.mxu2  ;;  %v3267_v39 = vpop.eup %2588  ;;  %v688_v34 = vmul.f32 %v3260_v32, %v3226_v5  ;;  %2592 = vrsqrt.f32 %v3276_v42  ;;  %v584_v18 = vmul.f32 %v3221_v63, %v583_v43  ;;  %v678_v11 = vmul.f32 0.5, %v677_v45 }
  0xa5   :  { %v494_v26 = vmul.f32 2.0, %v181_v14  ;;  %v391_v12 = vpop.xlane.xlu1 %390  ;;  %v160_v44 = vpop.f32.mrf.mxu0  ;;  %v463_v63 = vadd.f32 %v3113_v50, %v3228_v6  ;;  %vm622_vm7 = vcmp.eq.f32.partialorder %v3276_v42, inf }
  0xa6   :  { %2282 = vperm.xlu2 %2575, %v2154_v24   ;;  %v2145_v24 = vld [vmem:[%s5507_s3 + $0x70] sm:$0xff]  ;;  %v3265_v37 = vpop.xlane.xlu0 %387  ;;  %v467_v55 = vadd.f32 %v3247_v22, %v391_v12  ;;  %v689_v2 = vmul.f32 %v3260_v32, %v688_v34  ;;  %v487_v3 = vmul.f32 2.0, %v160_v44  ;;  %v679_v6 = vsub.f32 1.5, %v678_v11 }
  0xa7   :  { %2232 = vperm.xlu0 %2576, %v2144_v1   ;;  %v592_v1 = vmul.f32 %v3245_v21, %v3216_v58  ;;  %v526_v40 = vsub.f32 %v3161_v16, %v494_v26  ;;  %v273_v16 = vpop.f32.mrf.mxu1  ;;  %v288_v26 = vpop.f32.mrf.mxu3 }
  0xa8   :  { %v690_v12 = vmul.f32 0.5, %v689_v2  ;;  %v519_v33 = vsub.f32 %v3116_v52, %v487_v3  ;;  %v2146_v52 = vld [vmem:[%s5507_s3 + $0x78] sm:$0xff]  ;;  %v680_v11 = vmul.f32 %v3254_v27, %v679_v6 }
  0xa9   :  { %v394_v28 = vpop.xlane.xlu2 %393  ;;  %v593_v46 = vmul.f32 %v3245_v21, %v592_v1  ;;  %v3282_v47 = vmax.f32 %v526_v40, 0.0  ;;  %v3291_v57 = vpop.eup %2590  ;;  %v501_v1 = vmul.f32 2.0, %v3214_v56  ;;  %v3322_v56 = vmul.f32 2.0, %v288_v26 }
  0xaa   :  { %v468_v41 = vadd.f32 %v3247_v22, %v394_v28  ;;  %v700_v20 = vmul.f32 %v3291_v57, %v3249_v25 }
  0xab   :  { %2222 = vperm.xlu1 %2577, %v2142_v48   ;;  %5549 = vst [vmem:[#allocation11_spill] sm:$0xff] %v3282_v47  ;;  %v594_v13 = vmul.f32 0.5, %v593_v46  ;;  %2594 = vrsqrt.f32 %v3282_v47  ;;  %v585_v46 = vmul.f32 %v584_v18, %v3200_v38  ;;  %vm718_vm8 = vcmp.eq.f32.partialorder %v3282_v47, inf }
  0xac   :  { %v532_v48 = vsub.f32 %v468_v41, %v500_v35  ;;  %v3314_v41 = vpop.eup %2592 }
  0xad   :  { %v400_v17 = vpop.xlane.xlu1 %399  ;;  %v595_v34 = vsub.f32 1.5, %v594_v13  ;;  %v163_v18 = vpop.f32.mrf.mxu0 }
  0xae   :  { %2297 = vperm.xlu2 %2575, %v2157_v0   ;;  %v604_v0 = vmul.f32 %v3267_v39, %v3231_v8  ;;  %v3302_v14 = vmax.f32 %v532_v48, 0.0  ;;  %v397_v29 = vpop.xlane.xlu0 %396  ;;  %v470_v40 = vadd.f32 %v3247_v22, %v400_v17  ;;  %v3329_v48 = vmax.f32 %v519_v33, 0.0 }
  0xaf   :  { %2317 = vperm.xlu0 %2576, %v2161_v53   ;;  %v3288_v53 = vadd.f32 %v3113_v50, %v3177_v23  ;;  %v469_v43 = vadd.f32 %v3247_v22, %v397_v29  ;;  %v596_v13 = vmul.f32 %v3245_v21, %v595_v34  ;;  %v488_v27 = vmul.f32 2.0, %v163_v18 }
  0xb0   :  { %v605_v23 = vmul.f32 %v3267_v39, %v604_v0  ;;  %2596 = vrsqrt.f32 %v3302_v14  ;;  %v701_v0 = vmul.f32 %v3291_v57, %v700_v20  ;;  %vm790_vm9 = vcmp.eq.f32.partialorder %v3302_v14, inf }
  0xb1   :  { %v403_v10 = vpop.xlane.xlu2 %402  ;;  %v3326_v45 = vpop.eup %2594  ;;  %v533_v20 = vsub.f32 %v469_v43, %v501_v1  ;;  %vm634_vm11 = vcmp.eq.f32.partialorder %v3329_v48, inf }
  0xb2   :  { %v471_v35 = vadd.f32 %v3247_v22, %v403_v10  ;;  %v606_v36 = vmul.f32 0.5, %v605_v23  ;;  %v534_v23 = vsub.f32 %v470_v40, %v502_v62  ;;  %v2162_v10 = vld [vmem:[%s5507_s3 + $0xf8] sm:$0xff]  ;;  %v702_v26 = vmul.f32 0.5, %v701_v0  ;;  %s3587_s3 = sld [smem:[#allocation3 + $0x3]] }
  0xb3   :  { %2307 = vperm.xlu1 %2577, %v2159_v54   ;;  %v597_v62 = vmul.f32 %v596_v13, %v3216_v58  ;;  %v3370_v6 = vmax.f32 %v533_v20, 0.0  ;;  %v520_v0 = vsub.f32 %v3131_v59, %v488_v27 }
  0xb4   :  { %v607_v3 = vsub.f32 1.5, %v606_v36  ;;  %v3364_v1 = vmax.f32 %v534_v23, 0.0  ;;  %v681_v36 = vmul.f32 %v680_v11, %v3219_v61  ;;  %v703_v34 = vsub.f32 1.5, %v702_v26 }
  0xb5   :  { %5553 = vst [vmem:[#allocation15_spill] sm:$0xff] %v3370_v6  ;;  %v3394_v59 = vsel %vm598_vm3, %v3216_v58, %v597_v62  ;;  %v3403_v26 = vadd.f32 %v3113_v50, %v3265_v37  ;;  %vm802_vm15 = vcmp.eq.f32.partialorder %v3370_v6, inf  ;;  %vm624_vm3 = vcmp.eq.f32.partialorder %v3276_v42, 0.0 }
  0xb6   :  { %2227 = vperm.xlu2 %2575, %v2143_v4   ;;  %v184_v4 = vpop.f32.mrf.mxu2  ;;  %5552 = vst [vmem:[#allocation14_spill] sm:$0xff] %v3364_v1  ;;  %v3389_v23 = vsel %vm682_vm2, %v3219_v61, %v681_v36  ;;  %v704_v11 = vmul.f32 %v3291_v57, %v703_v34  ;;  %vm814_vm14 = vcmp.eq.f32.partialorder %v3364_v1, inf }
  0xb7   :  { %v495_v28 = vmul.f32 2.0, %v184_v4  ;;  %v616_v4 = vmul.f32 %v3314_v41, %v3276_v42  ;;  %5554 = vst [vmem:[#allocation16_spill] sm:$0xff] %v3389_v23 }
  0xb9   :  { %v527_v15 = vsub.f32 %v463_v63, %v495_v28  ;;  %v712_v63 = vmul.f32 %v3326_v45, %v3282_v47  ;;  %v3350_v28 = vpop.eup %2596  ;;  %v617_v33 = vmul.f32 %v3314_v41, %v616_v4 }
  0xbb   :  { %2237 = vperm.xlu1 %2577, %v2145_v24   ;;  %v503_v24 = vmul.f32 2.0, %v273_v16  ;;  %v691_v16 = vsub.f32 1.5, %v690_v12  ;;  %v3360_v12 = vsel %vm586_vm1, %v3200_v38, %v585_v46  ;;  %v713_v43 = vmul.f32 %v3326_v45, %v712_v63  ;;  %v409_v63 = vpop.xlane.xlu1 %408 }
  0xbd   :  { %v692_v29 = vmul.f32 %v3260_v32, %v691_v16  ;;  %v714_v13 = vmul.f32 0.5, %v713_v43 }
  0xbe   :  { %2312 = vperm.xlu2 %2575, %v2160_v19   ;;  %v531_v19 = vsub.f32 %v467_v55, %v499_v49  ;;  %v3331_v49 = vpop.f32.mrf.mxu1  ;;  %v535_v55 = vsub.f32 %v471_v35, %v503_v24  ;;  %v608_v24 = vmul.f32 %v3267_v39, %v607_v3  ;;  %v291_v35 = vpop.f32.mrf.mxu3  ;;  %v784_v39 = vmul.f32 %v3350_v28, %v3302_v14 }
  0xbf   :  { %v187_v32 = vpop.f32.mrf.mxu2  ;;  %v3368_v40 = vmul.f32 2.0, %v291_v35  ;;  %v618_v3 = vmul.f32 0.5, %v617_v33  ;;  %v412_v33 = vpop.xlane.xlu2 %411 }
  0xc0   :  { %v3324_v44 = vmax.f32 %v531_v19, 0.0  ;;  %v3348_v19 = vmax.f32 %v527_v15, 0.0  ;;  %v3355_v21 = vmax.f32 %v535_v55, 0.0  ;;  %v496_v15 = vmul.f32 2.0, %v187_v32  ;;  %v406_v32 = vpop.xlane.xlu0 %405 }
  0xc1   :  { %v609_v16 = vmul.f32 %v608_v24, %v3231_v8  ;;  %v785_v20 = vmul.f32 %v3350_v28, %v784_v39  ;;  %v3412_v24 = vmax.f32 %v520_v0, 0.0  ;;  %v619_v37 = vsub.f32 1.5, %v618_v3 }
  0xc2   :  { %2598 = vrsqrt.f32 %v3324_v44  ;;  %5550 = vst [vmem:[#allocation12_spill] sm:$0xff] %v3348_v19  ;;  %v528_v57 = vsub.f32 %v3186_v31, %v496_v15  ;;  %v504_v31 = vmul.f32 2.0, %v3331_v49  ;;  %v473_v39 = vadd.f32 %v3247_v22, %v409_v63 }
  0xc3   :  { %2322 = vperm.xlu1 %2577, %v2162_v10   ;;  %2600 = vrsqrt.f32 %v3329_v48  ;;  %5551 = vst [vmem:[#allocation13_spill] sm:$0xff] %v3355_v21  ;;  %v3420_v50 = vsel %vm610_vm5, %v3231_v8, %v609_v16  ;;  %v705_v0 = vmul.f32 %v704_v11, %v3249_v25  ;;  %v715_v15 = vsub.f32 1.5, %v714_v13 }
  0xc4   :  { %2602 = vrsqrt.f32 %v3348_v19  ;;  %v786_v16 = vmul.f32 0.5, %v785_v20  ;;  %v3440_v49 = vmax.f32 %v528_v57, 0.0  ;;  %v620_v63 = vmul.f32 %v3314_v41, %v619_v37 }
  0xc5   :  { %2604 = vrsqrt.f32 %v3355_v21  ;;  %v472_v17 = vadd.f32 %v3247_v22, %v406_v32  ;;  %v3456_v41 = vsel %vm706_vm6, %v3249_v25, %v705_v0  ;;  %v716_v13 = vmul.f32 %v3326_v45, %v715_v15 }
  0xc6   :  { %2242 = vperm.xlu2 %2575, %v2146_v52   ;;  %v693_v52 = vmul.f32 %v692_v29, %v3226_v5  ;;  %2606 = vrsqrt.f32 %v3364_v1  ;;  %v279_v10 = vpop.f32.mrf.mxu1  ;;  %5556 = vst [vmem:[#allocation18_spill] sm:$0xff] %v3440_v49  ;;  %v294_v20 = vpop.f32.mrf.mxu3  ;;  %v787_v37 = vsub.f32 1.5, %v786_v16  ;;  %vm778_vm10 = vcmp.eq.f32.partialorder %v3324_v44, inf }
  0xc7   :  { %2608 = vrsqrt.f32 %v3370_v6  ;;  %v505_v43 = vmul.f32 2.0, %v279_v10  ;;  %v166_v10 = vpop.f32.mrf.mxu0  ;;  %5557 = vst [vmem:[#allocation19_spill] sm:$0xff] %v3456_v41  ;;  %v536_v45 = vsub.f32 %v472_v17, %v504_v31  ;;  %v421_v15 = vpop.xlane.xlu2 %420  ;;  %vm730_vm12 = vcmp.eq.f32.partialorder %v3348_v19, inf }
  0xc8   :  { %v3379_v46 = vpop.eup %2598  ;;  %v3408_v29 = vsel %vm694_vm4, %v3226_v5, %v693_v52  ;;  %2610 = vrsqrt.f32 %v3412_v24  ;;  %v489_v9 = vmul.f32 2.0, %v166_v10  ;;  %v477_v31 = vadd.f32 %v3247_v22, %v421_v15 }
  0xc9   :  { %v3384_v4 = vpop.eup %2600  ;;  %5555 = vst [vmem:[#allocation17_spill] sm:$0xff] %v3408_v29  ;;  %v772_v27 = vmul.f32 %v3379_v46, %v3324_v44  ;;  %v537_v57 = vsub.f32 %v473_v39, %v505_v43  ;;  %2612 = vrsqrt.f32 %v3440_v49  ;;  %v621_v39 = vmul.f32 %v620_v63, %v3276_v42 }
  0xca   :  { %v3415_v35 = vpop.eup %2602  ;;  %v628_v36 = vmul.f32 %v3384_v4, %v3329_v48  ;;  %v474_v63 = vadd.f32 %v3247_v22, %v412_v33  ;;  %v788_v29 = vmul.f32 %v3350_v28, %v787_v37  ;;  %vm826_vm13 = vcmp.eq.f32.partialorder %v3355_v21, inf }
  0xcb   :  { %v3425_v62 = vpop.eup %2604  ;;  %v773_v2 = vmul.f32 %v3379_v46, %v772_v27  ;;  %v724_v34 = vmul.f32 %v3415_v35, %v3348_v19  ;;  %v3448_v27 = vmul.f32 2.0, %v294_v20  ;;  %v190_v20 = vpop.f32.mrf.mxu2  ;;  %v3470_v25 = vmax.f32 %v537_v57, 0.0 }
  0xcc   :  { %v3430_v52 = vpop.eup %2606  ;;  %v629_v11 = vmul.f32 %v3384_v4, %v628_v36  ;;  %v820_v3 = vmul.f32 %v3425_v62, %v3355_v21  ;;  %v3490_v28 = vsel %vm622_vm7, %v3276_v42, %v621_v39  ;;  %vm646_vm1 = vcmp.eq.f32.partialorder %v3412_v24, inf }
  0xcd   :  { %v3434_v55 = vpop.eup %2608  ;;  %v808_v54 = vmul.f32 %v3430_v52, %v3364_v1  ;;  %v774_v18 = vmul.f32 0.5, %v773_v2  ;;  %v725_v43 = vmul.f32 %v3415_v35, %v724_v34  ;;  %5558 = vst [vmem:[#allocation20_spill] sm:$0xff] %v3470_v25  ;;  %v497_v2 = vmul.f32 2.0, %v190_v20 }
  0xce   :  { %v796_v36 = vmul.f32 %v3434_v55, %v3370_v6  ;;  %v282_v32 = vpop.f32.mrf.mxu1  ;;  %v630_v0 = vmul.f32 0.5, %v629_v11  ;;  %v821_v16 = vmul.f32 %v3425_v62, %v820_v3  ;;  %v3467_v41 = vpop.eup %2610  ;;  %v521_v11 = vsub.f32 %v3288_v53, %v489_v9 }
  0xcf   :  { %v809_v10 = vmul.f32 %v3430_v52, %v808_v54  ;;  %v506_v51 = vmul.f32 2.0, %v282_v32  ;;  %v717_v3 = vmul.f32 %v716_v13, %v3282_v47  ;;  %v775_v5 = vsub.f32 1.5, %v774_v18  ;;  %v3481_v20 = vpop.eup %2612 }
  0xd0   :  { %v797_v34 = vmul.f32 %v3434_v55, %v796_v36  ;;  %v726_v54 = vmul.f32 0.5, %v725_v43  ;;  %v631_v57 = vsub.f32 1.5, %v630_v0  ;;  %v822_v23 = vmul.f32 0.5, %v821_v16 }
  0xd1   :  { %v640_v17 = vmul.f32 %v3467_v41, %v3412_v24  ;;  %v810_v36 = vmul.f32 0.5, %v809_v10  ;;  %2614 = vrsqrt.f32 %v3470_v25  ;;  %v3484_v53 = vmax.f32 %v536_v45, 0.0  ;;  %v418_v10 = vpop.xlane.xlu1 %417 }
  0xd2   :  { %v529_v9 = vsub.f32 %v3183_v30, %v497_v2  ;;  %v798_v18 = vmul.f32 0.5, %v797_v34  ;;  %v3493_v33 = vmax.f32 %v521_v11, 0.0  ;;  %v538_v13 = vsub.f32 %v474_v63, %v506_v51 }
  0xd3   :  { %5559 = vst [vmem:[#allocation21_spill] sm:$0xff] %v3484_v53  ;;  %v3498_v37 = vsel %vm718_vm8, %v3282_v47, %v717_v3  ;;  %v789_v43 = vmul.f32 %v788_v29, %v3302_v14  ;;  %v776_v30 = vmul.f32 %v3379_v46, %v775_v5  ;;  %v727_v32 = vsub.f32 1.5, %v726_v54 }
  0xd4   :  { %5560 = vst [vmem:[#allocation22_spill] sm:$0xff] %v3498_v37  ;;  %v632_v0 = vmul.f32 %v3384_v4, %v631_v57  ;;  %v641_v39 = vmul.f32 %v3467_v41, %v640_v17  ;;  %v736_v16 = vmul.f32 %v3481_v20, %v3440_v49  ;;  %v541_v51 = vsub.f32 %v477_v31, %v3368_v40 }
  0xd5   :  { %v823_v45 = vsub.f32 1.5, %v822_v23  ;;  %v811_v2 = vsub.f32 1.5, %v810_v36  ;;  %2616 = vrsqrt.f32 %v3484_v53  ;;  %v3509_v29 = vmax.f32 %v529_v9, 0.0 }
  0xd6   :  { %v799_v46 = vsub.f32 1.5, %v798_v18  ;;  %2618 = vrsqrt.f32 %v3493_v33  ;;  %v3514_v4 = vmax.f32 %v538_v13, 0.0  ;;  %v3521_v40 = vsel %vm790_vm9, %v3302_v14, %v789_v43  ;;  %v297_v18 = vpop.f32.mrf.mxu3  ;;  %v169_v43 = vpop.f32.mrf.mxu0 }
  0xd7   :  { %5561 = vst [vmem:[#allocation23_spill] sm:$0xff] %v3509_v29  ;;  %v3516_v15 = vpop.eup %2614  ;;  %v777_v23 = vmul.f32 %v776_v30, %v3324_v44  ;;  %v728_v34 = vmul.f32 %v3415_v35, %v727_v32  ;;  %v476_v63 = vadd.f32 %v3247_v22, %v418_v10  ;;  %v642_v3 = vmul.f32 0.5, %v641_v39  ;;  %v415_v35 = vpop.xlane.xlu0 %414 }
  0xd8   :  { %5562 = vst [vmem:[#allocation24_spill] sm:$0xff] %v3514_v4  ;;  %v737_v54 = vmul.f32 %v3481_v20, %v736_v16  ;;  %v3530_v57 = vmax.f32 %v541_v51, 0.0  ;;  %v633_v17 = vmul.f32 %v632_v0, %v3329_v48  ;;  %v824_v31 = vmul.f32 %v3425_v62, %v823_v45 }
  0xd9   :  { %5563 = vst [vmem:[#allocation25_spill] sm:$0xff] %v3521_v40  ;;  %v812_v36 = vmul.f32 %v3430_v52, %v811_v2  ;;  %2620 = vrsqrt.f32 %v3509_v29  ;;  %v800_v9 = vmul.f32 %v3434_v55, %v799_v46  ;;  %v844_v13 = vmul.f32 %v3516_v15, %v3470_v25 }
  0xda   :  { %5564 = vst [vmem:[#allocation26_spill] sm:$0xff] %v3530_v57  ;;  %2622 = vrsqrt.f32 %v3514_v4  ;;  %v3546_v62 = vsel %vm778_vm10, %v3324_v44, %v777_v23  ;;  %v729_v52 = vmul.f32 %v728_v34, %v3348_v19  ;;  %v540_v32 = vsub.f32 %v476_v63, %v3322_v56 }
  0xdb   :  { %v3541_v30 = vpop.eup %2616  ;;  %v643_v39 = vsub.f32 1.5, %v642_v3  ;;  %v738_v16 = vmul.f32 0.5, %v737_v54  ;;  %2624 = vrsqrt.f32 %v3530_v57  ;;  %v475_v51 = vadd.f32 %v3247_v22, %v415_v35 }
  0xdc   :  { %v3551_v0 = vpop.eup %2618  ;;  %v3558_v10 = vsel %vm634_vm11, %v3329_v48, %v633_v17  ;;  %v825_v45 = vmul.f32 %v824_v31, %v3355_v21  ;;  %v813_v2 = vmul.f32 %v812_v36, %v3364_v1  ;;  %v490_v46 = vmul.f32 2.0, %v169_v43 }
  0xdd   :  { %v801_v56 = vmul.f32 %v800_v9, %v3370_v6  ;;  %v3564_v23 = vmul.f32 2.0, %v297_v18  ;;  %v845_v34 = vmul.f32 %v3516_v15, %v844_v13  ;;  %v832_v63 = vmul.f32 %v3541_v30, %v3484_v53 }
  0xde   :  { %v3574_v54 = vsel %vm730_vm12, %v3348_v19, %v729_v52  ;;  %v652_v31 = vmul.f32 %v3551_v0, %v3493_v33  ;;  %v3580_v36 = vmax.f32 %v540_v32, 0.0  ;;  %v644_v9 = vmul.f32 %v3467_v41, %v643_v39 }
  0xdf   :  { %v3569_v3 = vpop.eup %2620  ;;  %5565 = vst [vmem:[#allocation27_spill] sm:$0xff] %v3574_v54  ;;  %v739_v18 = vsub.f32 1.5, %v738_v16  ;;  %v539_v43 = vsub.f32 %v475_v51, %v3293_v60  ;;  %v3592_v52 = vsel %vm826_vm13, %v3355_v21, %v825_v45  ;;  %v3597_v32 = vsel %vm814_vm14, %v3364_v1, %v813_v2 }
  0xe0   :  { %5566 = vst [vmem:[#allocation28_spill] sm:$0xff] %v3580_v36  ;;  %v3582_v35 = vpop.eup %2622  ;;  %v522_v41 = vsub.f32 %v3149_v7, %v490_v46  ;;  %v3608_v60 = vsel %vm802_vm15, %v3370_v6, %v801_v56  ;;  %v846_v16 = vmul.f32 0.5, %v845_v34  ;;  %v833_v51 = vmul.f32 %v3541_v30, %v832_v63  ;;  %v193_v46 = vpop.f32.mrf.mxu2 }
  0xe1   :  { %5567 = vst [vmem:[#allocation29_spill] sm:$0xff] %v3592_v52  ;;  %v3603_v39 = vpop.eup %2624  ;;  %v653_v2 = vmul.f32 %v3551_v0, %v652_v31  ;;  %v748_v13 = vmul.f32 %v3569_v3, %v3509_v29  ;;  %v856_v7 = vmul.f32 %v3582_v35, %v3514_v4  ;;  %2626 = vrsqrt.f32 %v3580_v36  ;;  %v300_v31 = vpop.f32.mrf.mxu3 }
  0xe2   :  { %5568 = vst [vmem:[#allocation30_spill] sm:$0xff] %v3597_v32  ;;  %v645_v56 = vmul.f32 %v644_v9, %v3412_v24  ;;  %v740_v34 = vmul.f32 %v3481_v20, %v739_v18  ;;  %vm742_vm2 = vcmp.eq.f32.partialorder %v3440_v49, inf  ;;  %v3624_v45 = vmax.f32 %v539_v43, 0.0  ;;  %v430_v18 = vpop.xlane.xlu2 %429 }
  0xe3   :  { %5569 = vst [vmem:[#allocation31_spill] sm:$0xff] %v3608_v60  ;;  %v3627_v5 = vmul.f32 2.0, %v300_v31  ;;  %v892_v11 = vmul.f32 %v3603_v39, %v3530_v57  ;;  %v3631_v17 = vmax.f32 %v522_v41, 0.0  ;;  %v847_v9 = vsub.f32 1.5, %v846_v16 }
  0xe4   :  { %5570 = vst [vmem:[#allocation32_spill] sm:$0xff] %v3624_v45  ;;  %v834_v37 = vmul.f32 0.5, %v833_v51  ;;  %v498_v20 = vmul.f32 2.0, %v193_v46  ;;  %v654_v63 = vmul.f32 0.5, %v653_v2  ;;  %v749_v43 = vmul.f32 %v3569_v3, %v748_v13 }
  0xe5   :  { %v857_v55 = vmul.f32 %v3582_v35, %v856_v7  ;;  %v5571_v31 = vand.u32 2147483648, %v3200_v38  ;;  %v5517_v41 = vmov 0.0   ;;  %v3645_v16 = vsel %vm646_vm1, %v3412_v24, %v645_v56  ;;  %v427_v7 = vpop.xlane.xlu1 %426 }
  0xe6   :  { %47 = vst [vmem:[#allocation2] sm:$0x3] %v5517_v41  ;;  %v741_v51 = vmul.f32 %v740_v34, %v3440_v49  ;;  %2628 = vrsqrt.f32 %v3624_v45  ;;  %v3650_v13 = vstv %s3587_s3  ;;  %vm636_vm4 = vcmp.eq.f32.partialorder %v3329_v48, 0.0  ;;  %v424_v41 = vpop.xlane.xlu0 %423 }
  0xe7   :  { %v590_v47 = vsel %vm588_vm0, %v5571_v31, %v3360_v12  ;;  %v3652_v2 = vpop.eup %2626  ;;  %v893_v38 = vmul.f32 %v3603_v39, %v892_v11  ;;  %2630 = vrsqrt.f32 %v3631_v17  ;;  %v480_v12 = vadd.f32 %v3247_v22, %v430_v18 }
  0xe8   :  { %v3659_v46 = vstv %s3601_s24  ;;  %v848_v56 = vmul.f32 %v3516_v15, %v847_v9  ;;  %vm850_vm5 = vcmp.eq.f32.partialorder %v3470_v25, inf  ;;  %v835_v34 = vsub.f32 1.5, %v834_v37 }
  0xe9   :  { %v530_v31 = vsub.f32 %v3403_v26, %v498_v20  ;;  %v964_v11 = vmax.f32 %v3650_v13, %v590_v47  ;;  %v655_v54 = vsub.f32 1.5, %v654_v63  ;;  %v750_v19 = vmul.f32 0.5, %v749_v43 }
  0xea   :  { %v858_v60 = vmul.f32 0.5, %v857_v55  ;;  %v3670_v18 = vstv %s3618_s25  ;;  %v880_v15 = vmul.f32 %v3652_v2, %v3580_v36  ;;  %v479_v37 = vadd.f32 %v3247_v22, %v427_v7 }
  0xeb   :  { %v3677_v26 = vmin.f32 %v3659_v46, %v964_v11  ;;  %v3682_v47 = vsel %vm742_vm2, %v3440_v49, %v741_v51  ;;  %vm838_vm6 = vcmp.eq.f32.partialorder %v3484_v53, inf  ;;  %v894_v55 = vmul.f32 0.5, %v893_v38 }
  0xec   :  { %5572 = vst [vmem:[#allocation33_spill] sm:$0xff] %v3682_v47  ;;  %v544_v63 = vsub.f32 %v480_v12, %v3627_v5  ;;  %v478_v9 = vadd.f32 %v3247_v22, %v424_v41  ;;  %v3687_v20 = vpop.eup %2628  ;;  %v849_v43 = vmul.f32 %v848_v56, %v3470_v25  ;;  %v3691_v11 = vmax.f32 %v530_v31, 0.0  ;;  %v303_v56 = vpop.f32.mrf.mxu3 }
  0xed   :  { %v1030_v6 = vmul.f32 %v3670_v18, %v3677_v26  ;;  %v3695_v51 = vpop.eup %2630  ;;  %v836_v47 = vmul.f32 %v3541_v30, %v835_v34  ;;  %v656_v38 = vmul.f32 %v3551_v0, %v655_v54  ;;  %v751_v5 = vsub.f32 1.5, %v750_v19 }
  0xee   :  { %5573 = vst [vmem:[#allocation34_spill] sm:$0xff] %v3691_v11  ;;  %v859_v12 = vsub.f32 1.5, %v858_v60  ;;  %vm658_vm7 = vcmp.eq.f32.partialorder %v3493_v33, inf  ;;  %v881_v41 = vmul.f32 %v3652_v2, %v880_v15  ;;  %v543_v31 = vsub.f32 %v479_v37, %v3564_v23  ;;  %v433_v52 = vpop.xlane.xlu0 %432 }
  0xef   :  { %v1225_v7 = vsub.f32 0.0, %v1030_v6  ;;  %v5574_v49 = vand.u32 2147483648, %v3276_v42  ;;  %v895_v34 = vsub.f32 1.5, %v894_v55  ;;  %v868_v19 = vmul.f32 %v3687_v20, %v3624_v45 }
  0xf0   :  { %v3709_v0 = vmax.f32 %v544_v63, 0.0  ;;  %v542_v54 = vsub.f32 %v478_v9, %v3448_v27  ;;  %vm754_vm8 = vcmp.eq.f32.partialorder %v3509_v29, inf  ;;  %v664_v23 = vmul.f32 %v3695_v51, %v3631_v17 }
  0xf1   :  { %v626_v30 = vsel %vm624_vm3, %v5574_v49, %v3490_v28  ;;  %2632 = vrsqrt.f32 %v3691_v11  ;;  %v1064_v60 = vmul.f32 2.0, %v1030_v6  ;;  %v5576_v42 = vand.u32 2147483648, %v3329_v48 }
  0xf2   :  { %5575 = vst [vmem:[#allocation35_spill] sm:$0xff] %v3709_v0  ;;  %v3724_v28 = vsel %vm850_vm5, %v3470_v25, %v849_v43  ;;  %v752_v27 = vmul.f32 %v3569_v3, %v751_v5  ;;  %v1257_v15 = vmul.f32 1.442695, %v1225_v7  ;;  %v967_v37 = vmax.f32 %v3650_v13, %v626_v30 }
  0xf3   :  { %v638_v49 = vsel %vm636_vm4, %v5576_v42, %v3558_v10  ;;  %5577 = vst [vmem:[#allocation36_spill] sm:$0xff] %v3724_v28  ;;  %v837_v55 = vmul.f32 %v836_v47, %v3484_v53  ;;  %v657_v63 = vmul.f32 %v656_v38, %v3493_v33  ;;  %vm862_vm9 = vcmp.eq.f32.partialorder %v3514_v4, inf }
  0xf4   :  { %v882_v9 = vmul.f32 0.5, %v881_v41  ;;  %v3733_v48 = vmax.f32 %v543_v31, 0.0  ;;  %v860_v10 = vmul.f32 %v3582_v35, %v859_v12  ;;  %v896_v43 = vmul.f32 %v3603_v39, %v895_v34  ;;  %v3798_v35 = vld [vmem:[%s5509_s5] sm:$0xff] }
  0xf5   :  { %vm898_vm10 = vcmp.eq.f32.partialorder %v3530_v57, inf  ;;  %v869_v3 = vmul.f32 %v3687_v20, %v868_v19  ;;  %v968_v7 = vmax.f32 %v3650_v13, %v638_v49  ;;  %vm600_vm11 = vcmp.eq.f32.partialorder %v3216_v58, 0.0 }
  0xf6   :  { %v665_v47 = vmul.f32 %v3695_v51, %v664_v23  ;;  %2634 = vrsqrt.f32 %v3709_v0  ;;  %v3743_v38 = vmax.f32 %v542_v54, 0.0  ;;  %v1096_v5 = vadd.f32 2.0, %v1064_v60 }
  0xf7   :  { %v753_v41 = vmul.f32 %v752_v27, %v3509_v29  ;;  %2636 = vpow2.f32 %v1257_v15  ;;  %v3748_v39 = vmin.f32 %v3659_v46, %v967_v37  ;;  %v3750_v12 = vpop.eup %2632  ;;  %v3755_v31 = vsel %vm838_vm6, %v3484_v53, %v837_v55  ;;  %v306_v27 = vpop.f32.mrf.mxu3 }
  0xf8   :  { %5578 = vst [vmem:[#allocation37_spill] sm:$0xff] %v3755_v31  ;;  %v883_v30 = vsub.f32 1.5, %v882_v9  ;;  %2638 = vrsqrt.f32 %v3733_v48  ;;  %v1128_v34 = vmul.f32 %v1030_v6, %v1030_v6  ;;  %v3761_v19 = vsel %vm658_vm7, %v3493_v33, %v657_v63 }
  0xf9   :  { %v861_v54 = vmul.f32 %v860_v10, %v3514_v4  ;;  %v870_v23 = vmul.f32 0.5, %v869_v3  ;;  %v3765_v60 = vmin.f32 %v3659_v46, %v968_v7  ;;  %v897_v42 = vmul.f32 %v896_v43, %v3530_v57 }
  0xfa   :  { %v666_v49 = vmul.f32 0.5, %v665_v47  ;;  %2640 = vrsqrt.f32 %v3743_v38  ;;  %v1160_v15 = vadd.f32 %v1128_v34, %v1096_v5  ;;  %v3772_v6 = vsel %vm754_vm8, %v3509_v29, %v753_v41 }
  0xfb   :  { %5579 = vst [vmem:[#allocation38_spill] sm:$0xff] %v3772_v6  ;;  %vm886_vm12 = vcmp.eq.f32.partialorder %v3580_v36, inf  ;;  %v760_v37 = vmul.f32 %v3750_v12, %v3691_v11  ;;  %v3777_v55 = vstv %s1063_s29  ;;  %v1033_v63 = vmul.f32 %v3670_v18, %v3748_v39 }
  0xfc   :  { %v3781_v9 = vpop.eup %2634  ;;  %v884_v10 = vmul.f32 %v3652_v2, %v883_v30  ;;  %v3786_v7 = vmul.f32 2.0, %v303_v56  ;;  %v3791_v5 = vsel %vm862_vm9, %v3514_v4, %v861_v54  ;;  %v871_v41 = vsub.f32 1.5, %v870_v23 }
  0xfd   :  { %v2637_v47 = vpop.eup %2636  ;;  %5580 = vst [vmem:[#allocation39_spill] sm:$0xff] %v3791_v5  ;;  %v3793_v34 = vmul.f32 2.0, %v306_v27  ;;  %v1034_v2 = vmul.f32 %v3670_v18, %v3765_v60  ;;  %v3807_v56 = vsel %vm898_vm10, %v3530_v57, %v897_v42  ;;  %v667_v54 = vsub.f32 1.5, %v666_v49 }
  0xfe   :  { %v3802_v30 = vpop.eup %2638  ;;  %5581 = vst [vmem:[#allocation40_spill] sm:$0xff] %v3807_v56  ;;  %v1193_v27 = vmul.f32 %v3777_v55, %v1160_v15  ;;  %v761_v43 = vmul.f32 %v3750_v12, %v760_v37  ;;  %v928_v3 = vmul.f32 %v3781_v9, %v3709_v0  ;;  %v1228_v6 = vsub.f32 0.0, %v1033_v63 }
  0xff   :  { %v5582_v29 = vand.u32 2147483648, %v3216_v58  ;;  %vm612_vm13 = vcmp.eq.f32.partialorder %v3231_v8, 0.0  ;;  %v885_v49 = vmul.f32 %v884_v10, %v3580_v36  ;;  %v1939_v37 = vunpack.c.0.s8 %v3798_v35 }
 0x100   :  { %v3819_v42 = vpop.eup %2640  ;;  %v1321_v23 = vmul.f32 %v2637_v47, %v1193_v27  ;;  %v872_v56 = vmul.f32 %v3687_v20, %v871_v41  ;;  %v916_v53 = vmul.f32 %v3802_v30, %v3733_v48  ;;  %v3829_v57 = vstv %s3664_s26  ;;  %v436_v41 = vpop.xlane.xlu1 %435 }
 0x101   :  { %v602_v31 = vsel %vm600_vm11, %v5582_v29, %v3394_v59  ;;  %v1229_v58 = vsub.f32 0.0, %v1034_v2  ;;  %vm874_vm14 = vcmp.eq.f32.partialorder %v3624_v45, inf  ;;  %v668_v59 = vmul.f32 %v3695_v51, %v667_v54 }
 0x102   :  { %v1067_v10 = vmul.f32 2.0, %v1033_v63  ;;  %v965_v15 = vmax.f32 %v3650_v13, %v602_v31  ;;  %v762_v5 = vmul.f32 0.5, %v761_v43  ;;  %v929_v47 = vmul.f32 %v3781_v9, %v928_v3 }
 0x103   :  { %v904_v20 = vmul.f32 %v3819_v42, %v3743_v38  ;;  %v1263_v27 = vmul.f32 1.442695, %v1228_v6  ;;  %v3841_v4 = vsel %vm886_vm12, %v3580_v36, %v885_v49  ;;  %vm670_vm15 = vcmp.eq.f32.partialorder %v3631_v17, inf }
 0x104   :  { %5583 = vst [vmem:[#allocation41_spill] sm:$0xff] %v3841_v4  ;;  %v1971_v51 = vcvt.s32.f32 %v1939_v37  ;;  %v1354_v54 = vsub.f32 %v3829_v57, %v1321_v23  ;;  %v1068_v29 = vmul.f32 2.0, %v1034_v2  ;;  %v873_v31 = vmul.f32 %v872_v56, %v3624_v45 }
 0x105   :  { %v917_v43 = vmul.f32 %v3802_v30, %v916_v53  ;;  %v1265_v28 = vmul.f32 1.442695, %v1229_v58  ;;  %v669_v6 = vmul.f32 %v668_v59, %v3631_v17  ;;  %v482_v25 = vadd.f32 %v3247_v22, %v436_v41 }
 0x106   :  { %v1099_v49 = vadd.f32 2.0, %v1067_v10  ;;  %v3851_v4 = vmin.f32 %v3659_v46, %v965_v15  ;;  %v763_v37 = vsub.f32 1.5, %v762_v5  ;;  %v930_v36 = vmul.f32 0.5, %v929_v47 }
 0x107   :  { %v905_v23 = vmul.f32 %v3819_v42, %v904_v20  ;;  %2642 = vpow2.f32 %v1263_v27  ;;  %vm2035_vm0 = vcmp.gt.f32.partialorder %v1971_v51, 0.5  ;;  %v3857_v53 = vmul.f32 %v1354_v54, %v3677_v26 }
 0x108   :  { %v1131_v56 = vmul.f32 %v1033_v63, %v1033_v63  ;;  %v1100_v58 = vadd.f32 2.0, %v1068_v29  ;;  %v918_v59 = vmul.f32 0.5, %v917_v43  ;;  %v481_v41 = vadd.f32 %v3247_v22, %v433_v52 }
 0x109   :  { %2644 = vpow2.f32 %v1265_v28  ;;  %v5584_v15 = vand.u32 2147483648, %v3231_v8  ;;  %vm660_vm1 = vcmp.eq.f32.partialorder %v3493_v33, 0.0  ;;  %v546_v10 = vsub.f32 %v482_v25, %v3793_v34  ;;  %v3878_v8 = vld [vmem:[%s5508_s4] ss:$0 sm:$0xff] }
 0x10a   :  { %v1163_v47 = vadd.f32 %v1131_v56, %v1099_v49  ;;  %v1132_v20 = vmul.f32 %v1034_v2, %v1034_v2  ;;  %v1031_v26 = vmul.f32 %v3670_v18, %v3851_v4  ;;  %v3872_v22 = vsel %vm874_vm14, %v3624_v45, %v873_v31 }
 0x10b   :  { %v614_v5 = vsel %vm612_vm13, %v5584_v15, %v3420_v50  ;;  %5585 = vst [vmem:[#allocation42_spill] sm:$0xff] %v3872_v22  ;;  %v764_v52 = vmul.f32 %v3750_v12, %v763_v37  ;;  %v931_v28 = vsub.f32 1.5, %v930_v36  ;;  %v906_v63 = vmul.f32 0.5, %v905_v23  ;;  %v2168_v12 = vpop.permute.xlu2 %2167 }
 0x10c   :  { %vm2003_vm2 = vcmp.gt.f32.partialorder %v1971_v51, 1.5  ;;  %2646 = vrcp.f32 %v3857_v53  ;;  %v1164_v25 = vadd.f32 %v1132_v20, %v1100_v58  ;;  %v966_v50 = vmax.f32 %v3650_v13, %v614_v5 }
 0x10d   :  { %v2643_v34 = vpop.eup %2642  ;;  %v3885_v2 = vsel %vm670_vm15, %v3631_v17, %v669_v6  ;;  %vm766_vm3 = vcmp.eq.f32.partialorder %v3691_v11, inf  ;;  %v919_v36 = vsub.f32 1.5, %v918_v59  ;;  %v5587_v29 = vmov 0.0  }
 0x10e   :  { %5586 = vst [vmem:[#allocation43_spill] sm:$0xff] %v3885_v2  ;;  %v2067_v27 = vsel %vm2035_vm0, 0.2, %v5587_v29  ;;  %v1942_v54 = vunpack.c.3.s8 %v3798_v35  ;;  %v3891_v31 = vmax.f32 %v546_v10, 0.0  ;;  %v545_v43 = vsub.f32 %v481_v41, %v3786_v7 }
 0x10f   :  { %v1196_v49 = vmul.f32 %v3777_v55, %v1163_v47  ;;  %v1065_v37 = vmul.f32 2.0, %v1031_v26  ;;  %v2645_v23 = vpop.eup %2644  ;;  %v765_v6 = vmul.f32 %v764_v52, %v3691_v11  ;;  %v932_v56 = vmul.f32 %v3781_v9, %v931_v28 }
 0x110   :  { %v907_v58 = vsub.f32 1.5, %v906_v63  ;;  %v3898_v59 = vstv %s3854_s7  ;;  %vm934_vm4 = vcmp.eq.f32.partialorder %v3709_v0, inf  ;;  %v2331_v15 = vmul.f32 %v3878_v8, %v2168_v12 }
 0x111   :  { %v1324_v5 = vmul.f32 %v2643_v34, %v1196_v49  ;;  %v1197_v10 = vmul.f32 %v3777_v55, %v1164_v25  ;;  %v3904_v7 = vmin.f32 %v3659_v46, %v966_v50  ;;  %v920_v41 = vmul.f32 %v3802_v30, %v919_v36 }
 0x112   :  { %v2099_v47 = vsel %vm2003_vm2, 1.0, %v2067_v27  ;;  %v1974_v20 = vcvt.s32.f32 %v1942_v54  ;;  %v1226_v52 = vsub.f32 0.0, %v1031_v26  ;;  %v3908_v9 = vpop.eup %2646  ;;  %2648 = vrsqrt.f32 %v3891_v31  ;;  %v3924_v54 = vld [vmem:[%s5509_s5 + $0x8] sm:$0xff] }
 0x113   :  { %v3911_v28 = vmax.f32 %v545_v43, 0.0  ;;  %v1325_v63 = vmul.f32 %v2645_v23, %v1197_v10  ;;  %v1097_v12 = vadd.f32 2.0, %v1065_v37  ;;  %v933_v34 = vmul.f32 %v932_v56, %v3709_v0  ;;  %v2183_v56 = vpop.permute.xlu2 %2182 }
 0x114   :  { %v908_v25 = vmul.f32 %v3819_v42, %v907_v58  ;;  %v1259_v50 = vmul.f32 1.442695, %v1226_v52  ;;  %v5588_v30 = vand.u32 2147483648, %v3493_v33  ;;  %v2363_v36 = vmul.f32 %v2331_v15, %v2099_v47 }
 0x115   :  { %v1357_v27 = vsub.f32 %v3829_v57, %v1324_v5  ;;  %v1129_v43 = vmul.f32 %v1031_v26, %v1031_v26  ;;  %v1032_v49 = vmul.f32 %v3670_v18, %v3904_v7  ;;  %v1419_v42 = vmul.f32 %v3908_v9, %v3857_v53 }
 0x116   :  { %v662_v51 = vsel %vm660_vm1, %v5588_v30, %v3761_v19  ;;  %vm2038_vm5 = vcmp.gt.f32.partialorder %v1974_v20, 0.5  ;;  %2650 = vpow2.f32 %v1259_v50  ;;  %v3934_v19 = vsel %vm766_vm3, %v3691_v11, %v765_v6 }
 0x117   :  { %v970_v33 = vmax.f32 %v3650_v13, %v662_v51  ;;  %5589 = vst [vmem:[#allocation44_spill] sm:$0xff] %v3934_v19  ;;  %2652 = vrsqrt.f32 %v3911_v28  ;;  %v1358_v37 = vsub.f32 %v3829_v57, %v1325_v63  ;;  %v1161_v26 = vadd.f32 %v1129_v43, %v1097_v12 }
 0x118   :  { %v3939_v23 = vmul.f32 %v920_v41, %v3733_v48  ;;  %vm2006_vm6 = vcmp.gt.f32.partialorder %v1974_v20, 1.5  ;;  %v1943_v58 = vunpack.c.0.s8 %v3924_v54  ;;  %v3945_v5 = vpop.eup %2648  ;;  %v3948_v6 = vmul.f32 %v1357_v27, %v3748_v39 }
 0x119   :  { %v3943_v15 = vmin.f32 %v3659_v46, %v970_v33  ;;  %v2070_v10 = vsel %vm2038_vm5, 0.2, %v5587_v29  ;;  %v1066_v47 = vmul.f32 2.0, %v1032_v49  ;;  %v1227_v52 = vsub.f32 0.0, %v1032_v49 }
 0x11a   :  { %vm684_vm7 = vcmp.eq.f32.partialorder %v3219_v61, 0.0  ;;  %v3955_v41 = vsel %vm934_vm4, %v3709_v0, %v933_v34  ;;  %v3958_v63 = vmul.f32 %v908_v25, %v3743_v38  ;;  %v1420_v12 = vsub.f32 1.0, %v1419_v42 }
 0x11b   :  { %5590 = vst [vmem:[#allocation45_spill] sm:$0xff] %v3955_v41  ;;  %v3960_v50 = vmul.f32 322.0637, %v2363_v36  ;;  %v2334_v39 = vmul.f32 %v3878_v8, %v2183_v56  ;;  %v3964_v30 = vmul.f32 %v1358_v37, %v3765_v60  ;;  %v1194_v51 = vmul.f32 %v3777_v55, %v1161_v26  ;;  %v5595_v41 = vld [vmem:[#allocation9_spill] sm:$0xff] }
 0x11c   :  { %v1261_v27 = vmul.f32 1.442695, %v1227_v52  ;;  %v2651_v43 = vpop.eup %2650  ;;  %v952_v33 = vmul.f32 %v3945_v5, %v3891_v31  ;;  %v2102_v34 = vsel %vm2006_vm6, 1.0, %v2070_v10  ;;  %v1975_v3 = vcvt.s32.f32 %v1943_v58 }
 0x11d   :  { %v1036_v25 = vmul.f32 %v3670_v18, %v3943_v15  ;;  %v3972_v36 = vpop.eup %2652  ;;  %2654 = vrcp.f32 %v3948_v6  ;;  %v1940_v60 = vunpack.c.1.s8 %v3798_v35  ;;  %v1322_v42 = vmul.f32 %v2651_v43, %v1194_v51 }
 0x11e   :  { %v1098_v37 = vadd.f32 2.0, %v1066_v47  ;;  %v1421_v26 = vmul.f32 %v3908_v9, %v1420_v12  ;;  %v1427_v56 = vand.u32 2147483647, %v3857_v53  ;;  %v1429_v52 = vand.u32 2147483648, %v3857_v53 }
 0x11f   :  { %2656 = vpow2.f32 %v1261_v27  ;;  %v2366_v20 = vmul.f32 %v2334_v39, %v2102_v34  ;;  %v1355_v58 = vsub.f32 %v3829_v57, %v1322_v42  ;;  %v1130_v10 = vmul.f32 %v1032_v49, %v1032_v49 }
 0x120   :  { %2658 = vrcp.f32 %v3964_v30  ;;  %vm1423_vm8 = vweird.f32 %v3857_v53  ;;  %v953_v19 = vmul.f32 %v3945_v5, %v952_v33  ;;  %v940_v47 = vmul.f32 %v3972_v36, %v3911_v28  ;;  %v2188_v33 = vpop.permute.xlu2 %2187 }
 0x121   :  { %v1231_v51 = vsub.f32 0.0, %v1036_v25  ;;  %vm2039_vm9 = vcmp.gt.f32.partialorder %v1975_v3, 0.5  ;;  %v1972_v12 = vcvt.s32.f32 %v1940_v60  ;;  %v3986_v43 = vmul.f32 %v1355_v58, %v3851_v4  ;;  %v5593_v4 = vld [vmem:[#allocation16_spill] sm:$0xff] }
 0x122   :  { %v1162_v27 = vadd.f32 %v1130_v10, %v1098_v37  ;;  %v1422_v39 = vadd.f32 %v3908_v9, %v1421_v26  ;;  %vm1424_vm10 = vweird.f32 %v3908_v9  ;;  %vm3990_vm11 = vcmp.eq.f32.partialorder %v1427_v56, 8.507059e+37 }
 0x123   :  { %v1430_v34 = vor.u32 1.1754944e-38, %v1429_v52  ;;  %v3994_v42 = vpop.eup %2654  ;;  %v3996_v11 = vmul.f32 322.0637, %v2366_v20  ;;  %2660 = vrcp.f32 %v3986_v43  ;;  %v1070_v60 = vmul.f32 2.0, %v1036_v25  ;;  %vm4016_vm14 = vmor %vm1423_vm8, %vm1424_vm10 }
 0x124   :  { %v5594_v37 = vand.u32 2147483648, %v3219_v61  ;;  %v4005_v56 = vmul.f32 %v3972_v36, %v940_v47  ;;  %vm2007_vm12 = vcmp.gt.f32.partialorder %v1975_v3, 1.5  ;;  %v2071_v52 = vsel %vm2039_vm9, 0.2, %v5587_v29 }
 0x125   :  { %v2657_v58 = vpop.eup %2656  ;;  %v1269_v10 = vmul.f32 1.442695, %v1231_v51  ;;  %vm696_vm13 = vcmp.eq.f32.partialorder %v5595_v41, 0.0  ;;  %v4023_v47 = vmul.f32 %v3878_v8, %v2188_v33  ;;  %vm2036_vm15 = vcmp.gt.f32.partialorder %v1972_v12, 0.5 }
 0x126   :  { %v686_v26 = vsel %vm684_vm7, %v5594_v37, %v5593_v4  ;;  %v4009_v20 = vpop.eup %2658  ;;  %v4020_v4 = vmul.f32 0.5, %v953_v19  ;;  %v1195_v3 = vmul.f32 %v3777_v55, %v1162_v27  ;;  %v1426_v51 = vsel %vm4016_vm14, %v3908_v9, %v1422_v39  ;;  %v2173_v9 = vpop.permute.xlu0 %2172 }
 0x127   :  { %v1464_v37 = vmul.f32 %v3994_v42, %v3948_v6  ;;  %v1941_v53 = vunpack.c.2.s8 %v3798_v35  ;;  %v972_v0 = vmax.f32 %v3650_v13, %v686_v26  ;;  %v4033_v22 = vsel %vm2007_vm12, 1.0, %v2071_v52 }
 0x128   :  { %vm2004_vm0 = vcmp.gt.f32.partialorder %v1972_v12, 1.5  ;;  %v1102_v19 = vadd.f32 2.0, %v1070_v60  ;;  %v1323_v33 = vmul.f32 %v2657_v58, %v1195_v3  ;;  %v1472_v45 = vand.u32 2147483647, %v3948_v6 }
 0x129   :  { %v1474_v27 = vand.u32 2147483648, %v3948_v6  ;;  %v1479_v61 = vmul.f32 %v4009_v20, %v3964_v30  ;;  %2662 = vpow2.f32 %v1269_v10  ;;  %v4039_v39 = vpop.eup %2660  ;;  %v4043_v35 = vsel %vm3990_vm11, %v1430_v34, %v1426_v51 }
 0x12a   :  { %v2068_v26 = vsel %vm2036_vm15, 0.2, %v5587_v29  ;;  %v1134_v60 = vmul.f32 %v1036_v25, %v1036_v25  ;;  %v1356_v58 = vsub.f32 %v3829_v57, %v1323_v33  ;;  %v1465_v52 = vsub.f32 1.0, %v1464_v37  ;;  %v5600_v25 = vld [vmem:[#allocation17_spill] sm:$0xff] }
 0x12b   :  { %v1434_v3 = vmul.f32 %v4039_v39, %v3986_v43  ;;  %v1973_v32 = vcvt.s32.f32 %v1941_v53  ;;  %v4051_v21 = vmin.f32 %v3659_v46, %v972_v0  ;;  %vm648_vm1 = vcmp.eq.f32.partialorder %v3412_v24, 0.0 }
 0x12c   :  { %v1489_v49 = vand.u32 2147483648, %v3964_v30  ;;  %v2332_v34 = vmul.f32 %v3878_v8, %v2173_v9  ;;  %v1166_v10 = vadd.f32 %v1134_v60, %v1102_v19  ;;  %v4057_v51 = vmul.f32 %v1356_v58, %v3904_v7 }
 0x12d   :  { %vm1468_vm2 = vweird.f32 %v3948_v6  ;;  %v1480_v37 = vsub.f32 1.0, %v1479_v61  ;;  %v1435_v53 = vsub.f32 1.0, %v1434_v3  ;;  %v2100_v0 = vsel %vm2004_vm0, 1.0, %v2068_v26 }
 0x12e   :  { %vm1469_vm3 = vweird.f32 %v3994_v42  ;;  %v1475_v33 = vor.u32 1.1754944e-38, %v1474_v27  ;;  %2664 = vrcp.f32 %v4057_v51  ;;  %v1466_v7 = vmul.f32 %v3994_v42, %v1465_v52 }
 0x12f   :  { %v2663_v19 = vpop.eup %2662  ;;  %v1436_v9 = vmul.f32 %v4039_v39, %v1435_v53  ;;  %vm2037_vm4 = vcmp.gt.f32.partialorder %v1973_v32, 0.5  ;;  %v1038_v60 = vmul.f32 %v3670_v18, %v4051_v21  ;;  %vm1483_vm5 = vweird.f32 %v3964_v30  ;;  %v2178_v53 = vpop.permute.xlu1 %2177  ;;  %vm4113_vm12 = vmor %vm1468_vm2, %vm1469_vm3 }
 0x130   :  { %v4071_v12 = vor.u32 1.1754944e-38, %v1489_v49  ;;  %v2364_v61 = vmul.f32 %v2332_v34, %v2100_v0  ;;  %v1199_v26 = vmul.f32 %v3777_v55, %v1166_v10  ;;  %vm4075_vm6 = vcmp.eq.f32.partialorder %v1472_v45, 8.507059e+37 }
 0x131   :  { %v1481_v52 = vmul.f32 %v4009_v20, %v1480_v37  ;;  %v1437_v3 = vadd.f32 %v4039_v39, %v1436_v9  ;;  %vm1439_vm7 = vweird.f32 %v4039_v39  ;;  %v5601_v49 = vand.u32 2147483648, %v5595_v41 }
 0x132   :  { %v1444_v0 = vand.u32 2147483648, %v3986_v43  ;;  %v1327_v10 = vmul.f32 %v2663_v19, %v1199_v26  ;;  %vm2005_vm8 = vcmp.gt.f32.partialorder %v1973_v32, 1.5  ;;  %v2069_v45 = vsel %vm2037_vm4, 0.2, %v5587_v29 }
 0x133   :  { %v698_v34 = vsel %vm696_vm13, %v5601_v49, %v5600_v25  ;;  %v1467_v37 = vadd.f32 %v3994_v42, %v1466_v7  ;;  %vm1438_vm9 = vweird.f32 %v3986_v43  ;;  %v1442_v9 = vand.u32 2147483647, %v3986_v43 }
 0x134   :  { %v1233_v27 = vsub.f32 0.0, %v1038_v60  ;;  %v2665_v1 = vpop.eup %2664  ;;  %vm1484_vm10 = vweird.f32 %v4009_v20  ;;  %vm4094_vm11 = vmor %vm1438_vm9, %vm1439_vm7  ;;  %v2396_v25 = vmul.f32 322.0637, %v2364_v61  ;;  %v2333_v19 = vmul.f32 %v3878_v8, %v2178_v53 }
 0x135   :  { %v973_v32 = vmax.f32 %v3650_v13, %v698_v34  ;;  %v1441_v7 = vsel %vm4094_vm11, %v4039_v39, %v1437_v3  ;;  %v1449_v26 = vmul.f32 %v2665_v1, %v4057_v51  ;;  %v2101_v43 = vsel %vm2005_vm8, 1.0, %v2069_v45  ;;  %vm4129_vm15 = vmor %vm1483_vm5, %vm1484_vm10 }
 0x136   :  { %v5604_v49 = vand.u32 2147483648, %v3412_v24  ;;  %v1482_v53 = vadd.f32 %v4009_v20, %v1481_v52  ;;  %v1445_v39 = vor.u32 1.1754944e-38, %v1444_v0  ;;  %v1360_v3 = vsub.f32 %v3829_v57, %v1327_v10 }
 0x137   :  { %v1072_v34 = vmul.f32 2.0, %v1038_v60  ;;  %v1471_v45 = vsel %vm4113_vm12, %v3994_v42, %v1467_v37  ;;  %vm1443_vm13 = vcmp.eq.f32.partialorder %v1442_v9, 8.507059e+37  ;;  %v1450_v24 = vsub.f32 1.0, %v1449_v26 }
 0x138   :  { %v650_v2 = vsel %vm648_vm1, %v5604_v49, %v3645_v16  ;;  %v1273_v16 = vmul.f32 1.442695, %v1233_v27  ;;  %vm780_vm14 = vcmp.eq.f32.partialorder %v3324_v44, 0.0  ;;  %v1446_v6 = vsel %vm1443_vm13, %v1445_v39, %v1441_v7 }
 0x139   :  { %v1459_v41 = vand.u32 2147483648, %v4057_v51  ;;  %v2365_v49 = vmul.f32 %v2333_v19, %v2101_v43  ;;  %v969_v40 = vmax.f32 %v3650_v13, %v650_v2  ;;  %v1451_v42 = vmul.f32 %v2665_v1, %v1450_v24 }
 0x13a   :  { %vm1454_vm0 = vweird.f32 %v2665_v1  ;;  %v1457_v27 = vand.u32 2147483647, %v4057_v51  ;;  %v4135_v0 = vmin.f32 %v3659_v46, %v973_v32  ;;  %v1476_v10 = vsel %vm4075_vm6, %v1475_v33, %v1471_v45 }
 0x13b   :  { %v1486_v2 = vsel %vm4129_vm15, %v4009_v20, %v1482_v53  ;;  %v4143_v37 = vmul.f32 %v1360_v3, %v3943_v15  ;;  %v1104_v9 = vadd.f32 2.0, %v1072_v34  ;;  %v1900_v19 = vsub.f32 %v1446_v6, %v3898_v59 }
 0x13c   :  { %v1452_v7 = vadd.f32 %v2665_v1, %v1451_v42  ;;  %vm1453_vm1 = vweird.f32 %v4057_v51  ;;  %2666 = vpow2.f32 %v1273_v16  ;;  %v1460_v32 = vor.u32 1.1754944e-38, %v1459_v41 }
 0x13d   :  { %vm1455_vm2 = vmor %vm1453_vm1, %vm1454_vm0  ;;  %v2397_v26 = vmul.f32 322.0637, %v2365_v49  ;;  %v1136_v43 = vmul.f32 %v1038_v60, %v1038_v60  ;;  %v4148_v33 = vmin.f32 %v3659_v46, %v969_v40  ;;  %v2428_v58 = vmul.f32 %v2396_v25, %v1900_v19 }
 0x13e   :  { %v1456_v61 = vsel %vm1455_vm2, %v2665_v1, %v1452_v7  ;;  %vm1458_vm3 = vcmp.eq.f32.partialorder %v1457_v27, 8.507059e+37  ;;  %v1039_v15 = vmul.f32 %v3670_v18, %v4135_v0  ;;  %v5609_v20 = vand.u32 2147483647, %v3964_v30  ;;  %v4183_v27 = vld [vmem:[%s5509_s5 + $0x10] sm:$0xff] }
 0x13f   :  { %2668 = vrcp.f32 %v4143_v37  ;;  %v1461_v51 = vsel %vm1458_vm3, %v1460_v32, %v1456_v61  ;;  %v1168_v53 = vadd.f32 %v1136_v43, %v1104_v9  ;;  %v5610_v39 = vsub.f32 %v4043_v35, %v3898_v59  ;;  %v2198_v61 = vpop.permute.xlu2 %2197 }
 0x140   :  { %vm1488_vm4 = vcmp.eq.f32.partialorder %v5609_v20, 8.507059e+37  ;;  %v1902_v40 = vsub.f32 %v1476_v10, %v3898_v59  ;;  %v1901_v25 = vsub.f32 %v1461_v51, %v3898_v59  ;;  %vm922_vm5 = vcmp.eq.f32.partialorder %v3733_v48, inf }
 0x141   :  { %v2427_v60 = vmul.f32 %v3960_v50, %v5610_v39  ;;  %v1491_v1 = vsel %vm1488_vm4, %v4071_v12, %v1486_v2  ;;  %vm910_vm6 = vcmp.eq.f32.partialorder %v3743_v38, inf  ;;  %v942_v30 = vmul.f32 0.5, %v4005_v56 }
 0x142   :  { %v2367_v3 = vmul.f32 %v4023_v47, %v4033_v22  ;;  %v5611_v34 = vunpack.c.2.s8 %v3924_v54  ;;  %v1035_v50 = vmul.f32 %v3670_v18, %v4148_v33  ;;  %v2667_v45 = vpop.eup %2666  ;;  %v2429_v12 = vmul.f32 %v2397_v26, %v1901_v25 }
 0x143   :  { %v2460_v24 = vadd.f32 %v2428_v58, %v2427_v60  ;;  %v1234_v16 = vsub.f32 0.0, %v1039_v15  ;;  %v5612_v6 = vand.u32 2147483648, %v3324_v44  ;;  %v955_v56 = vsub.f32 1.5, %v4020_v4 }
 0x144   :  { %v1977_v35 = vcvt.s32.f32 %v5611_v34  ;;  %v1903_v22 = vsub.f32 %v1491_v1, %v3898_v59  ;;  %v1201_v47 = vmul.f32 %v3777_v55, %v1168_v53  ;;  %v1069_v49 = vmul.f32 2.0, %v1035_v50 }
 0x145   :  { %v782_v41 = vsel %vm780_vm14, %v5612_v6, %v3546_v62  ;;  %v2430_v52 = vmul.f32 %v3996_v11, %v1902_v40  ;;  %v2461_v42 = vadd.f32 %v2460_v24, %v2429_v12  ;;  %v1073_v10 = vmul.f32 2.0, %v1039_v15  ;;  %v4185_v9 = vpop.eup %2668 }
 0x146   :  { %v1230_v2 = vsub.f32 0.0, %v1035_v50  ;;  %v2399_v44 = vmul.f32 322.0637, %v2367_v3  ;;  %vm2041_vm7 = vcmp.gt.f32.partialorder %v1977_v35, 0.5  ;;  %v1329_v62 = vmul.f32 %v2667_v45, %v1201_v47 }
 0x147   :  { %v980_v4 = vmax.f32 %v3650_v13, %v782_v41  ;;  %v2462_v19 = vadd.f32 %v2461_v42, %v2430_v52  ;;  %v1275_v7 = vmul.f32 1.442695, %v1234_v16  ;;  %v1101_v32 = vadd.f32 2.0, %v1069_v49 }
 0x148   :  { %v1267_v26 = vmul.f32 1.442695, %v1230_v2  ;;  %v2431_v11 = vmul.f32 %v2399_v44, %v1903_v22  ;;  %vm2009_vm8 = vcmp.gt.f32.partialorder %v1977_v35, 1.5  ;;  %v1947_v43 = vunpack.c.0.s8 %v4183_v27  ;;  %v2208_v44 = vpop.permute.xlu0 %2207 }
 0x149   :  { %v1133_v58 = vmul.f32 %v1035_v50, %v1035_v50  ;;  %v1509_v20 = vmul.f32 %v4185_v9, %v4143_v37  ;;  %v2073_v51 = vsel %vm2041_vm7, 0.2, %v5587_v29  ;;  %v1105_v53 = vadd.f32 2.0, %v1073_v10 }
 0x14a   :  { %2670 = vpow2.f32 %v1267_v26  ;;  %vm792_vm9 = vcmp.eq.f32.partialorder %v3302_v14, 0.0  ;;  %v1362_v39 = vsub.f32 %v3829_v57, %v1329_v62  ;;  %v4194_v40 = vadd.f32 %v2462_v19, %v2431_v11  ;;  %v5613_v11 = vld [vmem:[#allocation25_spill] sm:$0xff] }
 0x14b   :  { %v1165_v60 = vadd.f32 %v1133_v58, %v1101_v32  ;;  %v4197_v1 = vmin.f32 %v3659_v46, %v980_v4  ;;  %v4203_v25 = vsel %vm922_vm5, %v3733_v48, %v3939_v23  ;;  %v956_v3 = vmul.f32 %v3945_v5, %v955_v56 }
 0x14c   :  { %v943_v34 = vsub.f32 1.5, %v942_v30  ;;  %2672 = vpow2.f32 %v1275_v7  ;;  %v2337_v50 = vmul.f32 %v3878_v8, %v2198_v61  ;;  %v1979_v45 = vcvt.s32.f32 %v1947_v43 }
 0x14d   :  { %v1948_v24 = vunpack.c.1.s8 %v4183_v27  ;;  %v1137_v12 = vmul.f32 %v1039_v15, %v1039_v15  ;;  %v4212_v16 = vsel %vm910_vm6, %v3743_v38, %v3958_v63  ;;  %v1510_v6 = vsub.f32 1.0, %v1509_v20 }
 0x14e   :  { %v2105_v23 = vsel %vm2009_vm8, 1.0, %v2073_v51  ;;  %v1944_v41 = vunpack.c.1.s8 %v3924_v54  ;;  %v4217_v5 = vmul.f32 %v1362_v39, %v4051_v21  ;;  %v1198_v56 = vmul.f32 %v3777_v55, %v1165_v60 }
 0x14f   :  { %v1169_v30 = vadd.f32 %v1137_v12, %v1105_v53  ;;  %v1046_v15 = vmul.f32 %v3670_v18, %v4197_v1  ;;  %vm672_vm10 = vcmp.eq.f32.partialorder %v3631_v17, 0.0  ;;  %v4224_v63 = vmul.f32 %v956_v3, %v3891_v31  ;;  %v2193_v12 = vpop.permute.xlu1 %2192 }
 0x150   :  { %v2671_v22 = vpop.eup %2670  ;;  %v944_v47 = vmul.f32 %v3972_v36, %v943_v34  ;;  %v949_v49 = vand.u32 2147483648, %v3911_v28  ;;  %v4229_v21 = vmul.f32 %v2337_v50, %v2105_v23  ;;  %vm2043_vm11 = vcmp.gt.f32.partialorder %v1979_v45, 0.5 }
 0x151   :  { %v1980_v52 = vcvt.s32.f32 %v1948_v24  ;;  %v1326_v42 = vmul.f32 %v2671_v22, %v1198_v56  ;;  %v1511_v2 = vmul.f32 %v4185_v9, %v1510_v6  ;;  %vm1513_vm12 = vweird.f32 %v4143_v37 }
 0x152   :  { %v2673_v10 = vpop.eup %2672  ;;  %vm2011_vm13 = vcmp.gt.f32.partialorder %v1979_v45, 1.5  ;;  %v1976_v62 = vcvt.s32.f32 %v1944_v41  ;;  %2674 = vrcp.f32 %v4217_v5  ;;  %v1202_v4 = vmul.f32 %v3777_v55, %v1169_v30  ;;  %v5619_v30 = vld [vmem:[#allocation43_spill] sm:$0xff] }
 0x153   :  { %v1359_v36 = vsub.f32 %v3829_v57, %v1326_v42  ;;  %v1241_v19 = vsub.f32 0.0, %v1046_v15  ;;  %v1517_v7 = vand.u32 2147483647, %v4143_v37  ;;  %v1519_v32 = vand.u32 2147483648, %v4143_v37 }
 0x154   :  { %v2075_v26 = vsel %vm2043_vm11, 0.2, %v5587_v29  ;;  %v5614_v43 = vand.u32 2147483648, %v3302_v14  ;;  %vm958_vm14 = vcmp.eq.f32.partialorder %v3891_v31, inf  ;;  %v2339_v61 = vmul.f32 %v3878_v8, %v2208_v44  ;;  %v5621_v44 = vld [vmem:[#allocation14_spill] sm:$0xff] }
 0x155   :  { %vm2044_vm15 = vcmp.gt.f32.partialorder %v1980_v52, 0.5  ;;  %v1330_v20 = vmul.f32 %v2673_v10, %v1202_v4  ;;  %v4247_v51 = vmul.f32 %v1359_v36, %v4148_v33  ;;  %v1512_v53 = vadd.f32 %v4185_v9, %v1511_v2  ;;  %v2213_v33 = vpop.permute.xlu2 %2212 }
 0x156   :  { %v794_v58 = vsel %vm792_vm9, %v5614_v43, %v5613_v11  ;;  %vm1514_vm0 = vweird.f32 %v4185_v9  ;;  %vm2040_vm1 = vcmp.gt.f32.partialorder %v1976_v62, 0.5  ;;  %v1080_v39 = vmul.f32 2.0, %v1046_v15 }
 0x157   :  { %v2107_v60 = vsel %vm2011_vm13, 1.0, %v2075_v26  ;;  %2676 = vrcp.f32 %v4247_v51  ;;  %v1289_v14 = vmul.f32 1.442695, %v1241_v19  ;;  %v981_v3 = vmax.f32 %v3650_v13, %v794_v58  ;;  %vm4263_vm4 = vmor %vm1513_vm12, %vm1514_vm0 }
 0x158   :  { %vm4254_vm2 = vcmp.eq.f32.partialorder %v1517_v7, 8.507059e+37  ;;  %v1520_v50 = vor.u32 1.1754944e-38, %v1519_v32  ;;  %vm2012_vm3 = vcmp.gt.f32.partialorder %v1980_v52, 1.5  ;;  %v2076_v24 = vsel %vm2044_vm15, 0.2, %v5587_v29  ;;  %v4259_v6 = vpop.eup %2674 }
 0x159   :  { %v1363_v23 = vsub.f32 %v3829_v57, %v1330_v20  ;;  %vm2008_vm5 = vcmp.gt.f32.partialorder %v1976_v62, 1.5  ;;  %v2072_v41 = vsel %vm2040_vm1, 0.2, %v5587_v29  ;;  %v5620_v56 = vand.u32 2147483648, %v3631_v17 }
 0x15a   :  { %v1516_v37 = vsel %vm4263_vm4, %v4185_v9, %v1512_v53  ;;  %v2371_v42 = vmul.f32 %v2339_v61, %v2107_v60  ;;  %v1112_v10 = vadd.f32 2.0, %v1080_v39  ;;  %vm816_vm6 = vcmp.eq.f32.partialorder %v5621_v44, 0.0  ;;  %v4310_v61 = vld [vmem:[%s5509_s5 + $0x20] sm:$0xff] }
 0x15b   :  { %v674_v22 = vsel %vm672_vm10, %v5620_v56, %v5619_v30  ;;  %v2340_v4 = vmul.f32 %v3878_v8, %v2213_v33  ;;  %v2336_v62 = vmul.f32 %v3878_v8, %v2193_v12  ;;  %2678 = vpow2.f32 %v1289_v14 }
 0x15c   :  { %v971_v2 = vmax.f32 %v3650_v13, %v674_v22  ;;  %v4283_v36 = vmin.f32 %v3659_v46, %v981_v3  ;;  %v1539_v17 = vmul.f32 %v4259_v6, %v4217_v5  ;;  %v2108_v19 = vsel %vm2012_vm3, 1.0, %v2076_v24 }
 0x15d   :  { %v2104_v9 = vsel %vm2008_vm5, 1.0, %v2072_v41  ;;  %v1144_v7 = vmul.f32 %v1046_v15, %v1046_v15  ;;  %v2677_v32 = vpop.eup %2676  ;;  %v4289_v26 = vmul.f32 %v944_v47, %v3911_v28  ;;  %v1521_v11 = vsel %vm4254_vm2, %v1520_v50, %v1516_v37  ;;  %v5622_v50 = vld [vmem:[#allocation13_spill] sm:$0xff] }
 0x15e   :  { %v4294_v43 = vmul.f32 %v1363_v23, %v4135_v0  ;;  %v4297_v58 = vmin.f32 %v3659_v46, %v971_v2  ;;  %v4303_v52 = vsel %vm958_vm14, %v3891_v31, %v4224_v63  ;;  %v2401_v15 = vmul.f32 322.0637, %v4229_v21  ;;  %v5623_v2 = vld [vmem:[#allocation30_spill] sm:$0xff] }
 0x15f   :  { %v1494_v47 = vmul.f32 %v2677_v32, %v4247_v51  ;;  %v1176_v0 = vadd.f32 %v1144_v7, %v1112_v10  ;;  %v4312_v20 = vmul.f32 322.0637, %v2371_v42  ;;  %v2372_v53 = vmul.f32 %v2340_v4, %v2108_v19 }
 0x160   :  { %v2368_v39 = vmul.f32 %v2336_v62, %v2104_v9  ;;  %v1047_v60 = vmul.f32 %v3670_v18, %v4283_v36  ;;  %v1905_v63 = vsub.f32 %v1521_v11, %v3898_v59  ;;  %v1540_v14 = vsub.f32 1.0, %v1539_v17 }
 0x161   :  { %v1549_v21 = vand.u32 2147483648, %v4217_v5  ;;  %v1495_v3 = vsub.f32 1.0, %v1494_v47  ;;  %v2679_v34 = vpop.eup %2678  ;;  %vm828_vm7 = vcmp.eq.f32.partialorder %v5622_v50, 0.0  ;;  %2680 = vrcp.f32 %v4294_v43 }
 0x162   :  { %v1504_v33 = vand.u32 2147483648, %v4247_v51  ;;  %v1955_v24 = vunpack.c.0.s8 %v4310_v61  ;;  %v1037_v12 = vmul.f32 %v3670_v18, %v4297_v58  ;;  %vm1499_vm8 = vweird.f32 %v2677_v32 }
 0x163   :  { %v1496_v45 = vmul.f32 %v2677_v32, %v1495_v3  ;;  %v1502_v23 = vand.u32 2147483647, %v4247_v51  ;;  %v1209_v41 = vmul.f32 %v3777_v55, %v1176_v0  ;;  %v2400_v30 = vmul.f32 322.0637, %v2368_v39 }
 0x164   :  { %v1242_v56 = vsub.f32 0.0, %v1047_v60  ;;  %v1071_v22 = vmul.f32 2.0, %v1037_v12  ;;  %v1232_v37 = vsub.f32 0.0, %v1037_v12  ;;  %vm1498_vm9 = vweird.f32 %v4247_v51 }
 0x165   :  { %v1497_v42 = vadd.f32 %v2677_v32, %v1496_v45  ;;  %v1337_v10 = vmul.f32 %v2679_v34, %v1209_v41  ;;  %v5624_v4 = vand.u32 2147483648, %v5621_v44  ;;  %vm1500_vm10 = vmor %vm1498_vm9, %vm1499_vm8  ;;  %v1505_v17 = vor.u32 1.1754944e-38, %v1504_v33  ;;  %v5625_v45 = vld [vmem:[#allocation10_spill] sm:$0xff] }
 0x166   :  { %v1987_v19 = vcvt.s32.f32 %v1955_v24  ;;  %v1103_v9 = vadd.f32 2.0, %v1071_v22  ;;  %v1271_v7 = vmul.f32 1.442695, %v1232_v37  ;;  %vm1503_vm11 = vcmp.eq.f32.partialorder %v1502_v23, 8.507059e+37 }
 0x167   :  { %v818_v62 = vsel %vm816_vm6, %v5624_v4, %v5623_v2  ;;  %v1501_v11 = vsel %vm1500_vm10, %v2677_v32, %v1497_v42  ;;  %v1081_v47 = vmul.f32 2.0, %v1047_v60  ;;  %v1135_v0 = vmul.f32 %v1037_v12, %v1037_v12  ;;  %v4332_v39 = vpop.eup %2680 }
 0x168   :  { %v1506_v3 = vsel %vm1503_vm11, %v1505_v17, %v1501_v11  ;;  %v1291_v51 = vmul.f32 1.442695, %v1242_v56  ;;  %2682 = vpow2.f32 %v1271_v7  ;;  %v983_v34 = vmax.f32 %v3650_v13, %v818_v62  ;;  %v2248_v7 = vpop.permute.xlu0 %2247 }
 0x169   :  { %vm708_vm12 = vcmp.eq.f32.partialorder %v5625_v45, 0.0  ;;  %v4336_v44 = vmul.f32 322.0637, %v2372_v53  ;;  %v1904_v33 = vsub.f32 %v1506_v3, %v3898_v59  ;;  %v1370_v24 = vsub.f32 %v3829_v57, %v1337_v10  ;;  %v5626_v53 = vld [vmem:[#allocation29_spill] sm:$0xff] }
 0x16a   :  { %v1167_v41 = vadd.f32 %v1135_v0, %v1103_v9  ;;  %v2433_v32 = vmul.f32 %v2401_v15, %v1905_v63  ;;  %v1541_v23 = vmul.f32 %v4259_v6, %v1540_v14  ;;  %vm1543_vm13 = vweird.f32 %v4217_v5  ;;  %v4368_v9 = vld [vmem:[%s5508_s4 + $0x1] ss:$0 sm:$0xff] }
 0x16b   :  { %v1547_v12 = vand.u32 2147483647, %v4217_v5  ;;  %v1550_v56 = vor.u32 1.1754944e-38, %v1549_v21  ;;  %v1554_v22 = vmul.f32 %v4332_v39, %v4294_v43  ;;  %v2432_v37 = vmul.f32 %v2400_v30, %v1904_v33 }
 0x16c   :  { %v1113_v42 = vadd.f32 2.0, %v1081_v47  ;;  %v5627_v2 = vand.u32 2147483648, %v5622_v50  ;;  %vm2051_vm14 = vcmp.gt.f32.partialorder %v1987_v19, 0.5  ;;  %v1956_v15 = vunpack.c.1.s8 %v4310_v61 }
 0x16d   :  { %2684 = vpow2.f32 %v1291_v51  ;;  %v4352_v63 = vmin.f32 %v3659_v46, %v983_v34  ;;  %v2464_v14 = vadd.f32 %v4194_v40, %v2432_v37  ;;  %v4356_v21 = vmul.f32 %v1370_v24, %v4197_v1 }
 0x16e   :  { %v830_v10 = vsel %vm828_vm7, %v5627_v2, %v5626_v53  ;;  %v1145_v30 = vmul.f32 %v1047_v60, %v1047_v60  ;;  %v1200_v4 = vmul.f32 %v3777_v55, %v1167_v41  ;;  %v2683_v62 = vpop.eup %2682  ;;  %v1542_v17 = vadd.f32 %v4259_v6, %v1541_v23 }
 0x16f   :  { %vm1544_vm15 = vweird.f32 %v4259_v6  ;;  %vm4361_vm0 = vcmp.eq.f32.partialorder %v1547_v12, 8.507059e+37  ;;  %v1946_v40 = vunpack.c.3.s8 %v3924_v54  ;;  %v984_v1 = vmax.f32 %v3650_v13, %v830_v10 }
 0x170   :  { %v1555_v60 = vsub.f32 1.0, %v1554_v22  ;;  %v1177_v11 = vadd.f32 %v1145_v30, %v1113_v42  ;;  %v1328_v47 = vmul.f32 %v2683_v62, %v1200_v4  ;;  %v4372_v0 = vadd.f32 %v2464_v14, %v2433_v32  ;;  %vm4395_vm2 = vmor %vm1543_vm13, %vm1544_vm15  ;;  %v5634_v62 = vld [vmem:[#allocation20_spill] sm:$0xff] }
 0x171   :  { %vm2019_vm1 = vcmp.gt.f32.partialorder %v1987_v19, 1.5  ;;  %v2083_v3 = vsel %vm2051_vm14, 0.2, %v5587_v29  ;;  %v1988_v51 = vcvt.s32.f32 %v1956_v15  ;;  %v1049_v34 = vmul.f32 %v3670_v18, %v4352_v63  ;;  %v5630_v19 = vld [vmem:[#allocation19_spill] sm:$0xff] }
 0x172   :  { %v1562_v33 = vand.u32 2147483647, %v4294_v43  ;;  %v1564_v54 = vand.u32 2147483648, %v4294_v43  ;;  %2686 = vrcp.f32 %v4356_v21  ;;  %v1361_v24 = vsub.f32 %v3829_v57, %v1328_v47  ;;  %v2203_v47 = vpop.permute.xlu1 %2202 }
 0x173   :  { %v2685_v41 = vpop.eup %2684  ;;  %v2347_v32 = vmul.f32 %v4368_v9, %v2248_v7  ;;  %v1978_v23 = vcvt.s32.f32 %v1946_v40  ;;  %v4384_v12 = vmin.f32 %v3659_v46, %v984_v1  ;;  %v5631_v22 = vand.u32 2147483648, %v5625_v45 }
 0x174   :  { %v1556_v53 = vmul.f32 %v4332_v39, %v1555_v60  ;;  %v2115_v2 = vsel %vm2019_vm1, 1.0, %v2083_v3  ;;  %v1210_v10 = vmul.f32 %v3777_v55, %v1177_v11  ;;  %v4402_v15 = vmul.f32 %v1361_v24, %v4297_v58 }
 0x175   :  { %v710_v37 = vsel %vm708_vm12, %v5631_v22, %v5630_v19  ;;  %v1546_v45 = vsel %vm4395_vm2, %v4259_v6, %v1542_v17  ;;  %vm1558_vm3 = vweird.f32 %v4294_v43  ;;  %vm2052_vm4 = vcmp.gt.f32.partialorder %v1988_v51, 0.5 }
 0x176   :  { %v1244_v5 = vsub.f32 0.0, %v1049_v34  ;;  %v1338_v14 = vmul.f32 %v2685_v41, %v1210_v10  ;;  %2688 = vrcp.f32 %v4402_v15  ;;  %v1083_v30 = vmul.f32 2.0, %v1049_v34 }
 0x177   :  { %v974_v4 = vmax.f32 %v3650_v13, %v710_v37  ;;  %vm852_vm5 = vcmp.eq.f32.partialorder %v5634_v62, 0.0  ;;  %vm4411_vm6 = vcmp.eq.f32.partialorder %v1562_v33, 8.507059e+37  ;;  %v2379_v58 = vmul.f32 %v2347_v32, %v2115_v2  ;;  %v2253_v33 = vpop.permute.xlu2 %2252 }
 0x178   :  { %vm2042_vm7 = vcmp.gt.f32.partialorder %v1978_v23, 0.5  ;;  %v1050_v6 = vmul.f32 %v3670_v18, %v4384_v12  ;;  %v4417_v17 = vpop.eup %2686  ;;  %v4421_v1 = vsel %vm4361_vm0, %v1550_v56, %v1546_v45  ;;  %v1557_v60 = vadd.f32 %v4332_v39, %v1556_v53 }
 0x179   :  { %vm1559_vm8 = vweird.f32 %v4332_v39  ;;  %v1565_v7 = vor.u32 1.1754944e-38, %v1564_v54  ;;  %vm2020_vm9 = vcmp.gt.f32.partialorder %v1988_v51, 1.5  ;;  %v2084_v11 = vsel %vm2052_vm4, 0.2, %v5587_v29 }
 0x17a   :  { %vm2010_vm10 = vcmp.gt.f32.partialorder %v1978_v23, 1.5  ;;  %v1295_v3 = vmul.f32 1.442695, %v1244_v5  ;;  %v1371_v24 = vsub.f32 %v3829_v57, %v1338_v14  ;;  %v2074_v41 = vsel %vm2042_vm7, 0.2, %v5587_v29  ;;  %vm4436_vm11 = vmor %vm1558_vm3, %vm1559_vm8 }
 0x17b   :  { %v1115_v50 = vadd.f32 2.0, %v1083_v30  ;;  %v4430_v56 = vmin.f32 %v3659_v46, %v974_v4  ;;  %v1907_v32 = vsub.f32 %v4421_v1, %v3898_v59  ;;  %v1659_v19 = vmul.f32 %v4417_v17, %v4356_v21 }
 0x17c   :  { %v4442_v22 = vmul.f32 322.0637, %v2379_v58  ;;  %v1245_v37 = vsub.f32 0.0, %v1050_v6  ;;  %v2689_v42 = vpop.eup %2688  ;;  %v1561_v53 = vsel %vm4436_vm11, %v4332_v39, %v1557_v60  ;;  %v2116_v2 = vsel %vm2020_vm9, 1.0, %v2084_v11 }
 0x17d   :  { %v2338_v10 = vmul.f32 %v3878_v8, %v2203_v47  ;;  %v1147_v43 = vmul.f32 %v1049_v34, %v1049_v34  ;;  %v2348_v45 = vmul.f32 %v4368_v9, %v2253_v33  ;;  %v1524_v5 = vmul.f32 %v2689_v42, %v4402_v15  ;;  %v5639_v47 = vld [vmem:[#allocation36_spill] sm:$0xff] }
 0x17e   :  { %v2106_v14 = vsel %vm2010_vm10, 1.0, %v2074_v41  ;;  %2690 = vpow2.f32 %v1295_v3  ;;  %v4453_v30 = vmul.f32 %v1371_v24, %v4283_v36  ;;  %v1084_v58 = vmul.f32 2.0, %v1050_v6 }
 0x17f   :  { %v1179_v4 = vadd.f32 %v1147_v43, %v1115_v50  ;;  %v1040_v39 = vmul.f32 %v3670_v18, %v4430_v56  ;;  %v1566_v51 = vsel %vm4411_vm6, %v1565_v7, %v1561_v53  ;;  %v1660_v8 = vsub.f32 1.0, %v1659_v19  ;;  %v5641_v19 = vld [vmem:[#allocation24_spill] sm:$0xff] }
 0x180   :  { %v1525_v34 = vsub.f32 1.0, %v1524_v5  ;;  %v1297_v1 = vmul.f32 1.442695, %v1245_v37  ;;  %v1534_v60 = vand.u32 2147483648, %v4402_v15  ;;  %v2370_v11 = vmul.f32 %v2338_v10, %v2106_v14 }
 0x181   :  { %v1074_v23 = vmul.f32 2.0, %v1040_v39  ;;  %v5640_v3 = vand.u32 2147483648, %v5634_v62  ;;  %vm1529_vm12 = vweird.f32 %v2689_v42  ;;  %v1532_v24 = vand.u32 2147483647, %v4402_v15 }
 0x182   :  { %v1526_v33 = vmul.f32 %v2689_v42, %v1525_v34  ;;  %v1235_v41 = vsub.f32 0.0, %v1040_v39  ;;  %2692 = vrcp.f32 %v4453_v30  ;;  %v1958_v40 = vunpack.c.3.s8 %v4310_v61 }
 0x183   :  { %v854_v36 = vsel %vm852_vm5, %v5640_v3, %v5639_v47  ;;  %v1212_v7 = vmul.f32 %v3777_v55, %v1179_v4  ;;  %v1116_v50 = vadd.f32 2.0, %v1084_v58  ;;  %vm864_vm13 = vcmp.eq.f32.partialorder %v5641_v19, 0.0 }
 0x184   :  { %v2691_v54 = vpop.eup %2690  ;;  %v1527_v37 = vadd.f32 %v2689_v42, %v1526_v33  ;;  %vm1528_vm14 = vweird.f32 %v4402_v15  ;;  %2694 = vpow2.f32 %v1297_v1  ;;  %v986_v62 = vmax.f32 %v3650_v13, %v854_v36 }
 0x185   :  { %vm1530_vm15 = vmor %vm1528_vm14, %vm1529_vm12  ;;  %v1535_v53 = vor.u32 1.1754944e-38, %v1534_v60  ;;  %v1148_v10 = vmul.f32 %v1050_v6, %v1050_v6  ;;  %v1106_v43 = vadd.f32 2.0, %v1074_v23  ;;  %v1277_v5 = vmul.f32 1.442695, %v1235_v41  ;;  %v5642_v41 = vld [vmem:[#allocation15_spill] sm:$0xff] }
 0x186   :  { %v1661_v14 = vmul.f32 %v4417_v17, %v1660_v8  ;;  %v1531_v34 = vsel %vm1530_vm15, %v2689_v42, %v1527_v37  ;;  %vm1533_vm0 = vcmp.eq.f32.partialorder %v1532_v24, 8.507059e+37  ;;  %v1138_v4 = vmul.f32 %v1040_v39, %v1040_v39 }
 0x187   :  { %v1536_v58 = vsel %vm1533_vm0, %v1535_v53, %v1531_v34  ;;  %v1340_v47 = vmul.f32 %v2691_v54, %v1212_v7  ;;  %v1180_v3 = vadd.f32 %v1148_v10, %v1116_v50  ;;  %2696 = vpow2.f32 %v1277_v5  ;;  %v5643_v10 = vld [vmem:[#allocation39_spill] sm:$0xff] }
 0x188   :  { %v1906_v33 = vsub.f32 %v1536_v58, %v3898_v59  ;;  %v2402_v15 = vmul.f32 322.0637, %v2370_v11  ;;  %v1170_v1 = vadd.f32 %v1138_v4, %v1106_v43  ;;  %v4475_v36 = vmin.f32 %v3659_v46, %v986_v62  ;;  %v4477_v60 = vpop.eup %2692 }
 0x189   :  { %v2435_v6 = vmul.f32 %v4312_v20, %v1907_v32  ;;  %v1908_v8 = vsub.f32 %v1566_v51, %v3898_v59  ;;  %vm1663_vm1 = vweird.f32 %v4356_v21  ;;  %v4482_v42 = vmul.f32 %v2348_v45, %v2116_v2 }
 0x18a   :  { %v2695_v39 = vpop.eup %2694  ;;  %vm1664_vm2 = vweird.f32 %v4417_v17  ;;  %v1667_v23 = vand.u32 2147483647, %v4356_v21  ;;  %v2434_v11 = vmul.f32 %v2402_v15, %v1906_v33  ;;  %v1990_v24 = vcvt.s32.f32 %v1958_v40 }
 0x18b   :  { %vm804_vm3 = vcmp.eq.f32.partialorder %v5642_v41, 0.0  ;;  %v1662_v7 = vadd.f32 %v4417_v17, %v1661_v14  ;;  %v1373_v50 = vsub.f32 %v3829_v57, %v1340_v47  ;;  %v1213_v20 = vmul.f32 %v3777_v55, %v1180_v3  ;;  %vm4508_vm4 = vmor %vm1663_vm1, %vm1664_vm2  ;;  %v2263_v47 = vpop.permute.xlu0 %2262 }
 0x18c   :  { %v1949_v32 = vunpack.c.2.s8 %v4183_v27  ;;  %v1674_v2 = vmul.f32 %v4477_v60, %v4453_v30  ;;  %v2466_v45 = vadd.f32 %v4372_v0, %v2434_v11  ;;  %v1203_v51 = vmul.f32 %v3777_v55, %v1170_v1 }
 0x18d   :  { %v1052_v40 = vmul.f32 %v3670_v18, %v4475_v36  ;;  %v2697_v54 = vpop.eup %2696  ;;  %v2436_v37 = vmul.f32 %v4336_v44, %v1908_v8  ;;  %v1669_v62 = vand.u32 2147483648, %v4356_v21  ;;  %v1341_v53 = vmul.f32 %v2695_v39, %v1213_v20 }
 0x18e   :  { %v5644_v43 = vand.u32 2147483648, %v5641_v19  ;;  %vm4512_vm5 = vcmp.eq.f32.partialorder %v1667_v23, 8.507059e+37  ;;  %v2467_v44 = vadd.f32 %v2466_v45, %v2435_v6  ;;  %vm2054_vm6 = vcmp.gt.f32.partialorder %v1990_v24, 0.5  ;;  %v5651_v45 = vld [vmem:[#allocation28_spill] sm:$0xff] }
 0x18f   :  { %v1331_v14 = vmul.f32 %v2697_v54, %v1203_v51  ;;  %vm946_vm7 = vcmp.eq.f32.partialorder %v3911_v28, inf  ;;  %v1666_v19 = vsel %vm4508_vm4, %v4417_v17, %v1662_v7  ;;  %v4521_v34 = vmul.f32 %v1373_v50, %v4352_v63  ;;  %v4534_v17 = vld [vmem:[%s5509_s5 + $0x28] sm:$0xff] }
 0x190   :  { %v866_v27 = vsel %vm864_vm13, %v5644_v43, %v5643_v10  ;;  %v1981_v21 = vcvt.s32.f32 %v1949_v32  ;;  %v1247_v4 = vsub.f32 0.0, %v1052_v40  ;;  %v1675_v58 = vsub.f32 1.0, %v1674_v2  ;;  %v5649_v32 = vld [vmem:[#allocation31_spill] sm:$0xff] }
 0x191   :  { %v1364_v3 = vsub.f32 %v3829_v57, %v1331_v14  ;;  %v4524_v33 = vadd.f32 %v2467_v44, %v2436_v37  ;;  %v987_v15 = vmax.f32 %v3650_v13, %v866_v27  ;;  %v1670_v1 = vor.u32 1.1754944e-38, %v1669_v62  ;;  %v2218_v62 = vpop.permute.xlu1 %2217 }
 0x192   :  { %v1682_v6 = vand.u32 2147483647, %v4453_v30  ;;  %v1374_v8 = vsub.f32 %v3829_v57, %v1341_v53  ;;  %v1086_v39 = vmul.f32 2.0, %v1052_v40  ;;  %vm2022_vm8 = vcmp.gt.f32.partialorder %v1990_v24, 1.5 }
 0x193   :  { %v2086_v63 = vsel %vm2054_vm6, 0.2, %v5587_v29  ;;  %v4537_v23 = vmul.f32 %v1364_v3, %v4430_v56  ;;  %v1301_v11 = vmul.f32 1.442695, %v1247_v4  ;;  %v1671_v7 = vsel %vm4512_vm5, %v1670_v1, %v1666_v19 }
 0x194   :  { %2698 = vrcp.f32 %v4521_v34  ;;  %v2350_v50 = vmul.f32 %v4368_v9, %v2263_v47  ;;  %vm2045_vm9 = vcmp.gt.f32.partialorder %v1981_v21, 0.5  ;;  %v1676_v24 = vmul.f32 %v4477_v60, %v1675_v58 }
 0x195   :  { %2700 = vrcp.f32 %v4537_v23  ;;  %v4546_v20 = vmin.f32 %v3659_v46, %v987_v15  ;;  %v5650_v56 = vand.u32 2147483648, %v5642_v41  ;;  %vm888_vm10 = vcmp.eq.f32.partialorder %v5651_v45, 0.0 }
 0x196   :  { %v2118_v51 = vsel %vm2022_vm8, 1.0, %v2086_v63  ;;  %v1959_v54 = vunpack.c.0.s8 %v4534_v17  ;;  %v4556_v37 = vmul.f32 %v1374_v8, %v4384_v12  ;;  %v1118_v53 = vadd.f32 2.0, %v1086_v39  ;;  %v4567_v12 = vld [vmem:[%s5508_s4] ss:$0 sm:$0xff] }
 0x197   :  { %v806_v2 = vsel %vm804_vm3, %v5650_v56, %v5649_v32  ;;  %v1684_v10 = vand.u32 2147483648, %v4453_v30  ;;  %vm2013_vm11 = vcmp.gt.f32.partialorder %v1981_v21, 1.5  ;;  %v2077_v43 = vsel %vm2045_vm9, 0.2, %v5587_v29 }
 0x198   :  { %2702 = vpow2.f32 %v1301_v11  ;;  %v1915_v27 = vsub.f32 %v1671_v7, %v3898_v59  ;;  %vm1679_vm12 = vweird.f32 %v4477_v60  ;;  %v1150_v41 = vmul.f32 %v1052_v40, %v1052_v40 }
 0x199   :  { %v982_v0 = vmax.f32 %v3650_v13, %v806_v2  ;;  %v1677_v5 = vadd.f32 %v4477_v60, %v1676_v24  ;;  %v2382_v44 = vmul.f32 %v2350_v50, %v2118_v51  ;;  %v2341_v14 = vmul.f32 %v4567_v12, %v2218_v62 }
 0x19a   :  { %v1053_v19 = vmul.f32 %v3670_v18, %v4546_v20  ;;  %v4572_v21 = vpop.eup %2698  ;;  %v4574_v4 = vcvt.s32.f32 %v1959_v54  ;;  %2704 = vrcp.f32 %v4556_v37  ;;  %v2109_v40 = vsel %vm2013_vm11, 1.0, %v2077_v43  ;;  %v5656_v54 = vld [vmem:[#allocation41_spill] sm:$0xff] }
 0x19b   :  { %v1182_v58 = vadd.f32 %v1150_v41, %v1118_v53  ;;  %v2701_v47 = vpop.eup %2700  ;;  %v4581_v3 = vsel %vm946_vm7, %v3911_v28, %v4289_v26  ;;  %vm1678_vm13 = vweird.f32 %v4453_v30  ;;  %vm4584_vm14 = vcmp.eq.f32.partialorder %v1682_v6, 8.507059e+37 }
 0x19c   :  { %v4589_v1 = vmul.f32 322.0637, %v4482_v42  ;;  %v4592_v8 = vmul.f32 %v4442_v22, %v1915_v27  ;;  %vm4596_vm15 = vmor %vm1678_vm13, %vm1679_vm12  ;;  %v1685_v26 = vor.u32 1.1754944e-38, %v1684_v10  ;;  %v1569_v63 = vmul.f32 %v2701_v47, %v4537_v23 }
 0x19d   :  { %v4602_v30 = vmin.f32 %v3659_v46, %v982_v0  ;;  %v1681_v42 = vsel %vm4596_vm15, %v4477_v60, %v1677_v5  ;;  %v4607_v11 = vmul.f32 322.0637, %v2382_v44  ;;  %v2373_v22 = vmul.f32 %v2341_v14, %v2109_v40  ;;  %v5658_v14 = vld [vmem:[#allocation26_spill] sm:$0xff] }
 0x19e   :  { %v2703_v6 = vpop.eup %2702  ;;  %v1248_v7 = vsub.f32 0.0, %v1053_v19  ;;  %v1704_v50 = vmul.f32 %v4572_v21, %v4521_v34  ;;  %vm2055_vm0 = vcmp.gt.f32.partialorder %v4574_v4, 0.5  ;;  %v1570_v24 = vsub.f32 1.0, %v1569_v63 }
 0x19f   :  { %v1215_v32 = vmul.f32 %v3777_v55, %v1182_v58  ;;  %v1577_v56 = vand.u32 2147483647, %v4537_v23  ;;  %v1579_v2 = vand.u32 2147483648, %v4537_v23  ;;  %v1087_v51 = vmul.f32 2.0, %v1053_v19 }
 0x1a0   :  { %v5657_v60 = vand.u32 2147483648, %v5651_v45  ;;  %v4620_v53 = vpop.eup %2704  ;;  %v1571_v10 = vmul.f32 %v2701_v47, %v1570_v24  ;;  %vm1574_vm1 = vweird.f32 %v2701_v47  ;;  %v1048_v27 = vmul.f32 %v3670_v18, %v4602_v30 }
 0x1a1   :  { %v1343_v43 = vmul.f32 %v2703_v6, %v1215_v32  ;;  %v1686_v41 = vsel %vm4584_vm14, %v1685_v26, %v1681_v42  ;;  %v2405_v0 = vmul.f32 322.0637, %v2373_v22  ;;  %v1961_v5 = vunpack.c.2.s8 %v4534_v17 }
 0x1a2   :  { %v890_v62 = vsel %vm888_vm10, %v5657_v60, %v5656_v54  ;;  %v1303_v44 = vmul.f32 1.442695, %v1248_v7  ;;  %vm900_vm2 = vcmp.eq.f32.partialorder %v5658_v14, 0.0  ;;  %v1705_v40 = vsub.f32 1.0, %v1704_v50 }
 0x1a3   :  { %v1572_v45 = vadd.f32 %v2701_v47, %v1571_v10  ;;  %vm1573_vm3 = vweird.f32 %v4537_v23  ;;  %v1082_v58 = vmul.f32 2.0, %v1048_v27  ;;  %v1719_v39 = vmul.f32 %v4620_v53, %v4556_v37 }
 0x1a4   :  { %vm1575_vm4 = vmor %vm1573_vm3, %vm1574_vm1  ;;  %v1580_v63 = vor.u32 1.1754944e-38, %v1579_v2  ;;  %v1243_v6 = vsub.f32 0.0, %v1048_v27  ;;  %v989_v15 = vmax.f32 %v3650_v13, %v890_v62  ;;  %vm1578_vm5 = vcmp.eq.f32.partialorder %v1577_v56, 8.507059e+37 }
 0x1a5   :  { %v1576_v26 = vsel %vm1575_vm4, %v2701_v47, %v1572_v45  ;;  %v1376_v42 = vsub.f32 %v3829_v57, %v1343_v43  ;;  %v1119_v22 = vadd.f32 2.0, %v1087_v51  ;;  %2706 = vpow2.f32 %v1303_v44  ;;  %v2268_v47 = vpop.permute.xlu2 %2267 }
 0x1a6   :  { %v1581_v7 = vsel %vm1578_vm5, %v1580_v63, %v1576_v26  ;;  %v1114_v50 = vadd.f32 2.0, %v1082_v58  ;;  %v1293_v24 = vmul.f32 1.442695, %v1243_v6  ;;  %vm2023_vm6 = vcmp.gt.f32.partialorder %v4574_v4, 1.5  ;;  %v5660_v6 = vld [vmem:[#allocation40_spill] sm:$0xff] }
 0x1a7   :  { %v2087_v23 = vsel %vm2055_vm0, 0.2, %v5587_v29  ;;  %v1909_v32 = vsub.f32 %v1581_v7, %v3898_v59  ;;  %v1151_v2 = vmul.f32 %v1053_v19, %v1053_v19  ;;  %v1916_v54 = vsub.f32 %v1686_v41, %v3898_v59  ;;  %v5659_v41 = vld [vmem:[#allocation21_spill] sm:$0xff] }
 0x1a8   :  { %v1146_v56 = vmul.f32 %v1048_v27, %v1048_v27  ;;  %2708 = vpow2.f32 %v1293_v24  ;;  %v4640_v51 = vmin.f32 %v3659_v46, %v989_v15  ;;  %v1993_v62 = vcvt.s32.f32 %v1961_v5 }
 0x1a9   :  { %v2437_v60 = vmul.f32 %v2405_v0, %v1909_v32  ;;  %v4643_v10 = vmul.f32 %v1376_v42, %v4475_v36  ;;  %v1183_v43 = vadd.f32 %v1151_v2, %v1119_v22  ;;  %v1706_v44 = vmul.f32 %v4572_v21, %v1705_v40 }
 0x1aa   :  { %v1720_v45 = vsub.f32 1.0, %v1719_v39  ;;  %v1178_v58 = vadd.f32 %v1146_v56, %v1114_v50  ;;  %v1055_v19 = vmul.f32 %v3670_v18, %v4640_v51  ;;  %vm840_vm7 = vcmp.eq.f32.partialorder %v5659_v41, 0.0 }
 0x1ab   :  { %v2444_v27 = vmul.f32 %v4589_v1, %v1916_v54  ;;  %v2119_v63 = vsel %vm2023_vm6, 1.0, %v2087_v23  ;;  %v2351_v0 = vmul.f32 %v4368_v9, %v2268_v47  ;;  %v4654_v36 = vadd.f32 %v4524_v33, %v2437_v60  ;;  %v2707_v5 = vpop.eup %2706 }
 0x1ac   :  { %vm1708_vm8 = vweird.f32 %v4521_v34  ;;  %v1712_v40 = vand.u32 2147483647, %v4521_v34  ;;  %v1250_v39 = vsub.f32 0.0, %v1055_v19  ;;  %v5661_v15 = vand.u32 2147483648, %v5658_v14 }
 0x1ad   :  { %vm1709_vm9 = vweird.f32 %v4572_v21  ;;  %v1714_v4 = vand.u32 2147483648, %v4521_v34  ;;  %2710 = vrcp.f32 %v4643_v10  ;;  %v1216_v33 = vmul.f32 %v3777_v55, %v1183_v43 }
 0x1ae   :  { %v902_v1 = vsel %vm900_vm2, %v5661_v15, %v5660_v6  ;;  %v2709_v26 = vpop.eup %2708  ;;  %v1707_v42 = vadd.f32 %v4572_v21, %v1706_v44  ;;  %v1721_v22 = vmul.f32 %v4620_v53, %v1720_v45  ;;  %vm2057_vm10 = vcmp.gt.f32.partialorder %v1993_v62, 0.5  ;;  %vm4681_vm12 = vmor %vm1708_vm8, %vm1709_vm9  ;;  %v2278_v45 = vpop.permute.xlu0 %2277 }
 0x1af   :  { %v1211_v7 = vmul.f32 %v3777_v55, %v1178_v58  ;;  %v1962_v50 = vunpack.c.3.s8 %v4534_v17  ;;  %v1344_v14 = vmul.f32 %v2707_v5, %v1216_v33  ;;  %v1089_v24 = vmul.f32 2.0, %v1055_v19 }
 0x1b0   :  { %v990_v23 = vmax.f32 %v3650_v13, %v902_v1  ;;  %vm4672_vm11 = vcmp.eq.f32.partialorder %v1712_v40, 8.507059e+37  ;;  %v1729_v2 = vand.u32 2147483648, %v4556_v37  ;;  %v1307_v47 = vmul.f32 1.442695, %v1250_v39 }
 0x1b1   :  { %v1339_v54 = vmul.f32 %v2709_v26, %v1211_v7  ;;  %v1715_v60 = vor.u32 1.1754944e-38, %v1714_v4  ;;  %vm1723_vm13 = vweird.f32 %v4556_v37  ;;  %vm1724_vm14 = vweird.f32 %v4620_v53 }
 0x1b2   :  { %vm2025_vm15 = vcmp.gt.f32.partialorder %v1993_v62, 1.5  ;;  %v1711_v43 = vsel %vm4681_vm12, %v4572_v21, %v1707_v42  ;;  %v1722_v44 = vadd.f32 %v4620_v53, %v1721_v22  ;;  %v2089_v34 = vsel %vm2057_vm10, 0.2, %v5587_v29  ;;  %vm4709_vm1 = vmor %vm1723_vm13, %vm1724_vm14 }
 0x1b3   :  { %v1957_v58 = vunpack.c.2.s8 %v4310_v61  ;;  %v4694_v5 = vpop.eup %2710  ;;  %v1994_v40 = vcvt.s32.f32 %v1962_v50  ;;  %v1377_v39 = vsub.f32 %v3829_v57, %v1344_v14  ;;  %v1121_v6 = vadd.f32 2.0, %v1089_v24  ;;  %v5668_v24 = vld [vmem:[#allocation37_spill] sm:$0xff] }
 0x1b4   :  { %v4698_v15 = vmin.f32 %v3659_v46, %v990_v23  ;;  %vm912_vm0 = vcmp.eq.f32.partialorder %v3743_v38, 0.0  ;;  %v1727_v21 = vand.u32 2147483647, %v4556_v37  ;;  %v1730_v1 = vor.u32 1.1754944e-38, %v1729_v2 }
 0x1b5   :  { %v1372_v4 = vsub.f32 %v3829_v57, %v1339_v54  ;;  %2712 = vpow2.f32 %v1307_v47  ;;  %v1716_v61 = vsel %vm4672_vm11, %v1715_v60, %v1711_v43  ;;  %v2121_v26 = vsel %vm2025_vm15, 1.0, %v2089_v34  ;;  %v2283_v60 = vpop.permute.xlu2 %2282 }
 0x1b6   :  { %v2353_v42 = vmul.f32 %v4368_v9, %v2278_v45  ;;  %v1153_v22 = vmul.f32 %v1055_v19, %v1055_v19  ;;  %v1726_v7 = vsel %vm4709_vm1, %v4620_v53, %v1722_v44  ;;  %v1749_v50 = vmul.f32 %v4694_v5, %v4643_v10 }
 0x1b7   :  { %v1989_v14 = vcvt.s32.f32 %v1957_v58  ;;  %v5669_v37 = vand.u32 2147483648, %v5659_v41  ;;  %vm2058_vm2 = vcmp.gt.f32.partialorder %v1994_v40, 0.5  ;;  %v4726_v62 = vmul.f32 %v1377_v39, %v4546_v20  ;;  %v4753_v58 = vld [vmem:[%s5509_s5 + $0x30] sm:$0xff] }
 0x1b8   :  { %v1185_v32 = vadd.f32 %v1153_v22, %v1121_v6  ;;  %v1056_v19 = vmul.f32 %v3670_v18, %v4698_v15  ;;  %v4731_v53 = vadd.f32 %v2444_v27, %v4592_v8  ;;  %vm1728_vm3 = vcmp.eq.f32.partialorder %v1727_v21, 8.507059e+37 }
 0x1b9   :  { %v842_v23 = vsel %vm840_vm7, %v5669_v37, %v5668_v24  ;;  %v2383_v2 = vmul.f32 %v2351_v0, %v2119_v63  ;;  %v4734_v54 = vmul.f32 %v1372_v4, %v4602_v30  ;;  %v1918_v47 = vsub.f32 %v1716_v61, %v3898_v59  ;;  %v2258_v4 = vpop.permute.xlu1 %2257 }
 0x1ba   :  { %v1731_v41 = vsel %vm1728_vm3, %v1730_v1, %v1726_v7  ;;  %v2385_v56 = vmul.f32 %v2353_v42, %v2121_v26  ;;  %v985_v20 = vmax.f32 %v3650_v13, %v842_v23  ;;  %v1750_v44 = vsub.f32 1.0, %v1749_v50 }
 0x1bb   :  { %v2713_v43 = vpop.eup %2712  ;;  %vm2026_vm4 = vcmp.gt.f32.partialorder %v1994_v40, 1.5  ;;  %v2090_v45 = vsel %vm2058_vm2, 0.2, %v5587_v29  ;;  %vm2053_vm5 = vcmp.gt.f32.partialorder %v1989_v14, 0.5  ;;  %2714 = vrcp.f32 %v4726_v62 }
 0x1bc   :  { %v1218_v8 = vmul.f32 %v3777_v55, %v1185_v32  ;;  %v1251_v30 = vsub.f32 0.0, %v1056_v19  ;;  %v4743_v27 = vmin.f32 %v3659_v46, %v985_v20  ;;  %v4746_v63 = vmul.f32 %v4607_v11, %v1918_v47 }
 0x1bd   :  { %v2415_v0 = vmul.f32 322.0637, %v2383_v2  ;;  %v2354_v34 = vmul.f32 %v4368_v9, %v2283_v60  ;;  %2716 = vrcp.f32 %v4734_v54  ;;  %v4755_v40 = vmul.f32 322.0637, %v2385_v56 }
 0x1be   :  { %v2122_v39 = vsel %vm2026_vm4, 1.0, %v2090_v45  ;;  %v1346_v6 = vmul.f32 %v2713_v43, %v1218_v8  ;;  %v5670_v21 = vand.u32 2147483648, %v3743_v38  ;;  %v1919_v1 = vsub.f32 %v1731_v41, %v3898_v59  ;;  %v5671_v41 = vld [vmem:[#allocation12_spill] sm:$0xff] }
 0x1bf   :  { %vm2021_vm6 = vcmp.gt.f32.partialorder %v1989_v14, 1.5  ;;  %v2085_v61 = vsel %vm2053_vm5, 0.2, %v5587_v29  ;;  %v1090_v33 = vmul.f32 2.0, %v1056_v19  ;;  %v1751_v26 = vmul.f32 %v4694_v5, %v1750_v44 }
 0x1c0   :  { %v914_v11 = vsel %vm912_vm0, %v5670_v21, %v4212_v16  ;;  %v1964_v42 = vunpack.c.1.s8 %v4753_v58  ;;  %v1309_v22 = vmul.f32 1.442695, %v1251_v30  ;;  %v1051_v7 = vmul.f32 %v3670_v18, %v4743_v27 }
 0x1c1   :  { %vm1753_vm7 = vweird.f32 %v4643_v10  ;;  %v1757_v38 = vand.u32 2147483647, %v4643_v10  ;;  %v2386_v16 = vmul.f32 %v2354_v34, %v2122_v39  ;;  %v991_v50 = vmax.f32 %v3650_v13, %v914_v11  ;;  %v4772_v24 = vpop.eup %2714 }
 0x1c2   :  { %v2349_v37 = vmul.f32 %v4368_v9, %v2258_v4  ;;  %v1379_v23 = vsub.f32 %v3829_v57, %v1346_v6  ;;  %v1085_v32 = vmul.f32 2.0, %v1051_v7  ;;  %v1246_v2 = vsub.f32 0.0, %v1051_v7 }
 0x1c3   :  { %v4776_v47 = vpop.eup %2716  ;;  %vm732_vm8 = vcmp.eq.f32.partialorder %v5671_v41, 0.0  ;;  %vm1754_vm9 = vweird.f32 %v4694_v5  ;;  %v1759_v56 = vand.u32 2147483648, %v4643_v10  ;;  %v2117_v60 = vsel %vm2021_vm6, 1.0, %v2085_v61 }
 0x1c4   :  { %v1122_v20 = vadd.f32 2.0, %v1090_v33  ;;  %v1752_v43 = vadd.f32 %v4694_v5, %v1751_v26  ;;  %v1996_v44 = vcvt.s32.f32 %v1964_v42  ;;  %2718 = vpow2.f32 %v1309_v22  ;;  %vm4799_vm10 = vmor %vm1753_vm7, %vm1754_vm9 }
 0x1c5   :  { %v1117_v45 = vadd.f32 2.0, %v1085_v32  ;;  %v1764_v8 = vmul.f32 %v4772_v24, %v4726_v62  ;;  %v1154_v30 = vmul.f32 %v1056_v19, %v1056_v19  ;;  %v1299_v34 = vmul.f32 1.442695, %v1246_v2 }
 0x1c6   :  { %v4786_v39 = vmin.f32 %v3659_v46, %v991_v50  ;;  %v1689_v6 = vmul.f32 %v4776_v47, %v4734_v54  ;;  %v2381_v21 = vmul.f32 %v2349_v37, %v2117_v60  ;;  %v4791_v14 = vmul.f32 %v1379_v23, %v4640_v51  ;;  %v5674_v60 = vld [vmem:[#allocation27_spill] sm:$0xff] }
 0x1c7   :  { %v1149_v11 = vmul.f32 %v1051_v7, %v1051_v7  ;;  %v4793_v4 = vmul.f32 %v2415_v0, %v1919_v1  ;;  %v4803_v61 = vmul.f32 322.0637, %v2386_v16  ;;  %v1186_v33 = vadd.f32 %v1154_v30, %v1122_v20  ;;  %v2293_v0 = vpop.permute.xlu0 %2292 }
 0x1c8   :  { %2720 = vpow2.f32 %v1299_v34  ;;  %v1756_v51 = vsel %vm4799_vm10, %v4694_v5, %v1752_v43  ;;  %vm1758_vm11 = vcmp.eq.f32.partialorder %v1757_v38, 8.507059e+37  ;;  %v1760_v26 = vor.u32 1.1754944e-38, %v1759_v56 }
 0x1c9   :  { %v1181_v1 = vadd.f32 %v1149_v11, %v1117_v45  ;;  %v1765_v42 = vsub.f32 1.0, %v1764_v8  ;;  %vm2060_vm12 = vcmp.gt.f32.partialorder %v1996_v44, 0.5  ;;  %v1965_v10 = vunpack.c.2.s8 %v4753_v58  ;;  %v5676_v8 = vld [vmem:[#allocation32_spill] sm:$0xff] }
 0x1ca   :  { %v1057_v22 = vmul.f32 %v3670_v18, %v4786_v39  ;;  %v2719_v7 = vpop.eup %2718  ;;  %v1774_v16 = vand.u32 2147483648, %v4726_v62  ;;  %v1690_v50 = vsub.f32 1.0, %v1689_v6  ;;  %v4812_v37 = vmul.f32 322.0637, %v2381_v21 }
 0x1cb   :  { %2722 = vrcp.f32 %v4791_v14  ;;  %v1761_v5 = vsel %vm1758_vm11, %v1760_v26, %v1756_v51  ;;  %vm1768_vm13 = vweird.f32 %v4726_v62  ;;  %v1772_v38 = vand.u32 2147483647, %v4726_v62 }
 0x1cc   :  { %v2356_v23 = vmul.f32 %v4368_v9, %v2293_v0  ;;  %v1219_v32 = vmul.f32 %v3777_v55, %v1186_v33  ;;  %vm2028_vm14 = vcmp.gt.f32.partialorder %v1996_v44, 1.5  ;;  %v2092_v2 = vsel %vm2060_vm12, 0.2, %v5587_v29 }
 0x1cd   :  { %v1214_v56 = vmul.f32 %v3777_v55, %v1181_v1  ;;  %v5675_v20 = vand.u32 2147483648, %v5671_v41  ;;  %vm876_vm15 = vcmp.eq.f32.partialorder %v5676_v8, 0.0  ;;  %v1766_v30 = vmul.f32 %v4772_v24, %v1765_v42 }
 0x1ce   :  { %v2721_v45 = vpop.eup %2720  ;;  %v1997_v34 = vcvt.s32.f32 %v1965_v10  ;;  %v1347_v6 = vmul.f32 %v2719_v7, %v1219_v32  ;;  %v1091_v21 = vmul.f32 2.0, %v1057_v22  ;;  %v1775_v11 = vor.u32 1.1754944e-38, %v1774_v16  ;;  %v5679_v10 = vld [vmem:[#allocation18_spill] sm:$0xff] }
 0x1cf   :  { %v734_v43 = vsel %vm732_vm8, %v5675_v20, %v5674_v60  ;;  %v1691_v19 = vmul.f32 %v4776_v47, %v1690_v50  ;;  %v1342_v33 = vmul.f32 %v2721_v45, %v1214_v56  ;;  %v1252_v51 = vsub.f32 0.0, %v1057_v22 }
 0x1d0   :  { %v1921_v26 = vsub.f32 %v1761_v5, %v3898_v59  ;;  %vm1769_vm0 = vweird.f32 %v4772_v24  ;;  %vm4831_vm1 = vcmp.eq.f32.partialorder %v1772_v38, 8.507059e+37  ;;  %v2124_v0 = vsel %vm2028_vm14, 1.0, %v2092_v2 }
 0x1d1   :  { %v976_v1 = vmax.f32 %v3650_v13, %v734_v43  ;;  %v4837_v42 = vpop.eup %2722  ;;  %vm744_vm2 = vcmp.eq.f32.partialorder %v5679_v10, 0.0  ;;  %v1697_v7 = vand.u32 2147483647, %v4734_v54  ;;  %v1699_v16 = vand.u32 2147483648, %v4734_v54  ;;  %vm4863_vm5 = vmor %vm1768_vm13, %vm1769_vm0 }
 0x1d2   :  { %v1375_v50 = vsub.f32 %v3829_v57, %v1342_v33  ;;  %v1311_v5 = vmul.f32 1.442695, %v1252_v51  ;;  %v1767_v38 = vadd.f32 %v4772_v24, %v1766_v30  ;;  %vm2061_vm3 = vcmp.gt.f32.partialorder %v1997_v34, 0.5 }
 0x1d3   :  { %v1380_v32 = vsub.f32 %v3829_v57, %v1347_v6  ;;  %v1123_v44 = vadd.f32 2.0, %v1091_v21  ;;  %v1692_v2 = vadd.f32 %v4776_v47, %v1691_v19  ;;  %vm1694_vm4 = vweird.f32 %v4776_v47 }
 0x1d4   :  { %v1960_v56 = vunpack.c.1.s8 %v4534_v17  ;;  %2724 = vpow2.f32 %v1311_v5  ;;  %v1794_v60 = vmul.f32 %v4837_v42, %v4791_v14  ;;  %v4851_v20 = vmul.f32 %v1375_v50, %v4743_v27 }
 0x1d5   :  { %v1155_v43 = vmul.f32 %v1057_v22, %v1057_v22  ;;  %v4854_v45 = vmin.f32 %v3659_v46, %v976_v1  ;;  %v4857_v30 = vmul.f32 %v4755_v40, %v1921_v26  ;;  %vm1693_vm6 = vweird.f32 %v4734_v54  ;;  %v2298_v22 = vpop.permute.xlu2 %2297 }
 0x1d6   :  { %v2388_v6 = vmul.f32 %v2356_v23, %v2124_v0  ;;  %vm2029_vm7 = vcmp.gt.f32.partialorder %v1997_v34, 1.5  ;;  %v1771_v27 = vsel %vm4863_vm5, %v4772_v24, %v1767_v38  ;;  %v4872_v40 = vmul.f32 %v1380_v32, %v4698_v15  ;;  %vm4878_vm8 = vmor %vm1693_vm6, %vm1694_vm4  ;;  %v5686_v15 = vld [vmem:[#allocation42_spill] sm:$0xff] }
 0x1d7   :  { %v1187_v21 = vadd.f32 %v1155_v43, %v1123_v44  ;;  %v1042_v62 = vmul.f32 %v3670_v18, %v4854_v45  ;;  %vm4882_vm9 = vcmp.eq.f32.partialorder %v1697_v7, 8.507059e+37  ;;  %v1700_v23 = vor.u32 1.1754944e-38, %v1699_v16 }
 0x1d8   :  { %v2093_v24 = vsel %vm2061_vm3, 0.2, %v5587_v29  ;;  %v5687_v33 = vand.u32 2147483648, %v5676_v8  ;;  %v1696_v26 = vsel %vm4878_vm8, %v4776_v47, %v1692_v2  ;;  %v1795_v0 = vsub.f32 1.0, %v1794_v60  ;;  %v5688_v47 = vld [vmem:[#allocation33_spill] sm:$0xff] }
 0x1d9   :  { %v1992_v1 = vcvt.s32.f32 %v1960_v56  ;;  %2726 = vrcp.f32 %v4851_v20  ;;  %v1776_v16 = vsel %vm4831_vm1, %v1775_v11, %v1771_v27  ;;  %v4899_v50 = vmul.f32 322.0637, %v2388_v6 }
 0x1da   :  { %v878_v51 = vsel %vm876_vm15, %v5687_v33, %v5686_v15  ;;  %v2725_v7 = vpop.eup %2724  ;;  %v2357_v5 = vmul.f32 %v4368_v9, %v2298_v22  ;;  %v1237_v38 = vsub.f32 0.0, %v1042_v62  ;;  %2728 = vrcp.f32 %v4872_v40  ;;  %v2273_v15 = vpop.permute.xlu1 %2272 }
 0x1db   :  { %v1220_v8 = vmul.f32 %v3777_v55, %v1187_v21  ;;  %v988_v32 = vmax.f32 %v3650_v13, %v878_v51  ;;  %v5689_v44 = vand.u32 2147483648, %v5679_v10  ;;  %v1701_v11 = vsel %vm4882_vm9, %v1700_v23, %v1696_v26 }
 0x1dc   :  { %vm1798_vm10 = vweird.f32 %v4791_v14  ;;  %v1802_v41 = vand.u32 2147483647, %v4791_v14  ;;  %v2125_v56 = vsel %vm2029_vm7, 1.0, %v2093_v24  ;;  %v1796_v60 = vmul.f32 %v4837_v42, %v1795_v0 }
 0x1dd   :  { %v746_v2 = vsel %vm744_vm2, %v5689_v44, %v5688_v47  ;;  %vm2056_vm11 = vcmp.gt.f32.partialorder %v1992_v1, 0.5  ;;  %v1348_v43 = vmul.f32 %v2725_v7, %v1220_v8  ;;  %v1076_v17 = vmul.f32 2.0, %v1042_v62 }
 0x1de   :  { %v1922_v6 = vsub.f32 %v1776_v16, %v3898_v59  ;;  %v1966_v27 = vunpack.c.3.s8 %v4753_v58  ;;  %v1281_v10 = vmul.f32 1.442695, %v1237_v38  ;;  %v977_v22 = vmax.f32 %v3650_v13, %v746_v2  ;;  %v5692_v2 = vld [vmem:[#allocation35_spill] sm:$0xff] }
 0x1df   :  { %v4919_v21 = vpop.eup %2726  ;;  %v1917_v19 = vsub.f32 %v1701_v11, %v3898_v59  ;;  %v1804_v54 = vand.u32 2147483648, %v4791_v14  ;;  %v2389_v34 = vmul.f32 %v2357_v5, %v2125_v56  ;;  %v4924_v23 = vmin.f32 %v3659_v46, %v988_v32  ;;  %v4973_v14 = vld [vmem:[%s5509_s5 + $0x18] sm:$0xff] }
 0x1e0   :  { %vm1799_vm12 = vweird.f32 %v4837_v42  ;;  %vm4927_vm13 = vcmp.eq.f32.partialorder %v1802_v41, 8.507059e+37  ;;  %vm2024_vm14 = vcmp.gt.f32.partialorder %v1992_v1, 1.5  ;;  %v2088_v33 = vsel %vm2056_vm11, 0.2, %v5587_v29  ;;  %v4933_v51 = vpop.eup %2728 }
 0x1e1   :  { %v2445_v26 = vmul.f32 %v4812_v37, %v1917_v19  ;;  %v1797_v0 = vadd.f32 %v4837_v42, %v1796_v60  ;;  %v1381_v7 = vsub.f32 %v3829_v57, %v1348_v43  ;;  %v1108_v16 = vadd.f32 2.0, %v1076_v17  ;;  %vm4955_vm0 = vmor %vm1798_vm10, %vm1799_vm12 }
 0x1e2   :  { %v1734_v5 = vmul.f32 %v4919_v21, %v4851_v20  ;;  %v1998_v38 = vcvt.s32.f32 %v1966_v27  ;;  %2730 = vpow2.f32 %v1281_v10  ;;  %v4941_v8 = vmin.f32 %v3659_v46, %v977_v22 }
 0x1e3   :  { %v1819_v32 = vand.u32 2147483648, %v4872_v40  ;;  %v2352_v47 = vmul.f32 %v4368_v9, %v2273_v15  ;;  %v1140_v44 = vmul.f32 %v1042_v62, %v1042_v62  ;;  %v1054_v37 = vmul.f32 %v3670_v18, %v4924_v23 }
 0x1e4   :  { %vm936_vm15 = vcmp.eq.f32.partialorder %v5692_v2, 0.0  ;;  %v4949_v11 = vmul.f32 %v4803_v61, %v1922_v6  ;;  %v1805_v56 = vor.u32 1.1754944e-38, %v1804_v54  ;;  %v1809_v9 = vmul.f32 %v4933_v51, %v4872_v40 }
 0x1e5   :  { %v2120_v62 = vsel %vm2024_vm14, 1.0, %v2088_v33  ;;  %v1801_v60 = vsel %vm4955_vm0, %v4837_v42, %v1797_v0  ;;  %v4965_v61 = vmul.f32 322.0637, %v2389_v34  ;;  %v4968_v43 = vmul.f32 %v1381_v7, %v4786_v39 }
 0x1e6   :  { %v1172_v17 = vadd.f32 %v1140_v44, %v1108_v16  ;;  %v2482_v6 = vadd.f32 %v4731_v53, %v2445_v26  ;;  %v1735_v27 = vsub.f32 1.0, %v1734_v5  ;;  %vm2062_vm1 = vcmp.gt.f32.partialorder %v1998_v38, 0.5 }
 0x1e7   :  { %v1043_v1 = vmul.f32 %v3670_v18, %v4941_v8  ;;  %v1817_v42 = vand.u32 2147483647, %v4872_v40  ;;  %v4979_v10 = vor.u32 1.1754944e-38, %v1819_v32  ;;  %v2384_v22 = vmul.f32 %v2352_v47, %v2120_v62 }
 0x1e8   :  { %v1249_v39 = vsub.f32 0.0, %v1054_v37  ;;  %v2731_v19 = vpop.eup %2730  ;;  %v4983_v54 = vsel %vm4927_vm13, %v1805_v56, %v1801_v60  ;;  %v1810_v34 = vsub.f32 1.0, %v1809_v9  ;;  %vm2030_vm2 = vcmp.gt.f32.partialorder %v1998_v38, 1.5 }
 0x1e9   :  { %v1951_v53 = vunpack.c.0.s8 %v4973_v14  ;;  %2732 = vrcp.f32 %v4968_v43  ;;  %v2094_v15 = vsel %vm2062_vm1, 0.2, %v5587_v29  ;;  %v1205_v33 = vmul.f32 %v3777_v55, %v1172_v17  ;;  %v5695_v17 = vld [vmem:[#allocation45_spill] sm:$0xff] }
 0x1ea   :  { %v1963_v26 = vunpack.c.0.s8 %v4753_v58  ;;  %v2483_v0 = vadd.f32 %v2482_v6, %v4746_v63  ;;  %vm1813_vm3 = vweird.f32 %v4872_v40  ;;  %v1736_v24 = vmul.f32 %v4919_v21, %v1735_v27  ;;  %v2303_v58 = vpop.permute.xlu0 %2302  ;;  %v2288_v40 = vpop.permute.xlu1 %2287 }
 0x1eb   :  { %v1088_v7 = vmul.f32 2.0, %v1054_v37  ;;  %v1238_v16 = vsub.f32 0.0, %v1043_v1  ;;  %v1924_v5 = vsub.f32 %v4983_v54, %v3898_v59  ;;  %v4995_v32 = vmul.f32 322.0637, %v2384_v22  ;;  %v5697_v22 = vld [vmem:[#allocation11_spill] sm:$0xff] }
 0x1ec   :  { %v1333_v47 = vmul.f32 %v2731_v19, %v1205_v33  ;;  %v1305_v44 = vmul.f32 1.442695, %v1249_v39  ;;  %v1811_v41 = vmul.f32 %v4933_v51, %v1810_v34  ;;  %vm1814_vm4 = vweird.f32 %v4933_v51 }
 0x1ed   :  { %v2126_v63 = vsel %vm2030_vm2, 1.0, %v2094_v15  ;;  %v1983_v56 = vcvt.s32.f32 %v1951_v53  ;;  %v1744_v9 = vand.u32 2147483648, %v4851_v20  ;;  %v1995_v62 = vcvt.s32.f32 %v1963_v26  ;;  %vm5039_vm12 = vmor %vm1813_vm3, %vm1814_vm4 }
 0x1ee   :  { %v1077_v60 = vmul.f32 2.0, %v1043_v1  ;;  %v5696_v6 = vand.u32 2147483648, %v5692_v2  ;;  %vm720_vm5 = vcmp.eq.f32.partialorder %v5697_v22, 0.0  ;;  %vm5007_vm6 = vcmp.eq.f32.partialorder %v1817_v42, 8.507059e+37  ;;  %v5019_v2 = vld [vmem:[%s5508_s4 + $0x1] ss:$0 sm:$0xff] }
 0x1ef   :  { %v1737_v38 = vadd.f32 %v4919_v21, %v1736_v24  ;;  %vm1739_vm7 = vweird.f32 %v4919_v21  ;;  %v1120_v19 = vadd.f32 2.0, %v1088_v7  ;;  %v1283_v34 = vmul.f32 1.442695, %v1238_v16  ;;  %v5013_v53 = vpop.eup %2732 }
 0x1f0   :  { %v938_v27 = vsel %vm936_vm15, %v5696_v6, %v5695_v17  ;;  %vm1738_vm8 = vweird.f32 %v4851_v20  ;;  %v2358_v42 = vmul.f32 %v5019_v2, %v2303_v58  ;;  %v1366_v15 = vsub.f32 %v3829_v57, %v1333_v47  ;;  %v2228_v17 = vpop.permute.xlu2 %2227 }
 0x1f1   :  { %2734 = vpow2.f32 %v1305_v44  ;;  %v1812_v33 = vadd.f32 %v4933_v51, %v1811_v41  ;;  %v1742_v26 = vand.u32 2147483647, %v4851_v20  ;;  %vm2047_vm9 = vcmp.gt.f32.partialorder %v1983_v56, 0.5  ;;  %vm5025_vm10 = vmor %vm1738_vm8, %vm1739_vm7 }
 0x1f2   :  { %v1152_v24 = vmul.f32 %v1054_v37, %v1054_v37  ;;  %v1745_v16 = vor.u32 1.1754944e-38, %v1744_v9  ;;  %vm2059_vm11 = vcmp.gt.f32.partialorder %v1995_v62, 0.5  ;;  %v1109_v6 = vadd.f32 2.0, %v1077_v60 }
 0x1f3   :  { %v993_v35 = vmax.f32 %v3650_v13, %v938_v27  ;;  %v1741_v47 = vsel %vm5025_vm10, %v4919_v21, %v1737_v38  ;;  %v1824_v44 = vmul.f32 %v5013_v53, %v4968_v43  ;;  %2736 = vpow2.f32 %v1283_v34 }
 0x1f4   :  { %v1184_v20 = vadd.f32 %v1152_v24, %v1120_v19  ;;  %vm2015_vm13 = vcmp.gt.f32.partialorder %v1983_v56, 1.5  ;;  %v5044_v41 = vmul.f32 %v1366_v15, %v4854_v45  ;;  %v2079_v58 = vsel %vm2047_vm9, 0.2, %v5587_v29 }
 0x1f5   :  { %v1141_v21 = vmul.f32 %v1043_v1, %v1043_v1  ;;  %v1816_v9 = vsel %vm5039_vm12, %v4933_v51, %v1812_v33  ;;  %vm1743_vm14 = vcmp.eq.f32.partialorder %v1742_v26, 8.507059e+37  ;;  %v2343_v60 = vmul.f32 %v4567_v12, %v2228_v17  ;;  %v5704_v33 = vld [vmem:[#allocation34_spill] sm:$0xff] }
 0x1f6   :  { %vm2027_vm15 = vcmp.gt.f32.partialorder %v1995_v62, 1.5  ;;  %v1746_v38 = vsel %vm1743_vm14, %v1745_v16, %v1741_v47  ;;  %v2091_v19 = vsel %vm2059_vm11, 0.2, %v5587_v29  ;;  %v5054_v45 = vmin.f32 %v3659_v46, %v993_v35  ;;  %v5705_v16 = vld [vmem:[#allocation22_spill] sm:$0xff] }
 0x1f7   :  { %v2735_v27 = vpop.eup %2734  ;;  %v1173_v34 = vadd.f32 %v1141_v21, %v1109_v6  ;;  %v2484_v1 = vadd.f32 %v2483_v0, %v4793_v4  ;;  %v1825_v15 = vsub.f32 1.0, %v1824_v44  ;;  %v2111_v24 = vsel %vm2015_vm13, 1.0, %v2079_v58 }
 0x1f8   :  { %v1217_v51 = vmul.f32 %v3777_v55, %v1184_v20  ;;  %vm768_vm0 = vcmp.eq.f32.partialorder %v5704_v33, 0.0  ;;  %v1821_v26 = vsel %vm5007_vm6, %v4979_v10, %v1816_v9  ;;  %2738 = vrcp.f32 %v5044_v41 }
 0x1f9   :  { %v2355_v7 = vmul.f32 %v5019_v2, %v2288_v40  ;;  %v5706_v35 = vand.u32 2147483648, %v5697_v22  ;;  %v2737_v0 = vpop.eup %2736  ;;  %v1920_v56 = vsub.f32 %v1746_v38, %v3898_v59  ;;  %v2390_v17 = vmul.f32 %v2358_v42, %v2126_v63 }
 0x1fa   :  { %v1345_v6 = vmul.f32 %v2735_v27, %v1217_v51  ;;  %v2123_v47 = vsel %vm2027_vm15, 1.0, %v2091_v19  ;;  %v1832_v39 = vand.u32 2147483647, %v4968_v43  ;;  %v2375_v10 = vmul.f32 %v2343_v60, %v2111_v24 }
 0x1fb   :  { %v722_v4 = vsel %vm720_vm5, %v5706_v35, %v5705_v16  ;;  %v1206_v44 = vmul.f32 %v3777_v55, %v1173_v34  ;;  %v1059_v20 = vmul.f32 %v3670_v18, %v5054_v45  ;;  %v1925_v37 = vsub.f32 %v1821_v26, %v3898_v59  ;;  %v5709_v35 = vld [vmem:[#allocation44_spill] sm:$0xff] }
 0x1fc   :  { %v2448_v22 = vmul.f32 %v4995_v32, %v1920_v56  ;;  %v1826_v58 = vmul.f32 %v5013_v53, %v1825_v15  ;;  %v975_v21 = vmax.f32 %v3650_v13, %v722_v4  ;;  %v1834_v63 = vand.u32 2147483648, %v4968_v43 }
 0x1fd   :  { %v2387_v62 = vmul.f32 %v2355_v7, %v2123_v47  ;;  %v1952_v42 = vunpack.c.1.s8 %v4973_v14  ;;  %v1334_v9 = vmul.f32 %v2737_v0, %v1206_v44  ;;  %vm948_vm1 = vcmp.eq.f32.partialorder %v3911_v28, 0.0 }
 0x1fe   :  { %v5087_v60 = vmul.f32 %v4899_v50, %v1924_v5  ;;  %v5090_v32 = vmul.f32 %v4965_v61, %v1925_v37  ;;  %v5092_v40 = vmul.f32 322.0637, %v2390_v17  ;;  %v1378_v27 = vsub.f32 %v3829_v57, %v1345_v6  ;;  %v5095_v38 = vpop.eup %2738 }
 0x1ff   :  { %vm1828_vm2 = vweird.f32 %v4968_v43  ;;  %vm5098_vm3 = vcmp.eq.f32.partialorder %v1832_v39, 8.507059e+37  ;;  %v5102_v34 = vmul.f32 322.0637, %v2375_v10  ;;  %v1254_v54 = vsub.f32 0.0, %v1059_v20  ;;  %v5139_v43 = vld [vmem:[%s5509_s5 + $0x38] sm:$0xff] }
 0x200   :  { %v2485_v50 = vadd.f32 %v2484_v1, %v2448_v22  ;;  %v1827_v5 = vadd.f32 %v5013_v53, %v1826_v58  ;;  %vm1829_vm4 = vweird.f32 %v5013_v53  ;;  %v5107_v61 = vmin.f32 %v3659_v46, %v975_v21  ;;  %v2233_v21 = vpop.permute.xlu0 %2232 }
 0x201   :  { %v1835_v15 = vor.u32 1.1754944e-38, %v1834_v63  ;;  %v5109_v24 = vmul.f32 322.0637, %v2387_v62  ;;  %v1984_v51 = vcvt.s32.f32 %v1952_v42  ;;  %v1367_v26 = vsub.f32 %v3829_v57, %v1334_v9  ;;  %vm5126_vm5 = vmor %vm1828_vm2, %vm1829_vm4 }
 0x202   :  { %v1599_v7 = vmul.f32 %v5095_v38, %v5044_v41  ;;  %v5115_v16 = vmul.f32 %v1378_v27, %v4924_v23  ;;  %v1041_v1 = vmul.f32 %v3670_v18, %v5107_v61  ;;  %v5710_v4 = vand.u32 2147483648, %v5704_v33 }
 0x203   :  { %v1607_v17 = vand.u32 2147483647, %v5044_v41  ;;  %v1609_v23 = vand.u32 2147483648, %v5044_v41  ;;  %v1093_v6 = vmul.f32 2.0, %v1059_v20  ;;  %v1315_v47 = vmul.f32 1.442695, %v1254_v54 }
 0x204   :  { %v770_v0 = vsel %vm768_vm0, %v5710_v4, %v5709_v35  ;;  %v2486_v39 = vadd.f32 %v2485_v50, %v4857_v30  ;;  %v1831_v10 = vsel %vm5126_vm5, %v5013_v53, %v1827_v5  ;;  %v1075_v33 = vmul.f32 2.0, %v1041_v1 }
 0x205   :  { %v1236_v44 = vsub.f32 0.0, %v1041_v1  ;;  %vm924_vm6 = vcmp.eq.f32.partialorder %v3733_v48, 0.0  ;;  %vm2016_vm7 = vcmp.gt.f32.partialorder %v1984_v51, 1.5  ;;  %vm2048_vm8 = vcmp.gt.f32.partialorder %v1984_v51, 0.5 }
 0x206   :  { %v5143_v37 = vmul.f32 %v1367_v26, %v4941_v8  ;;  %v979_v30 = vmax.f32 %v3650_v13, %v770_v0  ;;  %v1600_v22 = vsub.f32 1.0, %v1599_v7  ;;  %2740 = vrcp.f32 %v5115_v16 }
 0x207   :  { %v1107_v53 = vadd.f32 2.0, %v1075_v33  ;;  %v1279_v58 = vmul.f32 1.442695, %v1236_v44  ;;  %v1968_v63 = vunpack.c.1.s8 %v5139_v43  ;;  %v1125_v62 = vadd.f32 2.0, %v1093_v6 }
 0x208   :  { %2742 = vpow2.f32 %v1315_v47  ;;  %v1139_v42 = vmul.f32 %v1041_v1, %v1041_v1  ;;  %v1836_v9 = vsel %vm5098_vm3, %v1835_v15, %v1831_v10  ;;  %v2080_v27 = vsel %vm2048_vm8, 0.2, %v5587_v29  ;;  %v5713_v15 = vld [vmem:[#allocation23_spill] sm:$0xff] }
 0x209   :  { %v1157_v8 = vmul.f32 %v1059_v20, %v1059_v20  ;;  %2744 = vpow2.f32 %v1279_v58  ;;  %v950_v50 = vsel %vm948_vm1, %v949_v49, %v4581_v3  ;;  %v5158_v5 = vmin.f32 %v3659_v46, %v979_v30 }
 0x20a   :  { %2746 = vrcp.f32 %v5143_v37  ;;  %v1171_v54 = vadd.f32 %v1139_v42, %v1107_v53  ;;  %v1601_v26 = vmul.f32 %v5095_v38, %v1600_v22  ;;  %vm1603_vm9 = vweird.f32 %v5044_v41 }
 0x20b   :  { %v1610_v19 = vor.u32 1.1754944e-38, %v1609_v23  ;;  %v2344_v20 = vmul.f32 %v4567_v12, %v2233_v21  ;;  %vm756_vm10 = vcmp.eq.f32.partialorder %v5713_v15, 0.0  ;;  %v1926_v7 = vsub.f32 %v1836_v9, %v3898_v59  ;;  %v2774_v12 = vld [vmem:[%s5509_s5 + $0x10] sm:$0xff] }
 0x20c   :  { %v5166_v1 = vadd.f32 %v2486_v39, %v4949_v11  ;;  %v2000_v35 = vcvt.s32.f32 %v1968_v63  ;;  %v1189_v28 = vadd.f32 %v1157_v8, %v1125_v62  ;;  %v5168_v49 = vpop.eup %2740  ;;  %vm1604_vm11 = vweird.f32 %v5095_v38  ;;  %v2313_v63 = vpop.permute.xlu2 %2312 }
 0x20d   :  { %vm5171_vm12 = vcmp.eq.f32.partialorder %v1607_v17, 8.507059e+37  ;;  %v2112_v4 = vsel %vm2016_vm7, 1.0, %v2080_v27  ;;  %v1950_v0 = vunpack.c.3.s8 %v2774_v12  ;;  %v994_v11 = vmax.f32 %v3650_v13, %v950_v50  ;;  %vm5210_vm14 = vmor %vm1603_vm9, %vm1604_vm11 }
 0x20e   :  { %v2743_v56 = vpop.eup %2742  ;;  %v5181_v23 = vmul.f32 %v5092_v40, %v1926_v7  ;;  %v1787_v6 = vand.u32 2147483647, %v5115_v16  ;;  %v1204_v17 = vmul.f32 %v3777_v55, %v1171_v54  ;;  %v1045_v47 = vmul.f32 %v3670_v18, %v5158_v5 }
 0x20f   :  { %v2745_v51 = vpop.eup %2744  ;;  %v1602_v39 = vadd.f32 %v5095_v38, %v1601_v26  ;;  %v1789_v10 = vand.u32 2147483648, %v5115_v16  ;;  %v5190_v33 = vmin.f32 %v3659_v46, %v994_v11  ;;  %v5716_v44 = vand.u32 2147483648, %v3733_v48  ;;  %v5719_v11 = vld [vmem:[#allocation38_spill] sm:$0xff] }
 0x210   :  { %v5197_v30 = vpop.eup %2746  ;;  %v5199_v22 = vmul.f32 %v2344_v20, %v2112_v4  ;;  %vm2064_vm13 = vcmp.gt.f32.partialorder %v2000_v35, 0.5  ;;  %v1222_v53 = vmul.f32 %v3777_v55, %v1189_v28  ;;  %v1332_v58 = vmul.f32 %v2745_v51, %v1204_v17 }
 0x211   :  { %v926_v40 = vsel %vm924_vm6, %v5716_v44, %v4203_v25  ;;  %v1779_v21 = vmul.f32 %v5168_v49, %v5115_v16  ;;  %v1982_v62 = vcvt.s32.f32 %v1950_v0  ;;  %v1060_v42 = vmul.f32 %v3670_v18, %v5190_v33  ;;  %v2223_v44 = vpop.permute.xlu1 %2222 }
 0x212   :  { %v1240_v9 = vsub.f32 0.0, %v1045_v47  ;;  %vm2032_vm15 = vcmp.gt.f32.partialorder %v2000_v35, 1.5  ;;  %v1350_v25 = vmul.f32 %v2743_v56, %v1222_v53  ;;  %v1365_v27 = vsub.f32 %v3829_v57, %v1332_v58 }
 0x213   :  { %v992_v8 = vmax.f32 %v3650_v13, %v926_v40  ;;  %v1606_v54 = vsel %vm5210_vm14, %v5095_v38, %v1602_v39  ;;  %v5219_v50 = vor.u32 1.1754944e-38, %v1789_v10  ;;  %v1614_v26 = vmul.f32 %v5197_v30, %v5143_v37 }
 0x214   :  { %v1079_v41 = vmul.f32 2.0, %v1045_v47  ;;  %v2096_v20 = vsel %vm2064_vm13, 0.2, %v5587_v29  ;;  %v2360_v7 = vmul.f32 %v5019_v2, %v2313_v63  ;;  %v5227_v28 = vmul.f32 %v1365_v27, %v5107_v61  ;;  %v5257_v63 = vld [vmem:[%s5508_s4] ss:$0 sm:$0xff]  ;;  %s2819_s4 = smov [#allocation6]  }
 0x215   :  { %v1255_v4 = vsub.f32 0.0, %v1060_v42  ;;  %v1780_v12 = vsub.f32 1.0, %v1779_v21  ;;  %vm2046_vm0 = vcmp.gt.f32.partialorder %v1982_v62, 0.5  ;;  %v1287_v0 = vmul.f32 1.442695, %v1240_v9  ;;  %s2520_s30 = sshll.u32 %s2819_s4, 4  ;;  %s2521_s30 = int_to_ptr.vmem [resolvable:$true] %s2520_s30 }
 0x216   :  { %v5720_v38 = vand.u32 2147483648, %v5713_v15  ;;  %v5236_v17 = vsel %vm5171_vm12, %v1610_v19, %v1606_v54  ;;  %v1383_v51 = vsub.f32 %v3829_v57, %v1350_v25  ;;  %2748 = vrcp.f32 %v5227_v28 }
 0x217   :  { %v5241_v61 = vmin.f32 %v3659_v46, %v992_v8  ;;  %v1615_v39 = vsub.f32 1.0, %v1614_v26  ;;  %v2128_v10 = vsel %vm2032_vm15, 1.0, %v2096_v20  ;;  %v1094_v40 = vmul.f32 2.0, %v1060_v42 }
 0x218   :  { %v758_v56 = vsel %vm756_vm10, %v5720_v38, %v5719_v11  ;;  %v1111_v53 = vadd.f32 2.0, %v1079_v41  ;;  %vm1783_vm1 = vweird.f32 %v5115_v16  ;;  %vm1784_vm2 = vweird.f32 %v5168_v49 }
 0x219   :  { %vm2014_vm3 = vcmp.gt.f32.partialorder %v1982_v62, 1.5  ;;  %v2078_v19 = vsel %vm2046_vm0, 0.2, %v5587_v29  ;;  %v1317_v15 = vmul.f32 1.442695, %v1255_v4  ;;  %v1911_v3 = vsub.f32 %v5236_v17, %v3898_v59  ;;  %vm5288_vm8 = vmor %vm1783_vm1, %vm1784_vm2 }
 0x21a   :  { %v1781_v58 = vmul.f32 %v5168_v49, %v1780_v12  ;;  %v1143_v21 = vmul.f32 %v1045_v47, %v1045_v47  ;;  %2750 = vpow2.f32 %v1287_v0  ;;  %vm1618_vm4 = vweird.f32 %v5143_v37 }
 0x21b   :  { %v5252_v35 = vmul.f32 %v1383_v51, %v5054_v45  ;;  %v2342_v62 = vmul.f32 %v5257_v63, %v2223_v44  ;;  %v1058_v9 = vmul.f32 %v3670_v18, %v5241_v61  ;;  %v1616_v48 = vmul.f32 %v5197_v30, %v1615_v39 }
 0x21c   :  { %v2110_v25 = vsel %vm2014_vm3, 1.0, %v2078_v19  ;;  %v1126_v47 = vadd.f32 2.0, %v1094_v40  ;;  %v1175_v27 = vadd.f32 %v1143_v21, %v1111_v53  ;;  %v2749_v8 = vpop.eup %2748  ;;  %v1622_v54 = vand.u32 2147483647, %v5143_v37 }
 0x21d   :  { %v1624_v45 = vand.u32 2147483648, %v5143_v37  ;;  %2752 = vpow2.f32 %v1317_v15  ;;  %v978_v26 = vmax.f32 %v3650_v13, %v758_v56  ;;  %v1782_v41 = vadd.f32 %v5168_v49, %v1781_v58 }
 0x21e   :  { %vm5269_vm5 = vcmp.eq.f32.partialorder %v1787_v6, 8.507059e+37  ;;  %v2392_v4 = vmul.f32 %v2360_v7, %v2128_v10  ;;  %v1584_v12 = vmul.f32 %v2749_v8, %v5227_v28  ;;  %v1158_v0 = vmul.f32 %v1060_v42, %v1060_v42 }
 0x21f   :  { %vm960_vm6 = vcmp.eq.f32.partialorder %v3891_v31, 0.0  ;;  %vm1619_vm7 = vweird.f32 %v5197_v30  ;;  %2754 = vrcp.f32 %v5252_v35  ;;  %v2374_v11 = vmul.f32 %v2342_v62, %v2110_v25 }
 0x220   :  { %v1092_v38 = vmul.f32 2.0, %v1058_v9  ;;  %v2751_v56 = vpop.eup %2750  ;;  %v1617_v51 = vadd.f32 %v5197_v30, %v1616_v48  ;;  %v1585_v39 = vsub.f32 1.0, %v1584_v12  ;;  %v1190_v6 = vadd.f32 %v1158_v0, %v1126_v47  ;;  %vm5303_vm11 = vmor %vm1618_vm4, %vm1619_vm7 }
 0x221   :  { %v1208_v44 = vmul.f32 %v3777_v55, %v1175_v27  ;;  %v1592_v7 = vand.u32 2147483647, %v5227_v28  ;;  %v1594_v10 = vand.u32 2147483648, %v5227_v28  ;;  %v1253_v42 = vsub.f32 0.0, %v1058_v9 }
 0x222   :  { %v5282_v40 = vmin.f32 %v3659_v46, %v978_v26  ;;  %vm5292_vm9 = vcmp.eq.f32.partialorder %v1622_v54, 8.507059e+37  ;;  %v1586_v15 = vmul.f32 %v2749_v8, %v1585_v39  ;;  %vm1589_vm10 = vweird.f32 %v2749_v8 }
 0x223   :  { %v1336_v58 = vmul.f32 %v2751_v56, %v1208_v44  ;;  %v2753_v21 = vpop.eup %2752  ;;  %v1786_v62 = vsel %vm5288_vm8, %v5168_v49, %v1782_v41  ;;  %v2406_v48 = vmul.f32 322.0637, %v2374_v11  ;;  %v1124_v25 = vadd.f32 2.0, %v1092_v38 }
 0x224   :  { %v1313_v47 = vmul.f32 1.442695, %v1253_v42  ;;  %v1621_v27 = vsel %vm5303_vm11, %v5197_v30, %v1617_v51  ;;  %v1587_v54 = vadd.f32 %v2749_v8, %v1586_v15  ;;  %vm1588_vm12 = vweird.f32 %v5227_v28 }
 0x225   :  { %v1223_v49 = vmul.f32 %v3777_v55, %v1190_v6  ;;  %v5312_v26 = vpop.eup %2754  ;;  %vm1590_vm13 = vmor %vm1588_vm12, %vm1589_vm10  ;;  %vm1593_vm14 = vcmp.eq.f32.partialorder %v1592_v7, 8.507059e+37  ;;  %v1595_v37 = vor.u32 1.1754944e-38, %v1594_v10  ;;  %v1156_v41 = vmul.f32 %v1058_v9, %v1058_v9 }
 0x226   :  { %v1044_v12 = vmul.f32 %v3670_v18, %v5282_v40  ;;  %v1591_v0 = vsel %vm1590_vm13, %v2749_v8, %v1587_v54  ;;  %v1369_v38 = vsub.f32 %v3829_v57, %v1336_v58  ;;  %2756 = vpow2.f32 %v1313_v47 }
 0x227   :  { %v1351_v11 = vmul.f32 %v2753_v21, %v1223_v49  ;;  %v1791_v30 = vsel %vm5269_vm5, %v5219_v50, %v1786_v62  ;;  %v1625_v28 = vor.u32 1.1754944e-38, %v1624_v45  ;;  %v1596_v56 = vsel %vm1593_vm14, %v1595_v37, %v1591_v0 }
 0x228   :  { %v1188_v51 = vadd.f32 %v1156_v41, %v1124_v25  ;;  %v1854_v39 = vmul.f32 %v5312_v26, %v5252_v35  ;;  %v1910_v9 = vsub.f32 %v1596_v56, %v3898_v59  ;;  %v1969_v6 = vunpack.c.2.s8 %v5139_v43 }
 0x229   :  { %v5729_v8 = vand.u32 2147483648, %v3891_v31  ;;  %v2439_v50 = vmul.f32 %v5102_v34, %v1911_v3  ;;  %v1626_v45 = vsel %vm5292_vm9, %v1625_v28, %v1621_v27  ;;  %v2408_v20 = vmul.f32 322.0637, %v5199_v22 }
 0x22a   :  { %v1078_v7 = vmul.f32 2.0, %v1044_v12  ;;  %v5336_v10 = vmul.f32 322.0637, %v2392_v4  ;;  %v2438_v42 = vmul.f32 %v2406_v48, %v1910_v9  ;;  %v1384_v53 = vsub.f32 %v3829_v57, %v1351_v11 }
 0x22b   :  { %v962_v44 = vsel %vm960_vm6, %v5729_v8, %v4303_v52  ;;  %v5340_v15 = vmul.f32 %v1369_v38, %v5158_v5  ;;  %v1923_v31 = vsub.f32 %v1791_v30, %v3898_v59  ;;  %v1221_v52 = vmul.f32 %v3777_v55, %v1188_v51 }
 0x22c   :  { %v1239_v17 = vsub.f32 0.0, %v1044_v12  ;;  %v995_v34 = vmax.f32 %v3650_v13, %v962_v44  ;;  %v2757_v3 = vpop.eup %2756  ;;  %v1912_v19 = vsub.f32 %v1626_v45, %v3898_v59  ;;  %v1855_v22 = vsub.f32 1.0, %v1854_v39 }
 0x22d   :  { %v2470_v4 = vadd.f32 %v4654_v36, %v2438_v42  ;;  %v2001_v58 = vcvt.s32.f32 %v1969_v6  ;;  %v1954_v21 = vunpack.c.3.s8 %v4973_v14  ;;  %v1349_v62 = vmul.f32 %v2757_v3, %v1221_v52 }
 0x22e   :  { %v1110_v16 = vadd.f32 2.0, %v1078_v7  ;;  %v1285_v5 = vmul.f32 1.442695, %v1239_v17  ;;  %v5349_v25 = vmul.f32 %v1384_v53, %v5190_v33  ;;  %2758 = vrcp.f32 %v5340_v15 }
 0x22f   :  { %v2471_v48 = vadd.f32 %v2470_v4, %v2439_v50  ;;  %v5353_v13 = vmin.f32 %v3659_v46, %v995_v34  ;;  %v2440_v47 = vmul.f32 %v2408_v20, %v1912_v19  ;;  %v1967_v27 = vunpack.c.0.s8 %v5139_v43 }
 0x230   :  { %v1382_v36 = vsub.f32 %v3829_v57, %v1349_v62  ;;  %v1142_v54 = vmul.f32 %v1044_v12, %v1044_v12  ;;  %v2451_v49 = vmul.f32 %v5109_v24, %v1923_v31  ;;  %v1856_v37 = vmul.f32 %v5312_v26, %v1855_v22  ;;  %v2318_v12 = vpop.permute.xlu0 %2317 }
 0x231   :  { %vm2065_vm15 = vcmp.gt.f32.partialorder %v2001_v58, 0.5  ;;  %2760 = vpow2.f32 %v1285_v5  ;;  %v1986_v41 = vcvt.s32.f32 %v1954_v21  ;;  %v5362_v11 = vadd.f32 %v2471_v48, %v2440_v47 }
 0x232   :  { %v5360_v33 = vmul.f32 %v1382_v36, %v5241_v61  ;;  %v1174_v0 = vadd.f32 %v1142_v54, %v1110_v16  ;;  %vm1858_vm0 = vweird.f32 %v5252_v35  ;;  %v1864_v46 = vand.u32 2147483648, %v5252_v35 }
 0x233   :  { %2762 = vrcp.f32 %v5349_v25  ;;  %v1061_v24 = vmul.f32 %v3670_v18, %v5353_v13  ;;  %vm2033_vm1 = vcmp.gt.f32.partialorder %v2001_v58, 1.5  ;;  %v2097_v38 = vsel %vm2065_vm15, 0.2, %v5587_v29  ;;  %v2308_v18 = vpop.permute.xlu1 %2307 }
 0x234   :  { %v1999_v30 = vcvt.s32.f32 %v1967_v27  ;;  %2764 = vrcp.f32 %v5360_v33  ;;  %v5371_v61 = vpop.eup %2758  ;;  %v2488_v28 = vadd.f32 %v5166_v1, %v2451_v49  ;;  %v1862_v56 = vand.u32 2147483647, %v5252_v35  ;;  %v2243_v1 = vpop.permute.xlu2 %2242 }
 0x235   :  { %v1953_v51 = vunpack.c.2.s8 %v4973_v14  ;;  %v1095_v39 = vmul.f32 2.0, %v1061_v24  ;;  %v1857_v9 = vadd.f32 %v5312_v26, %v1856_v37  ;;  %vm1859_vm2 = vweird.f32 %v5312_v26 }
 0x236   :  { %vm2050_vm3 = vcmp.gt.f32.partialorder %v1986_v41, 0.5  ;;  %v1207_v6 = vmul.f32 %v3777_v55, %v1174_v0  ;;  %v1865_v44 = vor.u32 1.1754944e-38, %v1864_v46  ;;  %v2129_v50 = vsel %vm2033_vm1, 1.0, %v2097_v38  ;;  %vm5389_vm5 = vmor %vm1858_vm0, %vm1859_vm2 }
 0x237   :  { %v2761_v8 = vpop.eup %2760  ;;  %v2361_v45 = vmul.f32 %v5019_v2, %v2318_v12  ;;  %v1256_v20 = vsub.f32 0.0, %v1061_v24  ;;  %v1644_v14 = vmul.f32 %v5371_v61, %v5340_v15  ;;  %vm2063_vm4 = vcmp.gt.f32.partialorder %v1999_v30, 0.5 }
 0x238   :  { %v1335_v7 = vmul.f32 %v2761_v8, %v1207_v6  ;;  %v1127_v42 = vadd.f32 2.0, %v1095_v39  ;;  %vm2018_vm6 = vcmp.gt.f32.partialorder %v1986_v41, 1.5  ;;  %v2082_v52 = vsel %vm2050_vm3, 0.2, %v5587_v29 }
 0x239   :  { %v5383_v53 = vpop.eup %2762  ;;  %v1985_v17 = vcvt.s32.f32 %v1953_v51  ;;  %v1319_v34 = vmul.f32 1.442695, %v1256_v20  ;;  %v1861_v19 = vsel %vm5389_vm5, %v5312_v26, %v1857_v9  ;;  %v2346_v22 = vmul.f32 %v5257_v63, %v2243_v1 }
 0x23a   :  { %v5395_v3 = vpop.eup %2764  ;;  %v1368_v35 = vsub.f32 %v3829_v57, %v1335_v7  ;;  %v1159_v4 = vmul.f32 %v1061_v24, %v1061_v24  ;;  %vm2031_vm7 = vcmp.gt.f32.partialorder %v1999_v30, 1.5  ;;  %v2095_v21 = vsel %vm2063_vm4, 0.2, %v5587_v29 }
 0x23b   :  { %v1839_v58 = vmul.f32 %v5395_v3, %v5360_v33  ;;  %2766 = vpow2.f32 %v1319_v34  ;;  %v1645_v62 = vsub.f32 1.0, %v1644_v14  ;;  %v2114_v16 = vsel %vm2018_vm6, 1.0, %v2082_v52  ;;  %v2238_v46 = vpop.permute.xlu1 %2237 }
 0x23c   :  { %v5407_v5 = vmul.f32 %v1368_v35, %v5282_v40  ;;  %v1191_v48 = vadd.f32 %v1159_v4, %v1127_v42  ;;  %v1869_v26 = vmul.f32 %v5383_v53, %v5349_v25  ;;  %v2359_v27 = vmul.f32 %v5019_v2, %v2308_v18 }
 0x23d   :  { %v1840_v47 = vsub.f32 1.0, %v1839_v58  ;;  %vm2049_vm8 = vcmp.gt.f32.partialorder %v1985_v17, 0.5  ;;  %v2489_v36 = vadd.f32 %v2488_v28, %v5087_v60  ;;  %vm1863_vm9 = vcmp.eq.f32.partialorder %v1862_v56, 8.507059e+37 }
 0x23e   :  { %v2127_v54 = vsel %vm2031_vm7, 1.0, %v2095_v21  ;;  %2768 = vrcp.f32 %v5407_v5  ;;  %v5414_v49 = vsel %vm1863_vm9, %v1865_v44, %v1861_v19  ;;  %v5416_v37 = vmul.f32 %v2361_v45, %v2129_v50 }
 0x23f   :  { %v5418_v40 = vmul.f32 %v2346_v22, %v2114_v16  ;;  %v1841_v41 = vmul.f32 %v5395_v3, %v1840_v47  ;;  %v1646_v0 = vmul.f32 %v5371_v61, %v1645_v62  ;;  %vm2017_vm10 = vcmp.gt.f32.partialorder %v1985_v17, 1.5 }
 0x240   :  { %v2081_v24 = vsel %vm2049_vm8, 0.2, %v5587_v29  ;;  %v1224_v60 = vmul.f32 %v3777_v55, %v1191_v48  ;;  %v1870_v38 = vsub.f32 1.0, %v1869_v26  ;;  %v1877_v30 = vand.u32 2147483647, %v5349_v25 }
 0x241   :  { %v2767_v12 = vpop.eup %2766  ;;  %v1879_v28 = vand.u32 2147483648, %v5349_v25  ;;  %v2391_v56 = vmul.f32 %v2359_v27, %v2127_v54  ;;  %v1842_v51 = vadd.f32 %v5395_v3, %v1841_v41  ;;  %vm1844_vm11 = vweird.f32 %v5395_v3 }
 0x242   :  { %v1970_v39 = vunpack.c.3.s8 %v5139_v43  ;;  %v1352_v9 = vmul.f32 %v2767_v12, %v1224_v60  ;;  %vm1649_vm12 = vweird.f32 %v5371_v61  ;;  %v1849_v18 = vand.u32 2147483648, %v5360_v33 }
 0x243   :  { %v2113_v6 = vsel %vm2017_vm10, 1.0, %v2081_v24  ;;  %v2345_v55 = vmul.f32 %v5257_v63, %v2238_v46  ;;  %vm1873_vm13 = vweird.f32 %v5349_v25  ;;  %v1647_v44 = vadd.f32 %v5371_v61, %v1646_v0  ;;  %v2323_v26 = vpop.permute.xlu1 %2322 }
 0x244   :  { %v2769_v8 = vpop.eup %2768  ;;  %vm1843_vm14 = vweird.f32 %v5360_v33  ;;  %v1847_v50 = vand.u32 2147483647, %v5360_v33  ;;  %v1385_v45 = vsub.f32 %v3829_v57, %v1352_v9  ;;  %vm1648_vm15 = vweird.f32 %v5340_v15 }
 0x245   :  { %v1652_v43 = vand.u32 2147483647, %v5340_v15  ;;  %v1654_v1 = vand.u32 2147483648, %v5340_v15  ;;  %vm5442_vm0 = vmor %vm1843_vm14, %vm1844_vm11  ;;  %v1629_v20 = vmul.f32 %v2769_v8, %v5407_v5  ;;  %v1871_v14 = vmul.f32 %v5383_v53, %v1870_v38 }
 0x246   :  { %v1846_v57 = vsel %vm5442_vm0, %v5395_v3, %v1842_v51  ;;  %v2002_v33 = vcvt.s32.f32 %v1970_v39  ;;  %v5452_v7 = vmul.f32 %v1385_v45, %v5353_v13  ;;  %vm5456_vm1 = vmor %vm1648_vm15, %vm1649_vm12  ;;  %v1850_v42 = vor.u32 1.1754944e-38, %v1849_v18 }
 0x247   :  { %v2423_v31 = vmul.f32 322.0637, %v2391_v56  ;;  %v1630_v52 = vsub.f32 1.0, %v1629_v20  ;;  %v2377_v17 = vmul.f32 %v2345_v55, %v2113_v6  ;;  %v1651_v34 = vsel %vm5456_vm1, %v5371_v61, %v1647_v44 }
 0x248   :  { %vm1848_vm2 = vcmp.eq.f32.partialorder %v1847_v50, 8.507059e+37  ;;  %v1639_v3 = vand.u32 2147483648, %v5407_v5  ;;  %2770 = vrcp.f32 %v5452_v7  ;;  %vm1634_vm3 = vweird.f32 %v2769_v8 }
 0x249   :  { %v1851_v13 = vsel %vm1848_vm2, %v1850_v42, %v1846_v57  ;;  %v1631_v19 = vmul.f32 %v2769_v8, %v1630_v52  ;;  %v1637_v22 = vand.u32 2147483647, %v5407_v5  ;;  %v1872_v35 = vadd.f32 %v5383_v53, %v1871_v14 }
 0x24a   :  { %vm1874_vm4 = vweird.f32 %v5383_v53  ;;  %v1655_v4 = vor.u32 1.1754944e-38, %v1654_v1  ;;  %vm2066_vm5 = vcmp.gt.f32.partialorder %v2002_v33, 0.5  ;;  %vm1653_vm6 = vcmp.eq.f32.partialorder %v1652_v43, 8.507059e+37 }
 0x24b   :  { %v2490_v58 = vadd.f32 %v2489_v36, %v5090_v32  ;;  %v1632_v61 = vadd.f32 %v2769_v8, %v1631_v19  ;;  %vm1633_vm7 = vweird.f32 %v5407_v5  ;;  %v1927_v62 = vsub.f32 %v1851_v13, %v3898_v59  ;;  %vm5473_vm9 = vmor %vm1873_vm13, %vm1874_vm4  ;;  %v2459_v19 = vld [vmem:[#allocation2] sm:$0x3] }
 0x24c   :  { %v1656_v21 = vsel %vm1653_vm6, %v1655_v4, %v1651_v34  ;;  %vm1635_vm8 = vmor %vm1633_vm7, %vm1634_vm3  ;;  %v1640_v16 = vor.u32 1.1754944e-38, %v1639_v3  ;;  %v2409_v48 = vmul.f32 322.0637, %v2377_v17  ;;  %vm1638_vm10 = vcmp.eq.f32.partialorder %v1637_v22, 8.507059e+37 }
 0x24d   :  { %v1636_v27 = vsel %vm1635_vm8, %v2769_v8, %v1632_v61  ;;  %vm2034_vm11 = vcmp.gt.f32.partialorder %v2002_v33, 1.5  ;;  %v2098_v32 = vsel %vm2066_vm5, 0.2, %v5587_v29  ;;  %v1876_v5 = vsel %vm5473_vm9, %v5383_v53, %v1872_v35 }
 0x24e   :  { %v2771_v36 = vpop.eup %2770  ;;  %v2410_v54 = vmul.f32 322.0637, %v5418_v40  ;;  %v2455_v41 = vmul.f32 %v2423_v31, %v1927_v62  ;;  %v1641_v0 = vsel %vm1638_vm10, %v1640_v16, %v1636_v27  ;;  %v1880_v46 = vor.u32 1.1754944e-38, %v1879_v28 }
 0x24f   :  { %v1913_v24 = vsub.f32 %v1641_v0, %v3898_v59  ;;  %v1884_v60 = vmul.f32 %v2771_v36, %v5452_v7  ;;  %v2362_v12 = vmul.f32 %v5019_v2, %v2323_v26  ;;  %vm1878_vm12 = vcmp.eq.f32.partialorder %v1877_v30, 8.507059e+37 }
 0x250   :  { %v1914_v29 = vsub.f32 %v1656_v21, %v3898_v59  ;;  %v2491_v53 = vadd.f32 %v2490_v58, %v5181_v23  ;;  %v2130_v38 = vsel %vm2034_vm11, 1.0, %v2098_v32  ;;  %v1928_v40 = vsub.f32 %v5414_v49, %v3898_v59 }
 0x251   :  { %v1881_v56 = vsel %vm1878_vm12, %v1880_v46, %v1876_v5  ;;  %v2441_v51 = vmul.f32 %v2409_v48, %v1913_v24  ;;  %v1885_v28 = vsub.f32 1.0, %v1884_v60  ;;  %v1892_v18 = vand.u32 2147483647, %v5452_v7 }
 0x252   :  { %v2442_v39 = vmul.f32 %v2410_v54, %v1914_v29  ;;  %v2492_v9 = vadd.f32 %v2491_v53, %v2455_v41  ;;  %v1894_v2 = vand.u32 2147483648, %v5452_v7  ;;  %vm1889_vm13 = vweird.f32 %v2771_v36 }
 0x253   :  { %v2473_v25 = vadd.f32 %v5362_v11, %v2441_v51  ;;  %v1886_v30 = vmul.f32 %v2771_v36, %v1885_v28  ;;  %v2394_v6 = vmul.f32 %v2362_v12, %v2130_v38  ;;  %v2425_v23 = vmul.f32 322.0637, %v5416_v37 }
 0x254   :  { %v2456_v55 = vmul.f32 %v5336_v10, %v1928_v40  ;;  %vm1888_vm14 = vweird.f32 %v5452_v7  ;;  %v1929_v44 = vsub.f32 %v1881_v56, %v3898_v59  ;;  %vm1893_vm0 = vcmp.eq.f32.partialorder %v1892_v18, 8.507059e+37 }
 0x255   :  { %v2474_v8 = vadd.f32 %v2473_v25, %v2442_v39  ;;  %v1887_v49 = vadd.f32 %v2771_v36, %v1886_v30  ;;  %vm1890_vm15 = vmor %vm1888_vm14, %vm1889_vm13  ;;  %v1895_v50 = vor.u32 1.1754944e-38, %v1894_v2  ;;  %v2426_v11 = vmul.f32 322.0637, %v2394_v6 }
 0x256   :  { %v2493_v45 = vadd.f32 %v2492_v9, %v2456_v55  ;;  %v2457_v20 = vmul.f32 %v2425_v23, %v1929_v44  ;;  %vm2504_vm1 = vcmask 1041409   ;;  %vm2510_vm2 = vcmask 1041408  }
 0x257   :  { %v2475_v43 = vrot.slane %v2474_v8, 4  ;;  %v1891_v1 = vsel %vm1890_vm15, %v2771_v36, %v1887_v49 }
 0x258   :  { %v1896_v63 = vsel %vm1893_vm0, %v1895_v50, %v1891_v1  ;;  %v2494_v10 = vadd.f32 %v2493_v45, %v2457_v20 }
 0x259   :  { %v2476_v14 = vadd.f32 %v2475_v43, %v2474_v8  ;;  %v1930_v37 = vsub.f32 %v1896_v63, %v3898_v59 }
 0x25b   :  { %v2458_v57 = vmul.f32 %v2426_v11, %v1930_v37  ;;  %v2477_v33 = vrot.slane %v2476_v14, 2 }
 0x25d   :  { %v2495_v15 = vadd.f32 %v2494_v10, %v2458_v57  ;;  %v2478_v7 = vadd.f32 %v2477_v33, %v2476_v14 }
 0x25f   :  { %v2496_v42 = vrot.slane %v2495_v15, 4  ;;  %v2479_v17 = vrot.slane %v2478_v7, 1 }
 0x261   :  { %v2497_v31 = vadd.f32 %v2496_v42, %v2495_v15  ;;  %v2480_v13 = vadd.f32 %v2479_v17, %v2478_v7 }
 0x263   :  { %v2498_v52 = vrot.slane %v2497_v31, 2 }
 0x265   :  { %v2499_v34 = vadd.f32 %v2498_v52, %v2497_v31 }
 0x267   :  { %v2500_v3 = vrot.slane %v2499_v34, 1 }
 0x269   :  { %v2501_v22 = vadd.f32 %v2500_v3, %v2499_v34 }
 0x26b   :  { %v2505_v35 = vsel %vm2504_vm1, %v2501_v22, %v2480_v13 }
 0x26c   :  { %v2507_v4 = vadd.f32 %v2505_v35, %v2459_v19 }
 0x26e   :  { %2508 = vst [vmem:[#allocation2] sm:$0x3] %v2507_v4 }
 0x275   :  { %v2509_v59 = vld [vmem:[#allocation2] sm:$0x3] }
 0x276   :  { %v2511_v58 = vsel %vm2510_vm2, %v2509_v59, 0.0 }
 0x277   :  { %2512 = vadd.xlane.f32.xlu0 %v2511_v58 }
 0x2ea   :  { %v2513_v61 = vpop.xlane.xlu0 %2512 }
 0x2eb   :  { %2514 = vst [vmem:[#allocation6] sm:$0x3] %v2513_v61 }
 0x2ec   :  { %2525 = dma.vmem_to_hbm [thread:$0]  %s2521_s30, 32, %s2523_s8, [#allocation4]  }
 0x2ed   :  { %2814 = dma.done.wait [#allocation4], 32  }
 0x2ee   :  { %2815 = vsyncadd [#allocation4], 4294967264 }
 0x2ef   :  { %2530 = vsyncpa [#allocation4], 1 }
 0x2f0   :  { %2531 = vsyncpa [#allocation5], 1 }

</bundles_post_ra>
